<compile_context>
chip_gen: v7x
topology: tpu7x:2x2x1
jax: 0.10.0
libtpu: 0.0.40
codegen_flags: <defaults>
</compile_context>

<pallas_src>
import functools

import jax
import jax.numpy as jnp
from jax.experimental import pallas as pl
from jax.experimental.pallas import tpu as pltpu

LANE = 128  # lane-dense output width


def _round_up(x, m):
    return (x + m - 1) // m * m


# ----------------------------- Pallas kernels ------------------------------


def conv_relu_pool_kernel(p_ref, w_ref, b_ref, o_ref):
    # p_ref: (4, TM, K) bf16 -- 4 = the 2x2 pool-window positions
    # w_ref: (K, 128) bf16, b_ref: (1, 128) f32, o_ref: (TM, 128) bf16
    w = w_ref[...]
    # Incremental max-fold: one live f32 accumulator instead of four.
    m = jnp.dot(p_ref[0], w, preferred_element_type=jnp.float32)
    m = jnp.maximum(m, jnp.dot(p_ref[1], w, preferred_element_type=jnp.float32))
    m = jnp.maximum(m, jnp.dot(p_ref[2], w, preferred_element_type=jnp.float32))
    m = jnp.maximum(m, jnp.dot(p_ref[3], w, preferred_element_type=jnp.float32))
    # bias + ReLU commute with the pool max (per-channel bias, monotone ReLU)
    o_ref[...] = jnp.maximum(m + b_ref[...], 0.0).astype(o_ref.dtype)


def mlp_kernel(x_ref, w1_ref, b1_ref, w2_ref, b2_ref, o_ref):
    # Fused fc1(ReLU) + fc2; z stays on-chip (no HBM round-trip).
    z = jnp.dot(x_ref[...], w1_ref[...], preferred_element_type=jnp.float32)
    z = jnp.maximum(z + b1_ref[...], 0.0).astype(jnp.bfloat16)
    y = jnp.dot(z, w2_ref[...], preferred_element_type=jnp.float32)
    o_ref[...] = y + b2_ref[...]


# ----------------------------- kernel wrappers ------------------------------


def conv_relu_pool(patches, w, b, *, max_tile=512):
    # patches: (4, M, K) bf16, w: (K, 128) bf16, b: (1, 128) f32 -> (M, 128) bf16
    _, m, k = patches.shape
    cout = w.shape[1]
    tm = min(max_tile, _round_up(m, 32))
    mp = _round_up(m, tm)
    if mp != m:
        patches = jnp.pad(patches, ((0, 0), (0, mp - m), (0, 0)))
    out = pl.pallas_call(
        conv_relu_pool_kernel,
        out_shape=jax.ShapeDtypeStruct((mp, cout), jnp.bfloat16),
        grid_spec=pltpu.PrefetchScalarGridSpec(
            num_scalar_prefetch=0,
            grid=(mp // tm,),
            in_specs=[
                pl.BlockSpec((4, tm, k), lambda i: (0, i, 0)),
                pl.BlockSpec((k, cout), lambda i: (0, 0)),   # resident weight
                pl.BlockSpec((1, cout), lambda i: (0, 0)),   # resident bias
            ],
            out_specs=pl.BlockSpec((tm, cout), lambda i: (i, 0)),
        ),
        compiler_params=pltpu.CompilerParams(
            dimension_semantics=("parallel",)),
    )(patches, w, b)
    return out[:m]


def mlp(x, w1, b1, w2, b2, *, max_tile=256):
    # x: (N, K1) bf16; w1: (K1, H) bf16; w2: (H, 128) bf16 -> (N, 128) f32
    n, k1 = x.shape
    h = w1.shape[1]
    cout = w2.shape[1]
    tb = min(max_tile, _round_up(n, 8))
    np_ = _round_up(n, tb)
    if np_ != n:
        x = jnp.pad(x, ((0, np_ - n), (0, 0)))
    out = pl.pallas_call(
        mlp_kernel,
        out_shape=jax.ShapeDtypeStruct((np_, cout), jnp.float32),
        grid_spec=pltpu.PrefetchScalarGridSpec(
            num_scalar_prefetch=0,
            grid=(np_ // tb,),
            in_specs=[
                pl.BlockSpec((tb, k1), lambda i: (i, 0)),
                pl.BlockSpec((k1, h), lambda i: (0, 0)),
                pl.BlockSpec((1, h), lambda i: (0, 0)),
                pl.BlockSpec((h, cout), lambda i: (0, 0)),
                pl.BlockSpec((1, cout), lambda i: (0, 0)),
            ],
            out_specs=pl.BlockSpec((tb, cout), lambda i: (i, 0)),
        ),
        compiler_params=pltpu.CompilerParams(
            dimension_semantics=("parallel",)),
    )(x, w1, b1, w2, b2)
    return out[:n]


# -------------------------------- JAX glue ---------------------------------


def im2col(x, k):
    # x: (N, H, W, C) -> (N, OH, OW, C*k*k); feature order [c][kh][kw]
    # matches PyTorch conv weight.reshape(Cout, Cin*K*K).
    n, h, w, c = x.shape
    oh, ow = h - k + 1, w - k + 1
    cols = []
    for dy in range(k):
        for dx in range(k):
            cols.append(x[:, dy:dy + oh, dx:dx + ow, :])
    p = jnp.stack(cols, axis=-1)  # (N, OH, OW, C, k*k)
    return p.reshape(n, oh, ow, c * k * k)


def pool_group(p):
    # p: (N, OH, OW, F) -> (4, N*(OH//2)*(OW//2), F); rows grouped by
    # 2x2 max-pool window (pool position on the leading axis).
    n, oh, ow, f = p.shape
    ph, pw = oh // 2, ow // 2
    p = p.reshape(n, ph, 2, pw, 2, f)
    p = p.transpose(2, 4, 0, 1, 3, 5)  # (2, 2, N, PH, PW, F)
    return p.reshape(4, n * ph * pw, f)


def init_params(key, dataset="mnist"):
    config = {"mnist": (1, 1024, 10), "fmnist": (1, 1024, 10),
              "cifar10": (3, 1600, 10), "cifar100": (3, 1600, 100)}
    cin, feat_dim, num_classes = config[dataset]
    ks = jax.random.split(key, 8)

    def u(k, shape, fan_in):
        bound = 1.0 / jnp.sqrt(jnp.float32(fan_in))
        return jax.random.uniform(k, shape, jnp.float32, -bound, bound)

    def pad_cols(a):
        return jnp.pad(a, ((0, 0), (0, LANE - a.shape[1])))

    # conv weights stored as (Cin*K*K, Cout) im2col matrices, Cout padded to
    # 128 lanes with zeros (sliced off after the kernel); weights in bf16,
    # biases in f32.
    return {
        "conv1_w": pad_cols(u(ks[0], (cin * 25, 32), cin * 25)).astype(jnp.bfloat16),
        "conv1_b": pad_cols(u(ks[1], (1, 32), cin * 25)),
        "conv2_w": pad_cols(u(ks[2], (32 * 25, 64), 32 * 25)).astype(jnp.bfloat16),
        "conv2_b": pad_cols(u(ks[3], (1, 64), 32 * 25)),
        "fc1_w":   u(ks[4], (feat_dim, 512), feat_dim).astype(jnp.bfloat16),
        "fc1_b":   u(ks[5], (1, 512), feat_dim),
        "fc2_w":   pad_cols(u(ks[6], (512, num_classes), 512)).astype(jnp.bfloat16),
        "fc2_b":   pad_cols(u(ks[7], (1, num_classes), 512)),
    }


@functools.partial(jax.jit, static_argnames=("num_classes",))
def fedavg_cnn_forward(params, x_nchw, num_classes=10):
    # x_nchw: (N, C, H, W) like the PyTorch module.
    x = jnp.transpose(x_nchw, (0, 2, 3, 1)).astype(jnp.bfloat16)  # -> NHWC bf16
    n, h, _, _ = x.shape

    # conv1 (5x5, valid) + ReLU + MaxPool(2)
    ph1 = (h - 4) // 2
    p1 = pool_group(im2col(x, 5))                                   # (4, N*ph1*ph1, Cin*25)
    h1 = conv_relu_pool(p1, params["conv1_w"], params["conv1_b"])   # (N*ph1*ph1, 128)
    h1 = h1[:, :32].reshape(n, ph1, ph1, 32)

    # conv2 (5x5, valid) + ReLU + MaxPool(2)
    # TODO(synk): extract the conv2 im2col patches inside the kernel (DMA h1
    # blocks directly) instead of materializing p2 in HBM via XLA glue.
    ph2 = (ph1 - 4) // 2
    p2 = pool_group(im2col(h1, 5))                                  # (4, N*ph2*ph2, 800)
    h2 = conv_relu_pool(p2, params["conv2_w"], params["conv2_b"])   # (N*ph2*ph2, 128)
    h2 = h2[:, :64].reshape(n, ph2, ph2, 64)

    # flatten exactly like PyTorch (NCHW order)
    feat = jnp.transpose(h2, (0, 3, 1, 2)).reshape(n, -1)           # (N, feat_dim) bf16

    logits = mlp(feat, params["fc1_w"], params["fc1_b"],
                 params["fc2_w"], params["fc2_b"])                  # (N, 128) f32
    return logits[:, :num_classes]


if __name__ == "__main__":
    key = jax.random.PRNGKey(0)
    pkey, xkey = jax.random.split(key)
    params = init_params(pkey, dataset="mnist")
    # mnist config requires 28x28 single-channel input so the flattened
    # feature size is exactly 1024 (= 64 * 4 * 4) as Linear(1024, 512) expects.
    x = jax.random.normal(xkey, (2, 1, 28, 28), jnp.float32)
    logits = fedavg_cnn_forward(params, x, num_classes=10)
    jax.block_until_ready(logits)
    assert logits.shape == (2, 10) and logits.dtype == jnp.float32
    print("KERNEL_OK")
</pallas_src>

<mosaic_0001>
module attributes {stable_mosaic.version = 11 : i64} {
  func.func @conv_relu_pool_kernel(%arg0: i32, %arg1: memref<4x288x25xbf16, #tpu.memory_space<vmem>>, %arg2: memref<25x128xbf16, #tpu.memory_space<vmem>>, %arg3: memref<1x128xf32, #tpu.memory_space<vmem>>, %arg4: memref<288x128xbf16, #tpu.memory_space<vmem>>) attributes {dimension_semantics = [#tpu.dimension_semantics<parallel>], iteration_bounds = array<i64: 1>, scalar_prefetch = 0 : i64, scratch_operands = 0 : i64, tpu.core_type = #tpu.core_type<tc>, window_params = [{transform_indices = @transform_0, window_bounds = array<i64: 4, 288, 25>}, {pipeline_mode = #tpu.pipeline_mode<synchronous>, transform_indices = @transform_1, window_bounds = array<i64: 25, 128>}, {pipeline_mode = #tpu.pipeline_mode<synchronous>, transform_indices = @transform_2, window_bounds = array<i64: 1, 128>}, {transform_indices = @transform_3, window_bounds = array<i64: 288, 128>}]} {
    %c0 = arith.constant 0 : index
    %c0_0 = arith.constant 0 : index
    %0 = vector.load %arg2[%c0, %c0_0] : memref<25x128xbf16, #tpu.memory_space<vmem>>, vector<25x128xbf16>
    %c0_1 = arith.constant 0 : index
    %c0_2 = arith.constant 0 : index
    %c0_3 = arith.constant 0 : index
    %1 = vector.load %arg1[%c0_1, %c0_2, %c0_3] : memref<4x288x25xbf16, #tpu.memory_space<vmem>>, vector<1x288x25xbf16>
    %2 = vector.shape_cast %1 : vector<1x288x25xbf16> to vector<288x25xbf16>
    %cst = arith.constant dense<0.000000e+00> : vector<288x128xf32>
    %3 = tpu.matmul %2, %0, %cst {dimension_numbers = #tpu.dot_dimension_numbers<[1], [0], [0], [1], [0, 0, 1, 1], [], []>} : vector<288x25xbf16>, vector<25x128xbf16>, vector<288x128xf32> -> vector<288x128xf32>
    %c1 = arith.constant 1 : index
    %c0_4 = arith.constant 0 : index
    %c0_5 = arith.constant 0 : index
    %4 = vector.load %arg1[%c1, %c0_4, %c0_5] : memref<4x288x25xbf16, #tpu.memory_space<vmem>>, vector<1x288x25xbf16>
    %5 = vector.shape_cast %4 : vector<1x288x25xbf16> to vector<288x25xbf16>
    %cst_6 = arith.constant dense<0.000000e+00> : vector<288x128xf32>
    %6 = tpu.matmul %5, %0, %cst_6 {dimension_numbers = #tpu.dot_dimension_numbers<[1], [0], [0], [1], [0, 0, 1, 1], [], []>} : vector<288x25xbf16>, vector<25x128xbf16>, vector<288x128xf32> -> vector<288x128xf32>
    %7 = arith.maximumf %3, %6 : vector<288x128xf32>
    %c2 = arith.constant 2 : index
    %c0_7 = arith.constant 0 : index
    %c0_8 = arith.constant 0 : index
    %8 = vector.load %arg1[%c2, %c0_7, %c0_8] : memref<4x288x25xbf16, #tpu.memory_space<vmem>>, vector<1x288x25xbf16>
    %9 = vector.shape_cast %8 : vector<1x288x25xbf16> to vector<288x25xbf16>
    %cst_9 = arith.constant dense<0.000000e+00> : vector<288x128xf32>
    %10 = tpu.matmul %9, %0, %cst_9 {dimension_numbers = #tpu.dot_dimension_numbers<[1], [0], [0], [1], [0, 0, 1, 1], [], []>} : vector<288x25xbf16>, vector<25x128xbf16>, vector<288x128xf32> -> vector<288x128xf32>
    %11 = arith.maximumf %7, %10 : vector<288x128xf32>
    %c3 = arith.constant 3 : index
    %c0_10 = arith.constant 0 : index
    %c0_11 = arith.constant 0 : index
    %12 = vector.load %arg1[%c3, %c0_10, %c0_11] : memref<4x288x25xbf16, #tpu.memory_space<vmem>>, vector<1x288x25xbf16>
    %13 = vector.shape_cast %12 : vector<1x288x25xbf16> to vector<288x25xbf16>
    %cst_12 = arith.constant dense<0.000000e+00> : vector<288x128xf32>
    %14 = tpu.matmul %13, %0, %cst_12 {dimension_numbers = #tpu.dot_dimension_numbers<[1], [0], [0], [1], [0, 0, 1, 1], [], []>} : vector<288x25xbf16>, vector<25x128xbf16>, vector<288x128xf32> -> vector<288x128xf32>
    %15 = arith.maximumf %11, %14 : vector<288x128xf32>
    %c0_13 = arith.constant 0 : index
    %c0_14 = arith.constant 0 : index
    %16 = vector.load %arg3[%c0_13, %c0_14] : memref<1x128xf32, #tpu.memory_space<vmem>>, vector<1x128xf32>
    %17 = vector.broadcast %16 : vector<1x128xf32> to vector<288x128xf32>
    %18 = arith.addf %15, %17 : vector<288x128xf32>
    %cst_15 = arith.constant 0.000000e+00 : f32
    %19 = vector.broadcast %cst_15 : f32 to vector<288x128xf32>
    %20 = arith.maximumf %18, %19 : vector<288x128xf32>
    %21 = arith.truncf %20 : vector<288x128xf32> to vector<288x128xbf16>
    %c0_16 = arith.constant 0 : index
    %c0_17 = arith.constant 0 : index
    %22 = vector.load %arg4[%c0_16, %c0_17] : memref<288x128xbf16, #tpu.memory_space<vmem>>, vector<288x128xbf16>
    tpu.vector_store %arg4[%c0_16, %c0_17], %21 {strides = array<i32>} : memref<288x128xbf16, #tpu.memory_space<vmem>>, vector<288x128xbf16>,
    return
  }
  func.func @transform_0(%arg0: i32) -> (i32, i32, i32) {
    %c0_i32 = arith.constant 0 : i32
    %c0_i32_0 = arith.constant 0 : i32
    %c0_i32_1 = arith.constant 0 : i32
    return %c0_i32, %arg0, %c0_i32_0 : i32, i32, i32
  }
  func.func @transform_1(%arg0: i32) -> (i32, i32) {
    %c0_i32 = arith.constant 0 : i32
    %c0_i32_0 = arith.constant 0 : i32
    %c0_i32_1 = arith.constant 0 : i32
    return %c0_i32, %c0_i32_0 : i32, i32
  }
  func.func @transform_2(%arg0: i32) -> (i32, i32) {
    %c0_i32 = arith.constant 0 : i32
    %c0_i32_0 = arith.constant 0 : i32
    %c0_i32_1 = arith.constant 0 : i32
    return %c0_i32, %c0_i32_0 : i32, i32
  }
  func.func @transform_3(%arg0: i32) -> (i32, i32) {
    %c0_i32 = arith.constant 0 : i32
    %c0_i32_0 = arith.constant 0 : i32
    return %arg0, %c0_i32 : i32, i32
  }
}

module attributes {stable_mosaic.version = 11 : i64} {
  func.func @conv_relu_pool_kernel(%arg0: i32, %arg1: memref<4x32x800xbf16, #tpu.memory_space<vmem>>, %arg2: memref<800x128xbf16, #tpu.memory_space<vmem>>, %arg3: memref<1x128xf32, #tpu.memory_space<vmem>>, %arg4: memref<32x128xbf16, #tpu.memory_space<vmem>>) attributes {dimension_semantics = [#tpu.dimension_semantics<parallel>], iteration_bounds = array<i64: 1>, scalar_prefetch = 0 : i64, scratch_operands = 0 : i64, tpu.core_type = #tpu.core_type<tc>, window_params = [{transform_indices = @transform_0, window_bounds = array<i64: 4, 32, 800>}, {pipeline_mode = #tpu.pipeline_mode<synchronous>, transform_indices = @transform_1, window_bounds = array<i64: 800, 128>}, {pipeline_mode = #tpu.pipeline_mode<synchronous>, transform_indices = @transform_2, window_bounds = array<i64: 1, 128>}, {transform_indices = @transform_3, window_bounds = array<i64: 32, 128>}]} {
    %c0 = arith.constant 0 : index
    %c0_0 = arith.constant 0 : index
    %0 = vector.load %arg2[%c0, %c0_0] : memref<800x128xbf16, #tpu.memory_space<vmem>>, vector<800x128xbf16>
    %c0_1 = arith.constant 0 : index
    %c0_2 = arith.constant 0 : index
    %c0_3 = arith.constant 0 : index
    %1 = vector.load %arg1[%c0_1, %c0_2, %c0_3] : memref<4x32x800xbf16, #tpu.memory_space<vmem>>, vector<1x32x800xbf16>
    %2 = vector.shape_cast %1 : vector<1x32x800xbf16> to vector<32x800xbf16>
    %cst = arith.constant dense<0.000000e+00> : vector<32x128xf32>
    %3 = tpu.matmul %2, %0, %cst {dimension_numbers = #tpu.dot_dimension_numbers<[1], [0], [0], [1], [0, 0, 1, 1], [], []>} : vector<32x800xbf16>, vector<800x128xbf16>, vector<32x128xf32> -> vector<32x128xf32>
    %c1 = arith.constant 1 : index
    %c0_4 = arith.constant 0 : index
    %c0_5 = arith.constant 0 : index
    %4 = vector.load %arg1[%c1, %c0_4, %c0_5] : memref<4x32x800xbf16, #tpu.memory_space<vmem>>, vector<1x32x800xbf16>
    %5 = vector.shape_cast %4 : vector<1x32x800xbf16> to vector<32x800xbf16>
    %cst_6 = arith.constant dense<0.000000e+00> : vector<32x128xf32>
    %6 = tpu.matmul %5, %0, %cst_6 {dimension_numbers = #tpu.dot_dimension_numbers<[1], [0], [0], [1], [0, 0, 1, 1], [], []>} : vector<32x800xbf16>, vector<800x128xbf16>, vector<32x128xf32> -> vector<32x128xf32>
    %7 = arith.maximumf %3, %6 : vector<32x128xf32>
    %c2 = arith.constant 2 : index
    %c0_7 = arith.constant 0 : index
    %c0_8 = arith.constant 0 : index
    %8 = vector.load %arg1[%c2, %c0_7, %c0_8] : memref<4x32x800xbf16, #tpu.memory_space<vmem>>, vector<1x32x800xbf16>
    %9 = vector.shape_cast %8 : vector<1x32x800xbf16> to vector<32x800xbf16>
    %cst_9 = arith.constant dense<0.000000e+00> : vector<32x128xf32>
    %10 = tpu.matmul %9, %0, %cst_9 {dimension_numbers = #tpu.dot_dimension_numbers<[1], [0], [0], [1], [0, 0, 1, 1], [], []>} : vector<32x800xbf16>, vector<800x128xbf16>, vector<32x128xf32> -> vector<32x128xf32>
    %11 = arith.maximumf %7, %10 : vector<32x128xf32>
    %c3 = arith.constant 3 : index
    %c0_10 = arith.constant 0 : index
    %c0_11 = arith.constant 0 : index
    %12 = vector.load %arg1[%c3, %c0_10, %c0_11] : memref<4x32x800xbf16, #tpu.memory_space<vmem>>, vector<1x32x800xbf16>
    %13 = vector.shape_cast %12 : vector<1x32x800xbf16> to vector<32x800xbf16>
    %cst_12 = arith.constant dense<0.000000e+00> : vector<32x128xf32>
    %14 = tpu.matmul %13, %0, %cst_12 {dimension_numbers = #tpu.dot_dimension_numbers<[1], [0], [0], [1], [0, 0, 1, 1], [], []>} : vector<32x800xbf16>, vector<800x128xbf16>, vector<32x128xf32> -> vector<32x128xf32>
    %15 = arith.maximumf %11, %14 : vector<32x128xf32>
    %c0_13 = arith.constant 0 : index
    %c0_14 = arith.constant 0 : index
    %16 = vector.load %arg3[%c0_13, %c0_14] : memref<1x128xf32, #tpu.memory_space<vmem>>, vector<1x128xf32>
    %17 = vector.broadcast %16 : vector<1x128xf32> to vector<32x128xf32>
    %18 = arith.addf %15, %17 : vector<32x128xf32>
    %cst_15 = arith.constant 0.000000e+00 : f32
    %19 = vector.broadcast %cst_15 : f32 to vector<32x128xf32>
    %20 = arith.maximumf %18, %19 : vector<32x128xf32>
    %21 = arith.truncf %20 : vector<32x128xf32> to vector<32x128xbf16>
    %c0_16 = arith.constant 0 : index
    %c0_17 = arith.constant 0 : index
    %22 = vector.load %arg4[%c0_16, %c0_17] : memref<32x128xbf16, #tpu.memory_space<vmem>>, vector<32x128xbf16>
    tpu.vector_store %arg4[%c0_16, %c0_17], %21 {strides = array<i32>} : memref<32x128xbf16, #tpu.memory_space<vmem>>, vector<32x128xbf16>,
    return
  }
  func.func @transform_0(%arg0: i32) -> (i32, i32, i32) {
    %c0_i32 = arith.constant 0 : i32
    %c0_i32_0 = arith.constant 0 : i32
    %c0_i32_1 = arith.constant 0 : i32
    return %c0_i32, %arg0, %c0_i32_0 : i32, i32, i32
  }
  func.func @transform_1(%arg0: i32) -> (i32, i32) {
    %c0_i32 = arith.constant 0 : i32
    %c0_i32_0 = arith.constant 0 : i32
    %c0_i32_1 = arith.constant 0 : i32
    return %c0_i32, %c0_i32_0 : i32, i32
  }
  func.func @transform_2(%arg0: i32) -> (i32, i32) {
    %c0_i32 = arith.constant 0 : i32
    %c0_i32_0 = arith.constant 0 : i32
    %c0_i32_1 = arith.constant 0 : i32
    return %c0_i32, %c0_i32_0 : i32, i32
  }
  func.func @transform_3(%arg0: i32) -> (i32, i32) {
    %c0_i32 = arith.constant 0 : i32
    %c0_i32_0 = arith.constant 0 : i32
    return %arg0, %c0_i32 : i32, i32
  }
}

module attributes {stable_mosaic.version = 11 : i64} {
  func.func @mlp_kernel(%arg0: i32, %arg1: memref<8x1024xbf16, #tpu.memory_space<vmem>>, %arg2: memref<1024x512xbf16, #tpu.memory_space<vmem>>, %arg3: memref<1x512xf32, #tpu.memory_space<vmem>>, %arg4: memref<512x128xbf16, #tpu.memory_space<vmem>>, %arg5: memref<1x128xf32, #tpu.memory_space<vmem>>, %arg6: memref<8x128xf32, #tpu.memory_space<vmem>>) attributes {dimension_semantics = [#tpu.dimension_semantics<parallel>], iteration_bounds = array<i64: 1>, scalar_prefetch = 0 : i64, scratch_operands = 0 : i64, tpu.core_type = #tpu.core_type<tc>, window_params = [{transform_indices = @transform_0, window_bounds = array<i64: 8, 1024>}, {pipeline_mode = #tpu.pipeline_mode<synchronous>, transform_indices = @transform_1, window_bounds = array<i64: 1024, 512>}, {pipeline_mode = #tpu.pipeline_mode<synchronous>, transform_indices = @transform_2, window_bounds = array<i64: 1, 512>}, {pipeline_mode = #tpu.pipeline_mode<synchronous>, transform_indices = @transform_3, window_bounds = array<i64: 512, 128>}, {pipeline_mode = #tpu.pipeline_mode<synchronous>, transform_indices = @transform_4, window_bounds = array<i64: 1, 128>}, {transform_indices = @transform_5, window_bounds = array<i64: 8, 128>}]} {
    %c0 = arith.constant 0 : index
    %c0_0 = arith.constant 0 : index
    %0 = vector.load %arg1[%c0, %c0_0] : memref<8x1024xbf16, #tpu.memory_space<vmem>>, vector<8x1024xbf16>
    %c0_1 = arith.constant 0 : index
    %c0_2 = arith.constant 0 : index
    %1 = vector.load %arg2[%c0_1, %c0_2] : memref<1024x512xbf16, #tpu.memory_space<vmem>>, vector<1024x512xbf16>
    %cst = arith.constant dense<0.000000e+00> : vector<8x512xf32>
    %2 = tpu.matmul %0, %1, %cst {dimension_numbers = #tpu.dot_dimension_numbers<[1], [0], [0], [1], [0, 0, 1, 1], [], []>} : vector<8x1024xbf16>, vector<1024x512xbf16>, vector<8x512xf32> -> vector<8x512xf32>
    %c0_3 = arith.constant 0 : index
    %c0_4 = arith.constant 0 : index
    %3 = vector.load %arg3[%c0_3, %c0_4] : memref<1x512xf32, #tpu.memory_space<vmem>>, vector<1x512xf32>
    %4 = vector.broadcast %3 : vector<1x512xf32> to vector<8x512xf32>
    %5 = arith.addf %2, %4 : vector<8x512xf32>
    %cst_5 = arith.constant 0.000000e+00 : f32
    %6 = vector.broadcast %cst_5 : f32 to vector<8x512xf32>
    %7 = arith.maximumf %5, %6 : vector<8x512xf32>
    %8 = arith.truncf %7 : vector<8x512xf32> to vector<8x512xbf16>
    %c0_6 = arith.constant 0 : index
    %c0_7 = arith.constant 0 : index
    %9 = vector.load %arg4[%c0_6, %c0_7] : memref<512x128xbf16, #tpu.memory_space<vmem>>, vector<512x128xbf16>
    %cst_8 = arith.constant dense<0.000000e+00> : vector<8x128xf32>
    %10 = tpu.matmul %8, %9, %cst_8 {dimension_numbers = #tpu.dot_dimension_numbers<[1], [0], [0], [1], [0, 0, 1, 1], [], []>} : vector<8x512xbf16>, vector<512x128xbf16>, vector<8x128xf32> -> vector<8x128xf32>
    %c0_9 = arith.constant 0 : index
    %c0_10 = arith.constant 0 : index
    %11 = vector.load %arg5[%c0_9, %c0_10] : memref<1x128xf32, #tpu.memory_space<vmem>>, vector<1x128xf32>
    %12 = vector.broadcast %11 : vector<1x128xf32> to vector<8x128xf32>
    %13 = arith.addf %10, %12 : vector<8x128xf32>
    %c0_11 = arith.constant 0 : index
    %c0_12 = arith.constant 0 : index
    %14 = vector.load %arg6[%c0_11, %c0_12] : memref<8x128xf32, #tpu.memory_space<vmem>>, vector<8x128xf32>
    tpu.vector_store %arg6[%c0_11, %c0_12], %13 {strides = array<i32>} : memref<8x128xf32, #tpu.memory_space<vmem>>, vector<8x128xf32>,
    return
  }
  func.func @transform_0(%arg0: i32) -> (i32, i32) {
    %c0_i32 = arith.constant 0 : i32
    %c0_i32_0 = arith.constant 0 : i32
    return %arg0, %c0_i32 : i32, i32
  }
  func.func @transform_1(%arg0: i32) -> (i32, i32) {
    %c0_i32 = arith.constant 0 : i32
    %c0_i32_0 = arith.constant 0 : i32
    %c0_i32_1 = arith.constant 0 : i32
    return %c0_i32, %c0_i32_0 : i32, i32
  }
  func.func @transform_2(%arg0: i32) -> (i32, i32) {
    %c0_i32 = arith.constant 0 : i32
    %c0_i32_0 = arith.constant 0 : i32
    %c0_i32_1 = arith.constant 0 : i32
    return %c0_i32, %c0_i32_0 : i32, i32
  }
  func.func @transform_3(%arg0: i32) -> (i32, i32) {
    %c0_i32 = arith.constant 0 : i32
    %c0_i32_0 = arith.constant 0 : i32
    %c0_i32_1 = arith.constant 0 : i32
    return %c0_i32, %c0_i32_0 : i32, i32
  }
  func.func @transform_4(%arg0: i32) -> (i32, i32) {
    %c0_i32 = arith.constant 0 : i32
    %c0_i32_0 = arith.constant 0 : i32
    %c0_i32_1 = arith.constant 0 : i32
    return %c0_i32, %c0_i32_0 : i32, i32
  }
  func.func @transform_5(%arg0: i32) -> (i32, i32) {
    %c0_i32 = arith.constant 0 : i32
    %c0_i32_0 = arith.constant 0 : i32
    return %arg0, %c0_i32 : i32, i32
  }
}

</mosaic_0001>

<bundles_post_ra>
// kernel: fedavg_cnn_forward.3
= control target key start
LH: loop header
LB: loop body
LE: loop exit
PB: predicated region body
PF: predicated region fallthrough
CT: control target
= control target key end

     0   :  { %vm211_vm0 = vcmask 1043456   ;;  %vm212_vm1 = vcmask 1044480   ;;  %vm156_vm2 = vcmask 203776   ;;  %v2589_v1 = vmov 65535   ;;  %s3323_s1 = inlined_call_operand.vmem [shape: bf16[25,128], index: 1, kind: input, shape index: {}]   ;;  %s3324_s0 = inlined_call_operand.vmem [shape: bf16[4,288,25], index: 0, kind: input, shape index: {}]   ;;  %s3325_s2 = inlined_call_operand.vmem [shape: f32[1,128], index: 2, kind: input, shape index: {}]   ;;  %s3326_s3 = inlined_call_operand.vmem [shape: bf16[288,128], index: 3, kind: output, shape index: {}]  }
   0x1   :  { %v2515_v0 = vld [vmem:[%s3323_s1] sm:$0xff]   ;;  %v213_v2 = vsel %vm211_vm0, 4294967295, %v2589_v1  ;;  %v2516_v3 = vld [vmem:[%s3323_s1 + $0x8] sm:$0x1f]   ;;  %v2518_v7 = vld [vmem:[%s3324_s0 + $0x90] sm:$0xff]  }
   0x2   :  { %2354 = vmatprep.subr.bf16.mxu0 %v2515_v0  ;;  %2394 = vmatprep.subr.bf16.mxu1 %v2515_v0  ;;  %v214_v4 = vsel %vm212_vm1, %v213_v2, 0  ;;  %v2517_v5 = vld [vmem:[%s3324_s0] sm:$0xff]   ;;  %v2519_v8 = vld [vmem:[%s3324_s0 + $0x8] sm:$0xff]   ;;  %v2520_v9 = vld [vmem:[%s3324_s0 + $0x98] sm:$0xff]  }
   0x3   :  { %2355 = vmatpush3.bf16.msra.mxu0 %v2515_v0  ;;  %2395 = vmatpush3.bf16.msra.mxu1 %v2515_v0  ;;  %v216_v6 = vand.u32 %v2516_v3, %v214_v4  ;;  %v2521_v10 = vld [vmem:[%s3324_s0 + $0x10] sm:$0xff]   ;;  %v2522_v11 = vld [vmem:[%s3324_s0 + $0xa0] sm:$0xff]   ;;  %v2523_v12 = vld [vmem:[%s3324_s0 + $0x18] sm:$0xff]  }
   0x4   :  { %2358 = vmatprep.mubr.msk.bf16.mxu0 %vm156_vm2, %v2517_v5  ;;  %2398 = vmatprep.mubr.msk.bf16.mxu1 %vm156_vm2, %v2518_v7  ;;  %v2524_v13 = vld [vmem:[%s3324_s0 + $0xa8] sm:$0xff]   ;;  %v2525_v14 = vld [vmem:[%s3324_s0 + $0x20] sm:$0xff]   ;;  %v2526_v15 = vld [vmem:[%s3324_s0 + $0xb0] sm:$0xff]  }
   0x5   :  { %2356 = vmatprep.subr.bf16.mxu0 %v216_v6  ;;  %2396 = vmatprep.subr.bf16.mxu1 %v216_v6  ;;  %v2527_v16 = vld [vmem:[%s3324_s0 + $0x28] sm:$0xff]   ;;  %v2528_v17 = vld [vmem:[%s3324_s0 + $0xb8] sm:$0xff]   ;;  %v2529_v18 = vld [vmem:[%s3324_s0 + $0x30] sm:$0xff]  }
   0x6   :  { %v2530_v19 = vld [vmem:[%s3324_s0 + $0xc0] sm:$0xff]   ;;  %v2531_v20 = vld [vmem:[%s3324_s0 + $0x38] sm:$0xff]   ;;  %v2532_v21 = vld [vmem:[%s3324_s0 + $0xc8] sm:$0xff]  }
   0x7   :  { %2357 = vmatpush3.bf16.msra.mxu0 %v216_v6  ;;  %2397 = vmatpush3.bf16.msra.mxu1 %v216_v6  ;;  %v2533_v22 = vld [vmem:[%s3324_s0 + $0x40] sm:$0xff]   ;;  %v2534_v23 = vld [vmem:[%s3324_s0 + $0xd0] sm:$0xff]   ;;  %v2535_v24 = vld [vmem:[%s3324_s0 + $0x48] sm:$0xff]  }
   0x8   :  { %2434 = vmatprep.subr.bf16.mxu0 %v2515_v0  ;;  %2474 = vmatprep.subr.bf16.mxu1 %v2515_v0  ;;  %v2536_v25 = vld [vmem:[%s3324_s0 + $0xd8] sm:$0xff]   ;;  %v2537_v26 = vld [vmem:[%s3324_s0 + $0x50] sm:$0xff]   ;;  %v2538_v27 = vld [vmem:[%s3324_s0 + $0xe0] sm:$0xff]  }
   0x9   :  { %v2539_v28 = vld [vmem:[%s3324_s0 + $0x58] sm:$0xff]   ;;  %v2540_v29 = vld [vmem:[%s3324_s0 + $0xe8] sm:$0xff]   ;;  %v2541_v30 = vld [vmem:[%s3324_s0 + $0x60] sm:$0xff]  }
   0xa   :  { %2359 = vmatmul.mubr.msk.bf16.vlgmr.msra.gmra.mrb[0].mxu0 %vm156_vm2, %v2519_v8  ;;  %2399 = vmatmul.mubr.msk.bf16.vlgmr.msra.gmra.mrb[0].mxu1 %vm156_vm2, %v2520_v9  ;;  %v2542_v31 = vld [vmem:[%s3324_s0 + $0xf0] sm:$0xff]   ;;  %v2543_v32 = vld [vmem:[%s3324_s0 + $0x68] sm:$0xff]   ;;  %v2544_v33 = vld [vmem:[%s3324_s0 + $0xf8] sm:$0xff]  }
   0xb   :  { %2435 = vmatpush3.bf16.msra.mxu0 %v2515_v0  ;;  %2475 = vmatpush3.bf16.msra.mxu1 %v2515_v0  ;;  %v2545_v34 = vld [vmem:[%s3324_s0 + $0x70] sm:$0xff]   ;;  %v2546_v35 = vld [vmem:[%s3324_s0 + $0x100] sm:$0xff]   ;;  %v2547_v36 = vld [vmem:[%s3324_s0 + $0x78] sm:$0xff]  }
   0xc   :  { %2362 = vmatprep.mubr.msk.bf16.mxu0 %vm156_vm2, %v2521_v10  ;;  %2402 = vmatprep.mubr.msk.bf16.mxu1 %vm156_vm2, %v2522_v11  ;;  %v2548_v37 = vld [vmem:[%s3324_s0 + $0x108] sm:$0xff]   ;;  %v2549_v38 = vld [vmem:[%s3324_s0 + $0x80] sm:$0xff]   ;;  %v2550_v39 = vld [vmem:[%s3324_s0 + $0x110] sm:$0xff]  }
   0xd   :  { %2436 = vmatprep.subr.bf16.mxu0 %v216_v6  ;;  %2476 = vmatprep.subr.bf16.mxu1 %v216_v6  ;;  %v2551_v40 = vld [vmem:[%s3324_s0 + $0x88] sm:$0xff]   ;;  %v2552_v41 = vld [vmem:[%s3324_s0 + $0x118] sm:$0xff]   ;;  %v2553_v42 = vld [vmem:[%s3324_s0 + $0x120] sm:$0xff]  }
   0xe   :  { %v2554_v43 = vld [vmem:[%s3324_s0 + $0x1b0] sm:$0xff]   ;;  %v2555_v44 = vld [vmem:[%s3324_s0 + $0x128] sm:$0xff]   ;;  %v2556_v45 = vld [vmem:[%s3324_s0 + $0x1b8] sm:$0xff]  }
   0xf   :  { %2437 = vmatpush3.bf16.msra.mxu0 %v216_v6  ;;  %2477 = vmatpush3.bf16.msra.mxu1 %v216_v6  ;;  %v2557_v46 = vld [vmem:[%s3324_s0 + $0x130] sm:$0xff]   ;;  %v2558_v47 = vld [vmem:[%s3324_s0 + $0x1c0] sm:$0xff]   ;;  %v2559_v48 = vld [vmem:[%s3324_s0 + $0x138] sm:$0xff]  }
  0x10   :  { %v2560_v49 = vld [vmem:[%s3324_s0 + $0x1c8] sm:$0xff]   ;;  %v2561_v50 = vld [vmem:[%s3324_s0 + $0x140] sm:$0xff]   ;;  %v2562_v51 = vld [vmem:[%s3324_s0 + $0x1d0] sm:$0xff]  }
  0x11   :  { %v2563_v52 = vld [vmem:[%s3324_s0 + $0x148] sm:$0xff]   ;;  %v2564_v53 = vld [vmem:[%s3324_s0 + $0x1d8] sm:$0xff]   ;;  %v2565_v54 = vld [vmem:[%s3324_s0 + $0x150] sm:$0xff]  }
  0x12   :  { %2363 = vmatmul.mubr.msk.bf16.gmra.mrb[4].mxu0 %vm156_vm2, %v2523_v12  ;;  %2403 = vmatmul.mubr.msk.bf16.gmra.mrb[4].mxu1 %vm156_vm2, %v2524_v13  ;;  %v2566_v55 = vld [vmem:[%s3324_s0 + $0x1e0] sm:$0xff]   ;;  %v2567_v56 = vld [vmem:[%s3324_s0 + $0x158] sm:$0xff]   ;;  %v2568_v57 = vld [vmem:[%s3324_s0 + $0x1e8] sm:$0xff]  }
  0x13   :  { %2366 = vmatprep.mubr.msk.bf16.mxu0 %vm156_vm2, %v2525_v14  ;;  %2406 = vmatprep.mubr.msk.bf16.mxu1 %vm156_vm2, %v2526_v15  ;;  %v2569_v58 = vld [vmem:[%s3324_s0 + $0x160] sm:$0xff]   ;;  %v2570_v59 = vld [vmem:[%s3324_s0 + $0x1f0] sm:$0xff]   ;;  %v2571_v60 = vld [vmem:[%s3324_s0 + $0x168] sm:$0xff]  }
  0x14   :  { %v2572_v61 = vld [vmem:[%s3324_s0 + $0x1f8] sm:$0xff]   ;;  %v2573_v62 = vld [vmem:[%s3324_s0 + $0x170] sm:$0xff]   ;;  %v2574_v63 = vld [vmem:[%s3324_s0 + $0x200] sm:$0xff]  }
  0x15   :  { %v2575_v0 = vld [vmem:[%s3324_s0 + $0x178] sm:$0xff]   ;;  %v2576_v1 = vld [vmem:[%s3324_s0 + $0x208] sm:$0xff]   ;;  %v2577_v2 = vld [vmem:[%s3324_s0 + $0x180] sm:$0xff]  }
  0x16   :  { %v2578_v3 = vld [vmem:[%s3324_s0 + $0x210] sm:$0xff]   ;;  %v2579_v4 = vld [vmem:[%s3324_s0 + $0x188] sm:$0xff]   ;;  %v2580_v5 = vld [vmem:[%s3324_s0 + $0x218] sm:$0xff]  }
  0x17   :  { %v2581_v6 = vld [vmem:[%s3324_s0 + $0x190] sm:$0xff]   ;;  %v2582_v7 = vld [vmem:[%s3324_s0 + $0x220] sm:$0xff]   ;;  %v2583_v8 = vld [vmem:[%s3324_s0 + $0x198] sm:$0xff]  }
  0x18   :  { %v2584_v9 = vld [vmem:[%s3324_s0 + $0x228] sm:$0xff]   ;;  %v2585_v10 = vld [vmem:[%s3324_s0 + $0x1a0] sm:$0xff]   ;;  %v2586_v11 = vld [vmem:[%s3324_s0 + $0x230] sm:$0xff]  }
  0x19   :  { %v2587_v12 = vld [vmem:[%s3324_s0 + $0x1a8] sm:$0xff]   ;;  %v2588_v13 = vld [vmem:[%s3324_s0 + $0x238] sm:$0xff]  }
  0x1a   :  { %2367 = vmatmul.mubr.msk.bf16.gmra.mrb[8].mxu0 %vm156_vm2, %v2527_v16  ;;  %2407 = vmatmul.mubr.msk.bf16.gmra.mrb[8].mxu1 %vm156_vm2, %v2528_v17 }
  0x1b   :  { %2370 = vmatprep.mubr.msk.bf16.mxu0 %vm156_vm2, %v2529_v18  ;;  %2410 = vmatprep.mubr.msk.bf16.mxu1 %vm156_vm2, %v2530_v19 }
  0x22   :  { %2371 = vmatmul.mubr.msk.bf16.gmra.mrb[12].mxu0 %vm156_vm2, %v2531_v20  ;;  %2411 = vmatmul.mubr.msk.bf16.gmra.mrb[12].mxu1 %vm156_vm2, %v2532_v21 }
  0x23   :  { %2374 = vmatprep.mubr.msk.bf16.mxu0 %vm156_vm2, %v2533_v22  ;;  %2414 = vmatprep.mubr.msk.bf16.mxu1 %vm156_vm2, %v2534_v23 }
  0x2a   :  { %2375 = vmatmul.mubr.msk.bf16.gmra.mrb[16].mxu0 %vm156_vm2, %v2535_v24  ;;  %2415 = vmatmul.mubr.msk.bf16.gmra.mrb[16].mxu1 %vm156_vm2, %v2536_v25 }
  0x2b   :  { %2378 = vmatprep.mubr.msk.bf16.mxu0 %vm156_vm2, %v2537_v26  ;;  %2418 = vmatprep.mubr.msk.bf16.mxu1 %vm156_vm2, %v2538_v27 }
  0x32   :  { %2379 = vmatmul.mubr.msk.bf16.gmra.mrb[20].mxu0 %vm156_vm2, %v2539_v28  ;;  %2419 = vmatmul.mubr.msk.bf16.gmra.mrb[20].mxu1 %vm156_vm2, %v2540_v29 }
  0x33   :  { %2382 = vmatprep.mubr.msk.bf16.mxu0 %vm156_vm2, %v2541_v30  ;;  %2422 = vmatprep.mubr.msk.bf16.mxu1 %vm156_vm2, %v2542_v31 }
  0x3a   :  { %2383 = vmatmul.mubr.msk.bf16.gmra.mrb[24].mxu0 %vm156_vm2, %v2543_v32  ;;  %2423 = vmatmul.mubr.msk.bf16.gmra.mrb[24].mxu1 %vm156_vm2, %v2544_v33 }
  0x3b   :  { %2386 = vmatprep.mubr.msk.bf16.mxu0 %vm156_vm2, %v2545_v34  ;;  %2426 = vmatprep.mubr.msk.bf16.mxu1 %vm156_vm2, %v2546_v35 }
  0x42   :  { %2387 = vmatmul.mubr.msk.bf16.gmra.mrb[28].mxu0 %vm156_vm2, %v2547_v36  ;;  %2427 = vmatmul.mubr.msk.bf16.gmra.mrb[28].mxu1 %vm156_vm2, %v2548_v37 }
  0x43   :  { %2390 = vmatprep.mubr.msk.bf16.mxu0 %vm156_vm2, %v2549_v38  ;;  %2430 = vmatprep.mubr.msk.bf16.mxu1 %vm156_vm2, %v2550_v39 }
  0x4a   :  { %2391 = vmatmul.mubr.msk.bf16.gmra.mrb[32].mxu0 %vm156_vm2, %v2551_v40  ;;  %2431 = vmatmul.mubr.msk.bf16.gmra.mrb[32].mxu1 %vm156_vm2, %v2552_v41 }
  0x4b   :  { %2438 = vmatprep.mubr.msk.bf16.mxu0 %vm156_vm2, %v2553_v42  ;;  %2478 = vmatprep.mubr.msk.bf16.mxu1 %vm156_vm2, %v2554_v43 }
  0x52   :  { %2439 = vmatmul.mubr.msk.bf16.vlgmr.msra.gmra.mrb[36].mxu0 %vm156_vm2, %v2555_v44  ;;  %2479 = vmatmul.mubr.msk.bf16.vlgmr.msra.gmra.mrb[36].mxu1 %vm156_vm2, %v2556_v45 }
  0x53   :  { %2442 = vmatprep.mubr.msk.bf16.mxu0 %vm156_vm2, %v2557_v46  ;;  %2482 = vmatprep.mubr.msk.bf16.mxu1 %vm156_vm2, %v2558_v47 }
  0x5a   :  { %2443 = vmatmul.mubr.msk.bf16.gmra.mrb[40].mxu0 %vm156_vm2, %v2559_v48  ;;  %2483 = vmatmul.mubr.msk.bf16.gmra.mrb[40].mxu1 %vm156_vm2, %v2560_v49 }
  0x5b   :  { %2446 = vmatprep.mubr.msk.bf16.mxu0 %vm156_vm2, %v2561_v50  ;;  %2486 = vmatprep.mubr.msk.bf16.mxu1 %vm156_vm2, %v2562_v51 }
  0x62   :  { %2447 = vmatmul.mubr.msk.bf16.gmra.mrb[44].mxu0 %vm156_vm2, %v2563_v52  ;;  %2487 = vmatmul.mubr.msk.bf16.gmra.mrb[44].mxu1 %vm156_vm2, %v2564_v53 }
  0x63   :  { %2450 = vmatprep.mubr.msk.bf16.mxu0 %vm156_vm2, %v2565_v54  ;;  %2490 = vmatprep.mubr.msk.bf16.mxu1 %vm156_vm2, %v2566_v55 }
  0x6a   :  { %2451 = vmatmul.mubr.msk.bf16.gmra.mrb[48].mxu0 %vm156_vm2, %v2567_v56  ;;  %2491 = vmatmul.mubr.msk.bf16.gmra.mrb[48].mxu1 %vm156_vm2, %v2568_v57 }
  0x6b   :  { %2454 = vmatprep.mubr.msk.bf16.mxu0 %vm156_vm2, %v2569_v58  ;;  %2494 = vmatprep.mubr.msk.bf16.mxu1 %vm156_vm2, %v2570_v59 }
  0x72   :  { %2455 = vmatmul.mubr.msk.bf16.gmra.mrb[52].mxu0 %vm156_vm2, %v2571_v60  ;;  %2495 = vmatmul.mubr.msk.bf16.gmra.mrb[52].mxu1 %vm156_vm2, %v2572_v61 }
  0x73   :  { %2458 = vmatprep.mubr.msk.bf16.mxu0 %vm156_vm2, %v2573_v62  ;;  %2498 = vmatprep.mubr.msk.bf16.mxu1 %vm156_vm2, %v2574_v63 }
  0x7a   :  { %2459 = vmatmul.mubr.msk.bf16.gmra.mrb[56].mxu0 %vm156_vm2, %v2575_v0  ;;  %2499 = vmatmul.mubr.msk.bf16.gmra.mrb[56].mxu1 %vm156_vm2, %v2576_v1 }
  0x7b   :  { %2462 = vmatprep.mubr.msk.bf16.mxu0 %vm156_vm2, %v2577_v2  ;;  %2502 = vmatprep.mubr.msk.bf16.mxu1 %vm156_vm2, %v2578_v3 }
  0x82   :  { %2463 = vmatmul.mubr.msk.bf16.gmra.mrb[60].mxu0 %vm156_vm2, %v2579_v4  ;;  %2503 = vmatmul.mubr.msk.bf16.gmra.mrb[60].mxu1 %vm156_vm2, %v2580_v5 }
  0x83   :  { %2466 = vmatprep.mubr.msk.bf16.mxu0 %vm156_vm2, %v2581_v6  ;;  %2506 = vmatprep.mubr.msk.bf16.mxu1 %vm156_vm2, %v2582_v7 }
  0x8a   :  { %2467 = vmatmul.mubr.msk.bf16.gmra.mrb[64].mxu0 %vm156_vm2, %v2583_v8  ;;  %2507 = vmatmul.mubr.msk.bf16.gmra.mrb[64].mxu1 %vm156_vm2, %v2584_v9 }
  0x8b   :  { %2470 = vmatprep.mubr.msk.bf16.mxu0 %vm156_vm2, %v2585_v10  ;;  %2510 = vmatprep.mubr.msk.bf16.mxu1 %vm156_vm2, %v2586_v11 }
  0x92   :  { %2471 = vmatmul.mubr.msk.bf16.gmra.mrb[68].mxu0 %vm156_vm2, %v2587_v12  ;;  %2511 = vmatmul.mubr.msk.bf16.gmra.mrb[68].mxu1 %vm156_vm2, %v2588_v13 }
  0xdd   :  { %v2904_v14 = vpop.f32.mrb[0].mxu0  ;;  %v2906_v15 = vpop.f32.mrb[0].mxu1 }
  0xde   :  { %v2910_v17 = vpop.f32.mrb[1].mxu0  ;;  %v2912_v18 = vpop.f32.mrb[1].mxu1 }
  0xdf   :  { %v2916_v20 = vpop.f32.mrb[2].mxu0  ;;  %v2918_v21 = vpop.f32.mrb[2].mxu1  ;;  %v3378_v9 = vmax.f32 %v2910_v17, %v2912_v18 }
  0xe0   :  { %v2922_v23 = vpop.f32.mrb[3].mxu0  ;;  %v2924_v24 = vpop.f32.mrb[3].mxu1 }
  0xe5   :  { %v2928_v26 = vpop.f32.mrb[4].mxu0  ;;  %v2930_v27 = vpop.f32.mrb[4].mxu1 }
  0xe6   :  { %v2934_v29 = vpop.f32.mrb[5].mxu0  ;;  %v2936_v30 = vpop.f32.mrb[5].mxu1 }
  0xe7   :  { %v2940_v32 = vpop.f32.mrb[6].mxu0  ;;  %v2942_v33 = vpop.f32.mrb[6].mxu1 }
  0xe8   :  { %v2946_v35 = vpop.f32.mrb[7].mxu0  ;;  %v2948_v36 = vpop.f32.mrb[7].mxu1 }
  0xed   :  { %v2952_v38 = vpop.f32.mrb[8].mxu0  ;;  %v2954_v39 = vpop.f32.mrb[8].mxu1 }
  0xee   :  { %v2958_v41 = vpop.f32.mrb[9].mxu0  ;;  %v2960_v42 = vpop.f32.mrb[9].mxu1 }
  0xef   :  { %v2964_v44 = vpop.f32.mrb[10].mxu0  ;;  %v2966_v45 = vpop.f32.mrb[10].mxu1 }
  0xf0   :  { %v2970_v47 = vpop.f32.mrb[11].mxu0  ;;  %v2972_v48 = vpop.f32.mrb[11].mxu1 }
  0xf5   :  { %v2976_v50 = vpop.f32.mrb[12].mxu0  ;;  %v2978_v51 = vpop.f32.mrb[12].mxu1 }
  0xf6   :  { %v2982_v53 = vpop.f32.mrb[13].mxu0  ;;  %v2984_v54 = vpop.f32.mrb[13].mxu1 }
  0xf7   :  { %v2988_v56 = vpop.f32.mrb[14].mxu0  ;;  %v2990_v57 = vpop.f32.mrb[14].mxu1 }
  0xf8   :  { %v2994_v59 = vpop.f32.mrb[15].mxu0  ;;  %v2996_v60 = vpop.f32.mrb[15].mxu1 }
  0xfd   :  { %v3000_v62 = vpop.f32.mrb[16].mxu0  ;;  %v3002_v63 = vpop.f32.mrb[16].mxu1 }
  0xfe   :  { %v3006_v1 = vpop.f32.mrb[17].mxu0  ;;  %v3008_v2 = vpop.f32.mrb[17].mxu1 }
  0xff   :  { %v3012_v4 = vpop.f32.mrb[18].mxu0  ;;  %v3014_v5 = vpop.f32.mrb[18].mxu1 }
 0x100   :  { %v3018_v7 = vpop.f32.mrb[19].mxu0  ;;  %v3020_v8 = vpop.f32.mrb[19].mxu1 }
 0x105   :  { %v3024_v10 = vpop.f32.mrb[20].mxu0  ;;  %v3026_v11 = vpop.f32.mrb[20].mxu1 }
 0x106   :  { %v3030_v13 = vpop.f32.mrb[21].mxu0  ;;  %v3032_v3 = vpop.f32.mrb[21].mxu1 }
 0x107   :  { %v3036_v0 = vpop.f32.mrb[22].mxu0  ;;  %v3038_v61 = vpop.f32.mrb[22].mxu1 }
 0x108   :  { %v3042_v58 = vpop.f32.mrb[23].mxu0  ;;  %v3044_v55 = vpop.f32.mrb[23].mxu1 }
 0x109   :  { %3352 = vst [vmem:[#allocation2_spill] sm:$0xff] %v3044_v55 }
 0x10d   :  { %v3048_v52 = vpop.f32.mrb[24].mxu0  ;;  %v3050_v49 = vpop.f32.mrb[24].mxu1 }
 0x10e   :  { %3353 = vst [vmem:[#allocation3_spill] sm:$0xff] %v3048_v52  ;;  %3354 = vst [vmem:[#allocation4_spill] sm:$0xff] %v3050_v49  ;;  %v3054_v46 = vpop.f32.mrb[25].mxu0  ;;  %v3056_v43 = vpop.f32.mrb[25].mxu1 }
 0x10f   :  { %3355 = vst [vmem:[#allocation5_spill] sm:$0xff] %v3054_v46  ;;  %3356 = vst [vmem:[#allocation6_spill] sm:$0xff] %v3056_v43  ;;  %v3060_v40 = vpop.f32.mrb[26].mxu0  ;;  %v3062_v37 = vpop.f32.mrb[26].mxu1  ;;  %v3126_v43 = vld [vmem:[%s3325_s2] ss:$0 sm:$0xff] }
 0x110   :  { %3357 = vst [vmem:[#allocation7_spill] sm:$0xff] %v3060_v40  ;;  %3358 = vst [vmem:[#allocation8_spill] sm:$0xff] %v3062_v37  ;;  %v3066_v34 = vpop.f32.mrb[27].mxu0  ;;  %v3068_v31 = vpop.f32.mrb[27].mxu1  ;;  %v3377_v40 = vmax.f32 %v2904_v14, %v2906_v15 }
 0x111   :  { %3359 = vst [vmem:[#allocation9_spill] sm:$0xff] %v3066_v34  ;;  %3360 = vst [vmem:[#allocation10_spill] sm:$0xff] %v3068_v31 }
 0x115   :  { %v3072_v28 = vpop.f32.mrb[28].mxu0  ;;  %v3074_v25 = vpop.f32.mrb[28].mxu1 }
 0x116   :  { %3361 = vst [vmem:[#allocation11_spill] sm:$0xff] %v3072_v28  ;;  %3362 = vst [vmem:[#allocation12_spill] sm:$0xff] %v3074_v25  ;;  %v3078_v22 = vpop.f32.mrb[29].mxu0  ;;  %v3080_v19 = vpop.f32.mrb[29].mxu1 }
 0x117   :  { %3363 = vst [vmem:[#allocation13_spill] sm:$0xff] %v3078_v22  ;;  %3364 = vst [vmem:[#allocation14_spill] sm:$0xff] %v3080_v19  ;;  %v3084_v16 = vpop.f32.mrb[30].mxu0  ;;  %v3086_v37 = vpop.f32.mrb[30].mxu1 }
 0x118   :  { %3365 = vst [vmem:[#allocation15_spill] sm:$0xff] %v3084_v16  ;;  %3366 = vst [vmem:[#allocation16_spill] sm:$0xff] %v3086_v37  ;;  %v3090_v31 = vpop.f32.mrb[31].mxu0  ;;  %v3092_v34 = vpop.f32.mrb[31].mxu1 }
 0x119   :  { %3367 = vst [vmem:[#allocation17_spill] sm:$0xff] %v3090_v31  ;;  %3368 = vst [vmem:[#allocation18_spill] sm:$0xff] %v3092_v34 }
 0x11d   :  { %v3096_v25 = vpop.f32.mrb[32].mxu0  ;;  %v3098_v28 = vpop.f32.mrb[32].mxu1 }
 0x11e   :  { %3369 = vst [vmem:[#allocation19_spill] sm:$0xff] %v3096_v25  ;;  %3370 = vst [vmem:[#allocation20_spill] sm:$0xff] %v3098_v28  ;;  %v3102_v19 = vpop.f32.mrb[33].mxu0  ;;  %v3104_v22 = vpop.f32.mrb[33].mxu1 }
 0x11f   :  { %3371 = vst [vmem:[#allocation21_spill] sm:$0xff] %v3102_v19  ;;  %3372 = vst [vmem:[#allocation22_spill] sm:$0xff] %v3104_v22  ;;  %v3108_v37 = vpop.f32.mrb[34].mxu0  ;;  %v3110_v16 = vpop.f32.mrb[34].mxu1 }
 0x120   :  { %3373 = vst [vmem:[#allocation23_spill] sm:$0xff] %v3108_v37  ;;  %3374 = vst [vmem:[#allocation24_spill] sm:$0xff] %v3110_v16  ;;  %v3114_v34 = vpop.f32.mrb[35].mxu0  ;;  %v3116_v31 = vpop.f32.mrb[35].mxu1 }
 0x121   :  { %3375 = vst [vmem:[#allocation25_spill] sm:$0xff] %v3114_v34  ;;  %3376 = vst [vmem:[#allocation26_spill] sm:$0xff] %v3116_v31  ;;  %v3379_v31 = vmax.f32 %v2916_v20, %v2918_v21 }
 0x125   :  { %v2440_v28 = vpop.f32.mrb[36].mxu0  ;;  %v2480_v25 = vpop.f32.mrb[36].mxu1 }
 0x126   :  { %v1149_v6 = vmax.f32 %v3377_v40, %v2440_v28  ;;  %v1004_v22 = vpop.f32.mrb[37].mxu0  ;;  %v1398_v19 = vpop.f32.mrb[37].mxu1  ;;  %v3380_v40 = vmax.f32 %v2922_v23, %v2924_v24 }
 0x127   :  { %v1147_v16 = vmax.f32 %v3378_v9, %v1004_v22  ;;  %v2441_v37 = vpop.f32.mrb[38].mxu0  ;;  %v2481_v46 = vpop.f32.mrb[38].mxu1 }
 0x128   :  { %v1543_v12 = vmax.f32 %v1149_v6, %v2480_v25  ;;  %v1150_v34 = vmax.f32 %v3379_v31, %v2441_v37  ;;  %v1007_v14 = vpop.f32.mrb[39].mxu0  ;;  %v1401_v15 = vpop.f32.mrb[39].mxu1 }
 0x129   :  { %v1541_v28 = vmax.f32 %v1147_v16, %v1398_v19  ;;  %v1148_v49 = vmax.f32 %v3380_v40, %v1007_v14  ;;  %v3381_v16 = vmax.f32 %v2928_v26, %v2930_v27 }
 0x12a   :  { %v1586_v52 = vadd.f32 %v3126_v43, %v1543_v12  ;;  %v1544_v55 = vmax.f32 %v1150_v34, %v2481_v46  ;;  %v3382_v34 = vmax.f32 %v2934_v29, %v2936_v30 }
 0x12b   :  { %v1584_v17 = vadd.f32 %v3126_v43, %v1541_v28  ;;  %v1542_v18 = vmax.f32 %v1148_v49, %v1401_v15 }
 0x12c   :  { %v1587_v22 = vadd.f32 %v3126_v43, %v1544_v55  ;;  %v1622_v21 = vmax.f32 %v1586_v52, 0.0  ;;  %v3383_v52 = vmax.f32 %v2940_v32, %v2942_v33 }
 0x12d   :  { %v1585_v25 = vadd.f32 %v3126_v43, %v1542_v18  ;;  %v2444_v6 = vpop.f32.mrb[40].mxu0  ;;  %v2484_v20 = vpop.f32.mrb[40].mxu1  ;;  %v1620_v37 = vmax.f32 %v1584_v17, 0.0  ;;  %v3384_v17 = vmax.f32 %v2946_v35, %v2948_v36 }
 0x12e   :  { %v1623_v31 = vmax.f32 %v1587_v22, 0.0  ;;  %v1153_v19 = vmax.f32 %v3381_v16, %v2444_v6  ;;  %v1020_v23 = vpop.f32.mrb[41].mxu0  ;;  %v1414_v24 = vpop.f32.mrb[41].mxu1 }
 0x12f   :  { %v1621_v9 = vmax.f32 %v1585_v25, 0.0  ;;  %v1151_v46 = vmax.f32 %v3382_v34, %v1020_v23  ;;  %v2445_v49 = vpop.f32.mrb[42].mxu0  ;;  %v2485_v55 = vpop.f32.mrb[42].mxu1 }
 0x130   :  { %v2175_v12 = vpack.c.bf16 %v1623_v31, %v1622_v21  ;;  %v1547_v14 = vmax.f32 %v1153_v19, %v2484_v20  ;;  %v1154_v15 = vmax.f32 %v3383_v52, %v2445_v49  ;;  %v1023_v28 = vpop.f32.mrb[43].mxu0  ;;  %v1417_v40 = vpop.f32.mrb[43].mxu1  ;;  %v3385_v21 = vmax.f32 %v2952_v38, %v2954_v39 }
 0x131   :  { %v2170_v26 = vpack.c.bf16 %v1621_v9, %v1620_v37  ;;  %v1545_v27 = vmax.f32 %v1151_v46, %v1414_v24  ;;  %v1152_v18 = vmax.f32 %v3384_v17, %v1023_v28  ;;  %v3386_v37 = vmax.f32 %v2958_v41, %v2960_v42 }
 0x132   :  { %2257 = vst [vmem:[%s3326_s3 + $0x8] sm:$0xff] %v2175_v12   ;;  %v1590_v29 = vadd.f32 %v3126_v43, %v1547_v14  ;;  %v1548_v30 = vmax.f32 %v1154_v15, %v2485_v55  ;;  %v3387_v12 = vmax.f32 %v2964_v44, %v2966_v45  ;;  %v3388_v28 = vmax.f32 %v2970_v47, %v2972_v48 }
 0x133   :  { %2171 = vst [vmem:[%s3326_s3] sm:$0xff] %v2170_v26   ;;  %v1588_v32 = vadd.f32 %v3126_v43, %v1545_v27  ;;  %v1546_v33 = vmax.f32 %v1152_v18, %v1417_v40 }
 0x134   :  { %v1591_v22 = vadd.f32 %v3126_v43, %v1548_v30  ;;  %v1626_v6 = vmax.f32 %v1590_v29, 0.0  ;;  %v3389_v29 = vmax.f32 %v2976_v50, %v2978_v51 }
 0x135   :  { %v1589_v25 = vadd.f32 %v3126_v43, %v1546_v33  ;;  %v2448_v35 = vpop.f32.mrb[44].mxu0  ;;  %v2488_v36 = vpop.f32.mrb[44].mxu1  ;;  %v1624_v23 = vmax.f32 %v1588_v32, 0.0 }
 0x136   :  { %v1627_v20 = vmax.f32 %v1591_v22, 0.0  ;;  %v1157_v31 = vmax.f32 %v3385_v21, %v2448_v35  ;;  %v1036_v16 = vpop.f32.mrb[45].mxu0  ;;  %v1430_v19 = vpop.f32.mrb[45].mxu1  ;;  %v3390_v35 = vmax.f32 %v2982_v53, %v2984_v54 }
 0x137   :  { %v1625_v24 = vmax.f32 %v1589_v25, 0.0  ;;  %v1155_v9 = vmax.f32 %v3386_v37, %v1036_v16  ;;  %v2449_v34 = vpop.f32.mrb[46].mxu0  ;;  %v2489_v46 = vpop.f32.mrb[46].mxu1  ;;  %v3391_v16 = vmax.f32 %v2988_v56, %v2990_v57  ;;  %v3392_v37 = vmax.f32 %v2994_v59, %v2996_v60 }
 0x138   :  { %v2185_v49 = vpack.c.bf16 %v1627_v20, %v1626_v6  ;;  %v1551_v55 = vmax.f32 %v1157_v31, %v2488_v36  ;;  %v1158_v14 = vmax.f32 %v3387_v12, %v2449_v34  ;;  %v1039_v52 = vpop.f32.mrb[47].mxu0  ;;  %v1433_v15 = vpop.f32.mrb[47].mxu1  ;;  %v3393_v12 = vmax.f32 %v3000_v62, %v3002_v63 }
 0x139   :  { %v2180_v38 = vpack.c.bf16 %v1625_v24, %v1624_v23  ;;  %v1549_v39 = vmax.f32 %v1155_v9, %v1430_v19  ;;  %v1156_v40 = vmax.f32 %v3388_v28, %v1039_v52  ;;  %v3394_v28 = vmax.f32 %v3006_v1, %v3008_v2 }
 0x13a   :  { %2259 = vst [vmem:[%s3326_s3 + $0x18] sm:$0xff] %v2185_v49   ;;  %v1594_v41 = vadd.f32 %v3126_v43, %v1551_v55  ;;  %v1552_v42 = vmax.f32 %v1158_v14, %v2489_v46 }
 0x13b   :  { %2258 = vst [vmem:[%s3326_s3 + $0x10] sm:$0xff] %v2180_v38   ;;  %v1592_v44 = vadd.f32 %v3126_v43, %v1549_v39  ;;  %v1550_v45 = vmax.f32 %v1156_v40, %v1433_v15 }
 0x13c   :  { %v1595_v26 = vadd.f32 %v3126_v43, %v1552_v42  ;;  %v1630_v17 = vmax.f32 %v1594_v41, 0.0 }
 0x13d   :  { %v1593_v27 = vadd.f32 %v3126_v43, %v1550_v45  ;;  %v2452_v47 = vpop.f32.mrb[48].mxu0  ;;  %v2492_v48 = vpop.f32.mrb[48].mxu1  ;;  %v1628_v22 = vmax.f32 %v1592_v44, 0.0 }
 0x13e   :  { %v1631_v18 = vmax.f32 %v1595_v26, 0.0  ;;  %v1161_v30 = vmax.f32 %v3389_v29, %v2452_v47  ;;  %v1052_v32 = vpop.f32.mrb[49].mxu0  ;;  %v1446_v33 = vpop.f32.mrb[49].mxu1  ;;  %v3395_v26 = vmax.f32 %v3012_v4, %v3014_v5 }
 0x13f   :  { %v1629_v25 = vmax.f32 %v1593_v27, 0.0  ;;  %v1159_v36 = vmax.f32 %v3390_v35, %v1052_v32  ;;  %v2453_v6 = vpop.f32.mrb[50].mxu0  ;;  %v2493_v20 = vpop.f32.mrb[50].mxu1 }
 0x140   :  { %v2195_v21 = vpack.c.bf16 %v1631_v18, %v1630_v17  ;;  %v1555_v31 = vmax.f32 %v1161_v30, %v2492_v48  ;;  %v1162_v19 = vmax.f32 %v3391_v16, %v2453_v6  ;;  %v1055_v23 = vpop.f32.mrb[51].mxu0  ;;  %v1449_v24 = vpop.f32.mrb[51].mxu1  ;;  %v3396_v17 = vmax.f32 %v3018_v7, %v3020_v8 }
 0x141   :  { %v2190_v50 = vpack.c.bf16 %v1629_v25, %v1628_v22  ;;  %v1553_v51 = vmax.f32 %v1159_v36, %v1446_v33  ;;  %v1160_v9 = vmax.f32 %v3392_v37, %v1055_v23  ;;  %v3397_v22 = vmax.f32 %v3024_v10, %v3026_v11 }
 0x142   :  { %2261 = vst [vmem:[%s3326_s3 + $0x28] sm:$0xff] %v2195_v21   ;;  %v1598_v53 = vadd.f32 %v3126_v43, %v1555_v31  ;;  %v1556_v54 = vmax.f32 %v1162_v19, %v2493_v20  ;;  %v3398_v21 = vmax.f32 %v3030_v13, %v3032_v3 }
 0x143   :  { %2260 = vst [vmem:[%s3326_s3 + $0x20] sm:$0xff] %v2190_v50   ;;  %v1596_v56 = vadd.f32 %v3126_v43, %v1553_v51  ;;  %v1554_v57 = vmax.f32 %v1160_v9, %v1449_v24  ;;  %v3399_v50 = vmax.f32 %v3036_v0, %v3038_v61 }
 0x144   :  { %v1599_v34 = vadd.f32 %v3126_v43, %v1556_v54  ;;  %v1634_v49 = vmax.f32 %v1598_v53, 0.0  ;;  %v3400_v53 = vld [vmem:[#allocation2_spill] sm:$0xff] }
 0x145   :  { %v1597_v46 = vadd.f32 %v3126_v43, %v1554_v57  ;;  %v2456_v59 = vpop.f32.mrb[52].mxu0  ;;  %v2496_v60 = vpop.f32.mrb[52].mxu1  ;;  %v1632_v38 = vmax.f32 %v1596_v56, 0.0  ;;  %v3401_v54 = vmax.f32 %v3042_v58, %v3400_v53 }
 0x146   :  { %v1635_v55 = vmax.f32 %v1599_v34, 0.0  ;;  %v1165_v14 = vmax.f32 %v3393_v12, %v2456_v59  ;;  %v1068_v52 = vpop.f32.mrb[53].mxu0  ;;  %v1462_v15 = vpop.f32.mrb[53].mxu1 }
 0x147   :  { %v1633_v39 = vmax.f32 %v1597_v46, 0.0  ;;  %v1163_v40 = vmax.f32 %v3394_v28, %v1068_v52  ;;  %v2457_v41 = vpop.f32.mrb[54].mxu0  ;;  %v2497_v42 = vpop.f32.mrb[54].mxu1  ;;  %v3405_v28 = vld [vmem:[#allocation5_spill] sm:$0xff] }
 0x148   :  { %v2205_v44 = vpack.c.bf16 %v1635_v55, %v1634_v49  ;;  %v1559_v45 = vmax.f32 %v1165_v14, %v2496_v60  ;;  %v1166_v27 = vmax.f32 %v3395_v26, %v2457_v41  ;;  %v1071_v47 = vpop.f32.mrb[55].mxu0  ;;  %v1465_v48 = vpop.f32.mrb[55].mxu1  ;;  %v3402_v49 = vld [vmem:[#allocation3_spill] sm:$0xff]  ;;  %v3403_v55 = vld [vmem:[#allocation4_spill] sm:$0xff] }
 0x149   :  { %v2200_v62 = vpack.c.bf16 %v1633_v39, %v1632_v38  ;;  %v1557_v63 = vmax.f32 %v1163_v40, %v1462_v15  ;;  %v1164_v18 = vmax.f32 %v3396_v17, %v1071_v47  ;;  %v3404_v12 = vmax.f32 %v3402_v49, %v3403_v55  ;;  %v3406_v40 = vld [vmem:[#allocation6_spill] sm:$0xff]  ;;  %v3408_v47 = vld [vmem:[#allocation7_spill] sm:$0xff] }
 0x14a   :  { %2263 = vst [vmem:[%s3326_s3 + $0x38] sm:$0xff] %v2205_v44   ;;  %v1602_v1 = vadd.f32 %v3126_v43, %v1559_v45  ;;  %v1560_v2 = vmax.f32 %v1166_v27, %v2497_v42  ;;  %v3407_v41 = vmax.f32 %v3405_v28, %v3406_v40  ;;  %v3424_v49 = vld [vmem:[#allocation18_spill] sm:$0xff] }
 0x14b   :  { %2262 = vst [vmem:[%s3326_s3 + $0x30] sm:$0xff] %v2200_v62   ;;  %v1600_v4 = vadd.f32 %v3126_v43, %v1557_v63  ;;  %v1558_v5 = vmax.f32 %v1164_v18, %v1465_v48  ;;  %v3409_v48 = vld [vmem:[#allocation8_spill] sm:$0xff] }
 0x14c   :  { %v1603_v29 = vadd.f32 %v3126_v43, %v1560_v2  ;;  %v1638_v32 = vmax.f32 %v1602_v1, 0.0  ;;  %v3410_v62 = vmax.f32 %v3408_v47, %v3409_v48 }
 0x14d   :  { %v1601_v30 = vadd.f32 %v3126_v43, %v1558_v5  ;;  %v2460_v7 = vpop.f32.mrb[56].mxu0  ;;  %v2500_v8 = vpop.f32.mrb[56].mxu1  ;;  %v1636_v6 = vmax.f32 %v1600_v4, 0.0  ;;  %v3411_v4 = vld [vmem:[#allocation9_spill] sm:$0xff]  ;;  %v3412_v5 = vld [vmem:[#allocation10_spill] sm:$0xff] }
 0x14e   :  { %v1639_v33 = vmax.f32 %v1603_v29, 0.0  ;;  %v1169_v25 = vmax.f32 %v3397_v22, %v2460_v7  ;;  %v1084_v35 = vpop.f32.mrb[57].mxu0  ;;  %v1478_v36 = vpop.f32.mrb[57].mxu1  ;;  %v3413_v29 = vmax.f32 %v3411_v4, %v3412_v5 }
 0x14f   :  { %v1637_v20 = vmax.f32 %v1601_v30, 0.0  ;;  %v1167_v31 = vmax.f32 %v3398_v21, %v1084_v35  ;;  %v2461_v16 = vpop.f32.mrb[58].mxu0  ;;  %v2501_v19 = vpop.f32.mrb[58].mxu1  ;;  %v3414_v21 = vld [vmem:[#allocation11_spill] sm:$0xff] }
 0x150   :  { %v2215_v23 = vpack.c.bf16 %v1639_v33, %v1638_v32  ;;  %v1563_v24 = vmax.f32 %v1169_v25, %v2500_v8  ;;  %v1170_v51 = vmax.f32 %v3399_v50, %v2461_v16  ;;  %v1087_v37 = vpop.f32.mrb[59].mxu0  ;;  %v1481_v9 = vpop.f32.mrb[59].mxu1 }
 0x151   :  { %v2210_v10 = vpack.c.bf16 %v1637_v20, %v1636_v6  ;;  %v1561_v11 = vmax.f32 %v1167_v31, %v1478_v36  ;;  %v1168_v56 = vmax.f32 %v3401_v54, %v1087_v37  ;;  %v3415_v31 = vld [vmem:[#allocation12_spill] sm:$0xff]  ;;  %v3417_v37 = vld [vmem:[#allocation13_spill] sm:$0xff] }
 0x152   :  { %2265 = vst [vmem:[%s3326_s3 + $0x48] sm:$0xff] %v2215_v23   ;;  %v1606_v3 = vadd.f32 %v3126_v43, %v1563_v24  ;;  %v1564_v13 = vmax.f32 %v1170_v51, %v2501_v19  ;;  %v3416_v16 = vmax.f32 %v3414_v21, %v3415_v31  ;;  %v3436_v21 = vld [vmem:[#allocation26_spill] sm:$0xff] }
 0x153   :  { %2264 = vst [vmem:[%s3326_s3 + $0x40] sm:$0xff] %v2210_v10   ;;  %v1604_v61 = vadd.f32 %v3126_v43, %v1561_v11  ;;  %v1562_v0 = vmax.f32 %v1168_v56, %v1481_v9  ;;  %v3418_v9 = vld [vmem:[#allocation14_spill] sm:$0xff] }
 0x154   :  { %v1607_v57 = vadd.f32 %v3126_v43, %v1564_v13  ;;  %v1642_v59 = vmax.f32 %v1606_v3, 0.0  ;;  %v3419_v10 = vmax.f32 %v3417_v37, %v3418_v9  ;;  %v3420_v13 = vld [vmem:[#allocation15_spill] sm:$0xff] }
 0x155   :  { %v1605_v34 = vadd.f32 %v3126_v43, %v1562_v0  ;;  %v2464_v58 = vpop.f32.mrb[60].mxu0  ;;  %v2504_v46 = vpop.f32.mrb[60].mxu1  ;;  %v1640_v38 = vmax.f32 %v1604_v61, 0.0  ;;  %v3421_v61 = vld [vmem:[#allocation16_spill] sm:$0xff] }
 0x156   :  { %v1643_v60 = vmax.f32 %v1607_v57, 0.0  ;;  %v1173_v14 = vmax.f32 %v3404_v12, %v2464_v58  ;;  %v1100_v52 = vpop.f32.mrb[61].mxu0  ;;  %v1494_v15 = vpop.f32.mrb[61].mxu1  ;;  %v3422_v0 = vmax.f32 %v3420_v13, %v3421_v61 }
 0x157   :  { %v1641_v39 = vmax.f32 %v1605_v34, 0.0  ;;  %v1171_v42 = vmax.f32 %v3407_v41, %v1100_v52  ;;  %v2465_v44 = vpop.f32.mrb[62].mxu0  ;;  %v2505_v45 = vpop.f32.mrb[62].mxu1 }
 0x158   :  { %v2225_v26 = vpack.c.bf16 %v1643_v60, %v1642_v59  ;;  %v1567_v27 = vmax.f32 %v1173_v14, %v2504_v46  ;;  %v1174_v63 = vmax.f32 %v3410_v62, %v2465_v44  ;;  %v1103_v17 = vpop.f32.mrb[63].mxu0  ;;  %v1497_v18 = vpop.f32.mrb[63].mxu1  ;;  %v3423_v60 = vld [vmem:[#allocation17_spill] sm:$0xff] }
 0x159   :  { %v2220_v1 = vpack.c.bf16 %v1641_v39, %v1640_v38  ;;  %v1565_v2 = vmax.f32 %v1171_v42, %v1494_v15  ;;  %v1172_v30 = vmax.f32 %v3413_v29, %v1103_v17  ;;  %v3425_v55 = vmax.f32 %v3423_v60, %v3424_v49 }
 0x15a   :  { %2267 = vst [vmem:[%s3326_s3 + $0x58] sm:$0xff] %v2225_v26   ;;  %v1610_v7 = vadd.f32 %v3126_v43, %v1567_v27  ;;  %v1568_v8 = vmax.f32 %v1174_v63, %v2505_v45  ;;  %v3426_v45 = vld [vmem:[#allocation19_spill] sm:$0xff]  ;;  %v3427_v26 = vld [vmem:[#allocation20_spill] sm:$0xff] }
 0x15b   :  { %2266 = vst [vmem:[%s3326_s3 + $0x50] sm:$0xff] %v2220_v1   ;;  %v1608_v32 = vadd.f32 %v3126_v43, %v1565_v2  ;;  %v1566_v33 = vmax.f32 %v1172_v30, %v1497_v18  ;;  %v3428_v27 = vmax.f32 %v3426_v45, %v3427_v26  ;;  %v3429_v18 = vld [vmem:[#allocation21_spill] sm:$0xff]  ;;  %v3430_v1 = vld [vmem:[#allocation22_spill] sm:$0xff] }
 0x15c   :  { %v1611_v22 = vadd.f32 %v3126_v43, %v1568_v8  ;;  %v1646_v6 = vmax.f32 %v1610_v7, 0.0  ;;  %v3431_v2 = vmax.f32 %v3429_v18, %v3430_v1  ;;  %v3432_v8 = vld [vmem:[#allocation23_spill] sm:$0xff] }
 0x15d   :  { %v1609_v25 = vadd.f32 %v3126_v43, %v1566_v33  ;;  %v2468_v35 = vpop.f32.mrb[64].mxu0  ;;  %v2508_v36 = vpop.f32.mrb[64].mxu1  ;;  %v1644_v50 = vmax.f32 %v1608_v32, 0.0  ;;  %v3433_v32 = vld [vmem:[#allocation24_spill] sm:$0xff] }
 0x15e   :  { %v1647_v20 = vmax.f32 %v1611_v22, 0.0  ;;  %v1177_v19 = vmax.f32 %v3416_v16, %v2468_v35  ;;  %v1116_v23 = vpop.f32.mrb[65].mxu0  ;;  %v1510_v24 = vpop.f32.mrb[65].mxu1  ;;  %v3434_v33 = vmax.f32 %v3432_v8, %v3433_v32 }
 0x15f   :  { %v1645_v51 = vmax.f32 %v1609_v25, 0.0  ;;  %v1175_v11 = vmax.f32 %v3419_v10, %v1116_v23  ;;  %v2469_v53 = vpop.f32.mrb[66].mxu0  ;;  %v2509_v54 = vpop.f32.mrb[66].mxu1 }
 0x160   :  { %v2235_v56 = vpack.c.bf16 %v1647_v20, %v1646_v6  ;;  %v1571_v3 = vmax.f32 %v1177_v19, %v2508_v36  ;;  %v1178_v57 = vmax.f32 %v3422_v0, %v2469_v53  ;;  %v1119_v34 = vpop.f32.mrb[67].mxu0  ;;  %v1513_v58 = vpop.f32.mrb[67].mxu1  ;;  %v3435_v20 = vld [vmem:[#allocation25_spill] sm:$0xff] }
 0x161   :  { %v2230_v46 = vpack.c.bf16 %v1645_v51, %v1644_v50  ;;  %v1569_v59 = vmax.f32 %v1175_v11, %v1510_v24  ;;  %v1176_v12 = vmax.f32 %v3425_v55, %v1119_v34  ;;  %v3437_v31 = vmax.f32 %v3435_v20, %v3436_v21 }
 0x162   :  { %2269 = vst [vmem:[%s3326_s3 + $0x68] sm:$0xff] %v2235_v56   ;;  %v1614_v14 = vadd.f32 %v3126_v43, %v1571_v3  ;;  %v1572_v52 = vmax.f32 %v1178_v57, %v2509_v54 }
 0x163   :  { %2268 = vst [vmem:[%s3326_s3 + $0x60] sm:$0xff] %v2230_v46   ;;  %v1612_v15 = vadd.f32 %v3126_v43, %v1569_v59  ;;  %v1570_v38 = vmax.f32 %v1176_v12, %v1513_v58 }
 0x164   :  { %v1615_v39 = vadd.f32 %v3126_v43, %v1572_v52  ;;  %v1650_v42 = vmax.f32 %v1614_v14, 0.0 }
 0x165   :  { %v1613_v28 = vadd.f32 %v3126_v43, %v1570_v38  ;;  %v2472_v40 = vpop.f32.mrb[68].mxu0  ;;  %v2512_v41 = vpop.f32.mrb[68].mxu1  ;;  %v1648_v63 = vmax.f32 %v1612_v15, 0.0 }
 0x166   :  { %v1651_v44 = vmax.f32 %v1615_v39, 0.0  ;;  %v1181_v47 = vmax.f32 %v3428_v27, %v2472_v40  ;;  %v1132_v48 = vpop.f32.mrb[69].mxu0  ;;  %v1526_v62 = vpop.f32.mrb[69].mxu1 }
 0x167   :  { %v1649_v17 = vmax.f32 %v1613_v28, 0.0  ;;  %v1179_v4 = vmax.f32 %v3431_v2, %v1132_v48  ;;  %v2473_v5 = vpop.f32.mrb[70].mxu0  ;;  %v2513_v29 = vpop.f32.mrb[70].mxu1 }
 0x168   :  { %v2245_v30 = vpack.c.bf16 %v1651_v44, %v1650_v42  ;;  %v1575_v7 = vmax.f32 %v1181_v47, %v2512_v41  ;;  %v1182_v22 = vmax.f32 %v3434_v33, %v2473_v5  ;;  %v1135_v25 = vpop.f32.mrb[71].mxu0  ;;  %v1529_v35 = vpop.f32.mrb[71].mxu1 }
 0x169   :  { %v2240_v36 = vpack.c.bf16 %v1649_v17, %v1648_v63  ;;  %v1573_v6 = vmax.f32 %v1179_v4, %v1526_v62  ;;  %v1180_v16 = vmax.f32 %v3437_v31, %v1135_v25 }
 0x16a   :  { %2271 = vst [vmem:[%s3326_s3 + $0x78] sm:$0xff] %v2245_v30   ;;  %v1618_v19 = vadd.f32 %v3126_v43, %v1575_v7  ;;  %v1576_v23 = vmax.f32 %v1182_v22, %v2513_v29 }
 0x16b   :  { %2270 = vst [vmem:[%s3326_s3 + $0x70] sm:$0xff] %v2240_v36   ;;  %v1616_v24 = vadd.f32 %v3126_v43, %v1573_v6  ;;  %v1574_v50 = vmax.f32 %v1180_v16, %v1529_v35 }
 0x16c   :  { %v1619_v51 = vadd.f32 %v3126_v43, %v1576_v23  ;;  %v1654_v9 = vmax.f32 %v1618_v19, 0.0 }
 0x16d   :  { %v1617_v37 = vadd.f32 %v3126_v43, %v1574_v50  ;;  %v1652_v11 = vmax.f32 %v1616_v24, 0.0 }
 0x16e   :  { %v1655_v10 = vmax.f32 %v1619_v51, 0.0 }
 0x16f   :  { %v1653_v53 = vmax.f32 %v1617_v37, 0.0 }
 0x170   :  { %v2255_v54 = vpack.c.bf16 %v1655_v10, %v1654_v9 }
 0x171   :  { %v2250_v56 = vpack.c.bf16 %v1653_v53, %v1652_v11 }
 0x172   :  { %2273 = vst [vmem:[%s3326_s3 + $0x88] sm:$0xff] %v2255_v54  }
 0x173   :  { %2272 = vst [vmem:[%s3326_s3 + $0x80] sm:$0xff] %v2250_v56  }

// kernel: fedavg_cnn_forward.4
= control target key start
LH: loop header
LB: loop body
LE: loop exit
PB: predicated region body
PF: predicated region fallthrough
CT: control target
= control target key end

     0   :  { %vm501_vm0 = vcmask 261120   ;;  %s2999_s1 = inlined_call_operand.vmem [shape: bf16[800,128], index: 1, kind: input, shape index: {}]   ;;  %s3000_s0 = inlined_call_operand.vmem [shape: bf16[4,32,800], index: 0, kind: input, shape index: {}]   ;;  %s3001_s2 = inlined_call_operand.vmem [shape: f32[1,128], index: 2, kind: input, shape index: {}]   ;;  %s3002_s3 = inlined_call_operand.vmem [shape: bf16[32,128], index: 3, kind: output, shape index: {}]  }
   0x1   :  { %v2341_v0 = vld [vmem:[%s2999_s1 + $0x40] sm:$0xff]   ;;  %v2364_v4 = vld [vmem:[%s2999_s1 + $0x48] sm:$0xff]   ;;  %v2388_v8 = vld [vmem:[%s2999_s1 + $0x50] sm:$0xff]  }
   0x2   :  { %v2346_v1 = vld [vmem:[%s2999_s1 + $0xc0] sm:$0xff]   ;;  %1804 = vmatprep.subr.bf16.mxu0 %v2341_v0  ;;  %v2370_v5 = vld [vmem:[%s2999_s1 + $0xc8] sm:$0xff]   ;;  %v2394_v9 = vld [vmem:[%s2999_s1 + $0xd0] sm:$0xff]  }
   0x3   :  { %v2352_v2 = vld [vmem:[%s2999_s1] sm:$0xff]   ;;  %1832 = vmatprep.subr.bf16.mxu1 %v2346_v1  ;;  %v2376_v6 = vld [vmem:[%s2999_s1 + $0x8] sm:$0xff]   ;;  %v2400_v10 = vld [vmem:[%s2999_s1 + $0x10] sm:$0xff]  }
   0x4   :  { %v2358_v3 = vld [vmem:[%s2999_s1 + $0x80] sm:$0xff]   ;;  %1805 = vmatpush3.bf16.msra.mxu0 %v2352_v2  ;;  %v2382_v7 = vld [vmem:[%s2999_s1 + $0x88] sm:$0xff]   ;;  %v2406_v11 = vld [vmem:[%s2999_s1 + $0x90] sm:$0xff]  }
   0x5   :  { %1833 = vmatpush3.bf16.msra.mxu1 %v2358_v3  ;;  %1806 = vmatprep.subr.bf16.mxu0 %v2364_v4  ;;  %v2412_v12 = vld [vmem:[%s2999_s1 + $0x58] sm:$0xff]   ;;  %v2436_v16 = vld [vmem:[%s2999_s1 + $0x60] sm:$0xff]   ;;  %v2460_v20 = vld [vmem:[%s2999_s1 + $0x68] sm:$0xff]  }
   0x6   :  { %1834 = vmatprep.subr.bf16.mxu1 %v2370_v5  ;;  %v2418_v13 = vld [vmem:[%s2999_s1 + $0xd8] sm:$0xff]   ;;  %v2442_v17 = vld [vmem:[%s2999_s1 + $0xe0] sm:$0xff]   ;;  %v2466_v21 = vld [vmem:[%s2999_s1 + $0xe8] sm:$0xff]  }
   0x7   :  { %v2424_v14 = vld [vmem:[%s2999_s1 + $0x18] sm:$0xff]   ;;  %v2448_v18 = vld [vmem:[%s2999_s1 + $0x20] sm:$0xff]   ;;  %v2472_v22 = vld [vmem:[%s2999_s1 + $0x28] sm:$0xff]  }
   0x8   :  { %1807 = vmatpush3.bf16.msra.mxu0 %v2376_v6  ;;  %v2430_v15 = vld [vmem:[%s2999_s1 + $0x98] sm:$0xff]   ;;  %v2454_v19 = vld [vmem:[%s2999_s1 + $0xa0] sm:$0xff]   ;;  %v2478_v23 = vld [vmem:[%s2999_s1 + $0xa8] sm:$0xff]  }
   0x9   :  { %1835 = vmatpush3.bf16.msra.mxu1 %v2382_v7  ;;  %1808 = vmatprep.subr.bf16.mxu0 %v2388_v8  ;;  %v2484_v24 = vld [vmem:[%s2999_s1 + $0x70] sm:$0xff]   ;;  %v2508_v28 = vld [vmem:[%s2999_s1 + $0x78] sm:$0xff]   ;;  %v2222_v33 = vld [vmem:[%s3000_s0 + $0x4] ss:$28 sps:$4 sm:$0xff]  }
   0xa   :  { %1836 = vmatprep.subr.bf16.mxu1 %v2394_v9  ;;  %v2490_v25 = vld [vmem:[%s2999_s1 + $0xf0] sm:$0xff]   ;;  %v2514_v29 = vld [vmem:[%s2999_s1 + $0xf8] sm:$0xff]   ;;  %v2223_v34 = vld [vmem:[%s3000_s0 + $0x8] ss:$28 sps:$4 sm:$0xff]   ;;  %540 = vmatprep.mubr.bf16.mxu0 %v2222_v33 }
   0xb   :  { %v2496_v26 = vld [vmem:[%s2999_s1 + $0x30] sm:$0xff]   ;;  %v2520_v30 = vld [vmem:[%s2999_s1 + $0x38] sm:$0xff]   ;;  %v2225_v35 = vld [vmem:[%s3000_s0 + $0xc] ss:$28 sps:$4 sm:$0xff]  }
   0xc   :  { %1809 = vmatpush3.bf16.msra.mxu0 %v2400_v10  ;;  %v2502_v27 = vld [vmem:[%s2999_s1 + $0xb0] sm:$0xff]   ;;  %v2526_v31 = vld [vmem:[%s2999_s1 + $0xb8] sm:$0xff]   ;;  %v2545_v36 = vld [vmem:[%s2999_s1 + $0x140] sm:$0xff]   ;;  %589 = vmatprep.mubr.bf16.mxu1 %v2225_v35 }
   0xd   :  { %1837 = vmatpush3.bf16.msra.mxu1 %v2406_v11  ;;  %1810 = vmatprep.subr.bf16.mxu0 %v2412_v12  ;;  %v2220_v32 = vld [vmem:[%s3000_s0] ss:$28 sps:$4 sm:$0xff]   ;;  %v2562_v39 = vld [vmem:[%s2999_s1 + $0x148] sm:$0xff]   ;;  %v2235_v43 = vld [vmem:[%s3000_s0 + $0x38] ss:$28 sps:$4 sm:$0xff]  }
   0xe   :  { %1838 = vmatprep.subr.bf16.mxu1 %v2418_v13  ;;  %v2550_v37 = vld [vmem:[%s2999_s1 + $0x180] sm:$0xff]   ;;  %v2569_v40 = vld [vmem:[%s2999_s1 + $0x108] sm:$0xff]   ;;  %v2231_v41 = vld [vmem:[%s3000_s0 + $0x3c] ss:$28 sps:$4 sm:$0xff]  }
   0xf   :  { %v2556_v38 = vld [vmem:[%s2999_s1 + $0x100] sm:$0xff]   ;;  %v2588_v45 = vld [vmem:[%s2999_s1 + $0x150] sm:$0xff]   ;;  %v2593_v46 = vld [vmem:[%s2999_s1 + $0x188] sm:$0xff]  }
  0x10   :  { %1811 = vmatpush3.bf16.msra.mxu0 %v2424_v14  ;;  %v2233_v42 = vld [vmem:[%s3000_s0 + $0x44] ss:$28 sps:$4 sm:$0xff]   ;;  %v2599_v47 = vld [vmem:[%s2999_s1 + $0x110] sm:$0xff]   ;;  %v2605_v48 = vld [vmem:[%s2999_s1 + $0x158] sm:$0xff]  }
  0x11   :  { %1839 = vmatpush3.bf16.msra.mxu1 %v2430_v15  ;;  %1812 = vmatprep.subr.bf16.mxu0 %v2436_v16  ;;  %v2236_v44 = vld [vmem:[%s3000_s0 + $0x40] ss:$28 sps:$4 sm:$0xff]   ;;  %v2242_v50 = vld [vmem:[%s3000_s0 + $0x18] ss:$28 sps:$4 sm:$0xff]   ;;  %v2244_v52 = vld [vmem:[%s3000_s0 + $0x50] ss:$28 sps:$4 sm:$0xff]  }
  0x12   :  { %1840 = vmatprep.subr.bf16.mxu1 %v2442_v17  ;;  %v2612_v49 = vld [vmem:[%s2999_s1 + $0x118] sm:$0xff]   ;;  %v2622_v51 = vld [vmem:[%s2999_s1 + $0x160] sm:$0xff]   ;;  %v2638_v54 = vld [vmem:[%s2999_s1 + $0x168] sm:$0xff]  }
  0x13   :  { %v2632_v53 = vld [vmem:[%s2999_s1 + $0x120] sm:$0xff]   ;;  %v2647_v55 = vld [vmem:[%s2999_s1 + $0x128] sm:$0xff]   ;;  %v2653_v56 = vld [vmem:[%s2999_s1 + $0x170] sm:$0xff]  }
  0x14   :  { %1813 = vmatpush3.bf16.msra.mxu0 %v2448_v18  ;;  %v2254_v57 = vld [vmem:[%s3000_s0 + $0x14] ss:$28 sps:$4 sm:$0xff]   ;;  %v2670_v59 = vld [vmem:[%s2999_s1 + $0x178] sm:$0xff]   ;;  %v2255_v63 = vld [vmem:[%s3000_s0 + $0x4c] ss:$28 sps:$4 sm:$0xff]  }
  0x15   :  { %1841 = vmatpush3.bf16.msra.mxu1 %v2454_v19  ;;  %1814 = vmatprep.subr.bf16.mxu0 %v2460_v20  ;;  %v2664_v58 = vld [vmem:[%s2999_s1 + $0x130] sm:$0xff]   ;;  %v2681_v61 = vld [vmem:[%s2999_s1 + $0x138] sm:$0xff]   ;;  %v2264_v35 = vld [vmem:[%s3000_s0 + $0xac] ss:$28 sps:$4 sm:$0xff]  }
  0x16   :  { %1842 = vmatprep.subr.bf16.mxu1 %v2466_v21  ;;  %v2260_v60 = vld [vmem:[%s3000_s0 + $0x74] ss:$28 sps:$4 sm:$0xff]   ;;  %v2263_v33 = vld [vmem:[%s3000_s0 + $0x7c] ss:$28 sps:$4 sm:$0xff]  }
  0x17   :  { %v2252_v62 = vld [vmem:[%s3000_s0 + $0x10] ss:$28 sps:$4 sm:$0xff]  }
  0x18   :  { %1815 = vmatpush3.bf16.msra.mxu0 %v2472_v22 }
  0x19   :  { %1843 = vmatpush3.bf16.msra.mxu1 %v2478_v23  ;;  %1816 = vmatprep.subr.bf16.mxu0 %v2484_v24 }
  0x1a   :  { %1844 = vmatprep.subr.bf16.mxu1 %v2490_v25 }
  0x1c   :  { %1817 = vmatpush3.bf16.msra.mxu0 %v2496_v26 }
  0x1d   :  { %1845 = vmatpush3.bf16.msra.mxu1 %v2502_v27  ;;  %1818 = vmatprep.subr.bf16.mxu0 %v2508_v28 }
  0x1e   :  { %1846 = vmatprep.subr.bf16.mxu1 %v2514_v29 }
  0x20   :  { %1819 = vmatpush3.bf16.msra.mxu0 %v2520_v30 }
  0x21   :  { %1847 = vmatpush3.bf16.msra.mxu1 %v2526_v31  ;;  %1860 = vmatprep.subr.bf16.mxu0 %v2545_v36 }
  0x22   :  { %2156 = vmatprep.subr.bf16.mxu1 %v2550_v37 }
  0x23   :  { %541 = vmatmul.mubr.bf16.vlgmr.msra.gmra.mrb[0].mxu0 %v2220_v32  ;;  %v2257_v32 = vld [vmem:[%s3000_s0 + $0x48] ss:$28 sps:$4 sm:$0xff]  }
  0x24   :  { %590 = vmatmul.mubr.bf16.vlgmr.msra.gmra.mrb[0].mxu1 %v2223_v34  ;;  %1861 = vmatpush3.bf16.msra.mxu0 %v2556_v38  ;;  %v2258_v34 = vld [vmem:[%s3000_s0 + $0x70] ss:$28 sps:$4 sm:$0xff]  }
  0x25   :  { %2157 = vmatpush3.bf16.msra.mxu1 %v2550_v37  ;;  %1862 = vmatprep.subr.bf16.mxu0 %v2562_v39 }
  0x26   :  { %548 = vmatprep.mubr.bf16.mxu0 %v2231_v41  ;;  %597 = vmatprep.mubr.bf16.mxu1 %v2233_v42  ;;  %v2266_v41 = vld [vmem:[%s3000_s0 + $0xa8] ss:$28 sps:$4 sm:$0xff]  }
  0x27   :  { %2158 = vmatprep.subr.bf16.mxu1 %v2593_v46  ;;  %v2272_v42 = vld [vmem:[%s3000_s0 + $0x84] ss:$28 sps:$4 sm:$0xff]  }
  0x28   :  { %1863 = vmatpush3.bf16.msra.mxu0 %v2569_v40 }
  0x29   :  { %1864 = vmatprep.subr.bf16.mxu0 %v2588_v45  ;;  %2159 = vmatpush3.bf16.msra.mxu1 %v2593_v46 }
  0x2a   :  { %1892 = vmatprep.subr.bf16.mxu1 %v2341_v0 }
  0x2b   :  { %549 = vmatmul.mubr.bf16.gmra.mrb[4].mxu0 %v2235_v43  ;;  %v2261_v43 = vld [vmem:[%s3000_s0 + $0x78] ss:$28 sps:$4 sm:$0xff]  }
  0x2c   :  { %598 = vmatmul.mubr.bf16.gmra.mrb[4].mxu1 %v2236_v44  ;;  %1865 = vmatpush3.bf16.msra.mxu0 %v2599_v47  ;;  %v2267_v44 = vld [vmem:[%s3000_s0 + $0xb4] ss:$28 sps:$4 sm:$0xff]  }
  0x2d   :  { %1866 = vmatprep.subr.bf16.mxu0 %v2605_v48  ;;  %2160 = vmatprep.mubr.msk.bf16.mxu1 %vm501_vm0, %v2242_v50  ;;  %v2269_v50 = vld [vmem:[%s3000_s0 + $0xb0] ss:$28 sps:$4 sm:$0xff]  }
  0x2e   :  { %638 = vmatprep.mubr.bf16.mxu0 %v2254_v57  ;;  %v2270_v57 = vld [vmem:[%s3000_s0 + $0x80] ss:$28 sps:$4 sm:$0xff]  }
  0x30   :  { %1867 = vmatpush3.bf16.msra.mxu0 %v2612_v49 }
  0x31   :  { %1868 = vmatprep.subr.bf16.mxu0 %v2622_v51 }
  0x34   :  { %2161 = vmatmul.mubr.msk.bf16.vlgmr.msra.gmra.mrb[8].mxu1 %vm501_vm0, %v2244_v52  ;;  %1869 = vmatpush3.bf16.msra.mxu0 %v2632_v53  ;;  %v2273_v52 = vld [vmem:[%s3000_s0 + $0x88] ss:$28 sps:$4 sm:$0xff]  }
  0x35   :  { %1893 = vmatpush3.bf16.msra.mxu1 %v2352_v2  ;;  %1870 = vmatprep.subr.bf16.mxu0 %v2638_v54 }
  0x36   :  { %1894 = vmatprep.subr.bf16.mxu1 %v2364_v4  ;;  %829 = vmatprep.mubr.bf16.mxu1 %v2260_v60  ;;  %v2274_v60 = vld [vmem:[%s3000_s0 + $0xc0] ss:$28 sps:$4 sm:$0xff]  }
  0x38   :  { %1871 = vmatpush3.bf16.msra.mxu0 %v2647_v55 }
  0x39   :  { %1895 = vmatpush3.bf16.msra.mxu1 %v2376_v6  ;;  %1872 = vmatprep.subr.bf16.mxu0 %v2653_v56 }
  0x3a   :  { %1896 = vmatprep.subr.bf16.mxu1 %v2388_v8 }
  0x3c   :  { %1873 = vmatpush3.bf16.msra.mxu0 %v2664_v58 }
  0x3d   :  { %1897 = vmatpush3.bf16.msra.mxu1 %v2400_v10  ;;  %1874 = vmatprep.subr.bf16.mxu0 %v2670_v59 }
  0x3e   :  { %1898 = vmatprep.subr.bf16.mxu1 %v2412_v12 }
  0x40   :  { %1875 = vmatpush3.bf16.msra.mxu0 %v2681_v61 }
  0x41   :  { %1899 = vmatpush3.bf16.msra.mxu1 %v2424_v14  ;;  %1920 = vmatprep.subr.bf16.mxu0 %v2346_v1 }
  0x42   :  { %1900 = vmatprep.subr.bf16.mxu1 %v2436_v16 }
  0x43   :  { %639 = vmatmul.mubr.bf16.vlgmr.msra.gmra.mrb[8].mxu0 %v2252_v62  ;;  %v2275_v62 = vld [vmem:[%s3000_s0 + $0xbc] ss:$28 sps:$4 sm:$0xff]  }
  0x44   :  { %1921 = vmatpush3.bf16.msra.mxu0 %v2358_v3  ;;  %646 = vmatprep.mubr.bf16.mxu0 %v2255_v63  ;;  %v2280_v63 = vld [vmem:[%s3000_s0 + $0xe4] ss:$28 sps:$4 sm:$0xff]  }
  0x45   :  { %1901 = vmatpush3.bf16.msra.mxu1 %v2448_v18  ;;  %1922 = vmatprep.subr.bf16.mxu0 %v2370_v5 }
  0x46   :  { %1902 = vmatprep.subr.bf16.mxu1 %v2460_v20 }
  0x48   :  { %1923 = vmatpush3.bf16.msra.mxu0 %v2382_v7 }
  0x49   :  { %1903 = vmatpush3.bf16.msra.mxu1 %v2472_v22  ;;  %1924 = vmatprep.subr.bf16.mxu0 %v2394_v9 }
  0x4a   :  { %1904 = vmatprep.subr.bf16.mxu1 %v2484_v24 }
  0x4b   :  { %647 = vmatmul.mubr.bf16.gmra.mrb[12].mxu0 %v2257_v32  ;;  %v2277_v32 = vld [vmem:[%s3000_s0 + $0xb8] ss:$28 sps:$4 sm:$0xff]  }
  0x4c   :  { %1925 = vmatpush3.bf16.msra.mxu0 %v2406_v11  ;;  %878 = vmatprep.mubr.bf16.mxu0 %v2263_v33  ;;  %v2283_v33 = vld [vmem:[%s3000_s0 + $0xec] ss:$28 sps:$4 sm:$0xff]  }
  0x4d   :  { %1905 = vmatpush3.bf16.msra.mxu1 %v2496_v26  ;;  %1926 = vmatprep.subr.bf16.mxu0 %v2418_v13 }
  0x4e   :  { %1906 = vmatprep.subr.bf16.mxu1 %v2508_v28 }
  0x50   :  { %1927 = vmatpush3.bf16.msra.mxu0 %v2430_v15 }
  0x51   :  { %1907 = vmatpush3.bf16.msra.mxu1 %v2520_v30  ;;  %1928 = vmatprep.subr.bf16.mxu0 %v2442_v17 }
  0x52   :  { %1948 = vmatprep.subr.bf16.mxu1 %v2545_v36 }
  0x54   :  { %830 = vmatmul.mubr.bf16.vlgmr.msra.gmra.mrb[12].mxu1 %v2258_v34  ;;  %1929 = vmatpush3.bf16.msra.mxu0 %v2454_v19  ;;  %v2281_v34 = vld [vmem:[%s3000_s0 + $0xe8] ss:$28 sps:$4 sm:$0xff]  }
  0x55   :  { %1949 = vmatpush3.bf16.msra.mxu1 %v2556_v38  ;;  %837 = vmatprep.mubr.bf16.mxu1 %v2264_v35  ;;  %v2278_v35 = vld [vmem:[%s3000_s0 + $0xe0] ss:$28 sps:$4 sm:$0xff]  }
  0x56   :  { %1950 = vmatprep.subr.bf16.mxu1 %v2562_v39  ;;  %1930 = vmatprep.subr.bf16.mxu0 %v2466_v21 }
  0x58   :  { %1931 = vmatpush3.bf16.msra.mxu0 %v2478_v23 }
  0x59   :  { %1951 = vmatpush3.bf16.msra.mxu1 %v2569_v40  ;;  %1932 = vmatprep.subr.bf16.mxu0 %v2490_v25 }
  0x5a   :  { %1952 = vmatprep.subr.bf16.mxu1 %v2588_v45 }
  0x5c   :  { %838 = vmatmul.mubr.bf16.gmra.mrb[16].mxu1 %v2266_v41  ;;  %1933 = vmatpush3.bf16.msra.mxu0 %v2502_v27  ;;  %v2284_v41 = vld [vmem:[%s3000_s0 + $0x11c] ss:$28 sps:$4 sm:$0xff]  }
  0x5d   :  { %1953 = vmatpush3.bf16.msra.mxu1 %v2599_v47  ;;  %927 = vmatprep.mubr.bf16.mxu1 %v2272_v42  ;;  %v2286_v42 = vld [vmem:[%s3000_s0 + $0x124] ss:$28 sps:$4 sm:$0xff]  }
  0x5e   :  { %1954 = vmatprep.subr.bf16.mxu1 %v2605_v48  ;;  %1934 = vmatprep.subr.bf16.mxu0 %v2514_v29 }
  0x60   :  { %1935 = vmatpush3.bf16.msra.mxu0 %v2526_v31 }
  0x61   :  { %1955 = vmatpush3.bf16.msra.mxu1 %v2612_v49  ;;  %2164 = vmatprep.subr.bf16.mxu0 %v2550_v37 }
  0x62   :  { %1956 = vmatprep.subr.bf16.mxu1 %v2622_v51 }
  0x63   :  { %879 = vmatmul.mubr.bf16.vlgmr.msra.gmra.mrb[16].mxu0 %v2261_v43  ;;  %v2289_v43 = vld [vmem:[%s3000_s0 + $0x120] ss:$28 sps:$4 sm:$0xff]  }
  0x64   :  { %886 = vmatprep.mubr.bf16.mxu0 %v2267_v44  ;;  %2165 = vmatpush3.bf16.msra.mxu0 %v2550_v37  ;;  %v2288_v44 = vld [vmem:[%s3000_s0 + $0x118] ss:$28 sps:$4 sm:$0xff]  }
  0x65   :  { %1957 = vmatpush3.bf16.msra.mxu1 %v2632_v53  ;;  %2166 = vmatprep.subr.bf16.mxu0 %v2593_v46 }
  0x66   :  { %1958 = vmatprep.subr.bf16.mxu1 %v2638_v54 }
  0x68   :  { %2167 = vmatpush3.bf16.msra.mxu0 %v2593_v46 }
  0x69   :  { %1959 = vmatpush3.bf16.msra.mxu1 %v2647_v55  ;;  %1980 = vmatprep.subr.bf16.mxu0 %v2341_v0 }
  0x6a   :  { %1960 = vmatprep.subr.bf16.mxu1 %v2653_v56 }
  0x6b   :  { %887 = vmatmul.mubr.bf16.gmra.mrb[20].mxu0 %v2269_v50  ;;  %v2290_v50 = vld [vmem:[%s3000_s0 + $0xf8] ss:$28 sps:$4 sm:$0xff]  }
  0x6c   :  { %2168 = vmatprep.mubr.msk.bf16.mxu0 %vm501_vm0, %v2273_v52  ;;  %v2294_v52 = vld [vmem:[%s3000_s0 + $0xf4] ss:$28 sps:$4 sm:$0xff]  }
  0x6d   :  { %1961 = vmatpush3.bf16.msra.mxu1 %v2664_v58 }
  0x6e   :  { %1962 = vmatprep.subr.bf16.mxu1 %v2670_v59 }
  0x71   :  { %1963 = vmatpush3.bf16.msra.mxu1 %v2681_v61 }
  0x72   :  { %2008 = vmatprep.subr.bf16.mxu1 %v2346_v1 }
  0x73   :  { %2169 = vmatmul.mubr.msk.bf16.vlgmr.msra.gmra.mrb[24].mxu0 %vm501_vm0, %v2274_v60 }
  0x74   :  { %928 = vmatmul.mubr.bf16.vlgmr.msra.gmra.mrb[20].mxu1 %v2270_v57  ;;  %1981 = vmatpush3.bf16.msra.mxu0 %v2352_v2  ;;  %v2291_v57 = vld [vmem:[%s3000_s0 + $0x130] ss:$28 sps:$4 sm:$0xff]  }
  0x75   :  { %2009 = vmatpush3.bf16.msra.mxu1 %v2358_v3  ;;  %1982 = vmatprep.subr.bf16.mxu0 %v2364_v4 }
  0x76   :  { %2010 = vmatprep.subr.bf16.mxu1 %v2370_v5  ;;  %935 = vmatprep.mubr.bf16.mxu1 %v2275_v62 }
  0x77   :  { %1122 = vmatprep.mubr.bf16.mxu0 %v2280_v63 }
  0x78   :  { %1983 = vmatpush3.bf16.msra.mxu0 %v2376_v6 }
  0x79   :  { %2011 = vmatpush3.bf16.msra.mxu1 %v2382_v7  ;;  %1984 = vmatprep.subr.bf16.mxu0 %v2388_v8 }
  0x7a   :  { %2012 = vmatprep.subr.bf16.mxu1 %v2394_v9 }
  0x7c   :  { %936 = vmatmul.mubr.bf16.gmra.mrb[24].mxu1 %v2277_v32  ;;  %1985 = vmatpush3.bf16.msra.mxu0 %v2400_v10 }
  0x7d   :  { %2013 = vmatpush3.bf16.msra.mxu1 %v2406_v11  ;;  %1171 = vmatprep.mubr.bf16.mxu1 %v2283_v33 }
  0x7e   :  { %2014 = vmatprep.subr.bf16.mxu1 %v2418_v13  ;;  %1986 = vmatprep.subr.bf16.mxu0 %v2412_v12 }
  0x80   :  { %1987 = vmatpush3.bf16.msra.mxu0 %v2424_v14 }
  0x81   :  { %2015 = vmatpush3.bf16.msra.mxu1 %v2430_v15  ;;  %1988 = vmatprep.subr.bf16.mxu0 %v2436_v16 }
  0x82   :  { %2016 = vmatprep.subr.bf16.mxu1 %v2442_v17 }
  0x84   :  { %1989 = vmatpush3.bf16.msra.mxu0 %v2448_v18 }
  0x85   :  { %2017 = vmatpush3.bf16.msra.mxu1 %v2454_v19  ;;  %1990 = vmatprep.subr.bf16.mxu0 %v2460_v20 }
  0x86   :  { %2018 = vmatprep.subr.bf16.mxu1 %v2466_v21 }
  0x88   :  { %1991 = vmatpush3.bf16.msra.mxu0 %v2472_v22 }
  0x89   :  { %2019 = vmatpush3.bf16.msra.mxu1 %v2478_v23  ;;  %1992 = vmatprep.subr.bf16.mxu0 %v2484_v24 }
  0x8a   :  { %2020 = vmatprep.subr.bf16.mxu1 %v2490_v25 }
  0x8c   :  { %1993 = vmatpush3.bf16.msra.mxu0 %v2496_v26 }
  0x8d   :  { %2021 = vmatpush3.bf16.msra.mxu1 %v2502_v27  ;;  %1994 = vmatprep.subr.bf16.mxu0 %v2508_v28 }
  0x8e   :  { %2022 = vmatprep.subr.bf16.mxu1 %v2514_v29 }
  0x90   :  { %1995 = vmatpush3.bf16.msra.mxu0 %v2520_v30 }
  0x91   :  { %2023 = vmatpush3.bf16.msra.mxu1 %v2526_v31  ;;  %2036 = vmatprep.subr.bf16.mxu0 %v2545_v36 }
  0x92   :  { %2172 = vmatprep.subr.bf16.mxu1 %v2550_v37 }
  0x93   :  { %1123 = vmatmul.mubr.bf16.vlgmr.msra.gmra.mrb[28].mxu0 %v2278_v35 }
  0x94   :  { %1172 = vmatmul.mubr.bf16.vlgmr.msra.gmra.mrb[28].mxu1 %v2281_v34  ;;  %2037 = vmatpush3.bf16.msra.mxu0 %v2556_v38 }
  0x95   :  { %2173 = vmatpush3.bf16.msra.mxu1 %v2550_v37  ;;  %1130 = vmatprep.mubr.bf16.mxu0 %v2284_v41 }
  0x96   :  { %2038 = vmatprep.subr.bf16.mxu0 %v2562_v39  ;;  %1179 = vmatprep.mubr.bf16.mxu1 %v2286_v42 }
  0x97   :  { %2174 = vmatprep.subr.bf16.mxu1 %v2593_v46 }
  0x98   :  { %2039 = vmatpush3.bf16.msra.mxu0 %v2569_v40 }
  0x99   :  { %2175 = vmatpush3.bf16.msra.mxu1 %v2593_v46  ;;  %2040 = vmatprep.subr.bf16.mxu0 %v2588_v45 }
  0x9a   :  { %2068 = vmatprep.subr.bf16.mxu1 %v2341_v0  ;;  %v2300_v0 = vld [vmem:[%s3000_s0 + $0x154] ss:$28 sps:$4 sm:$0xff]  }
  0x9b   :  { %1131 = vmatmul.mubr.bf16.gmra.mrb[32].mxu0 %v2288_v44 }
  0x9c   :  { %1180 = vmatmul.mubr.bf16.gmra.mrb[32].mxu1 %v2289_v43  ;;  %2041 = vmatpush3.bf16.msra.mxu0 %v2599_v47 }
  0x9d   :  { %2176 = vmatprep.mubr.msk.bf16.mxu1 %vm501_vm0, %v2290_v50  ;;  %1220 = vmatprep.mubr.bf16.mxu0 %v2294_v52 }
  0x9e   :  { %2042 = vmatprep.subr.bf16.mxu0 %v2605_v48 }
  0xa0   :  { %2043 = vmatpush3.bf16.msra.mxu0 %v2612_v49 }
  0xa1   :  { %2044 = vmatprep.subr.bf16.mxu0 %v2622_v51 }
  0xa4   :  { %2177 = vmatmul.mubr.msk.bf16.vlgmr.msra.gmra.mrb[36].mxu1 %vm501_vm0, %v2291_v57  ;;  %2045 = vmatpush3.bf16.msra.mxu0 %v2632_v53 }
  0xa5   :  { %2069 = vmatpush3.bf16.msra.mxu1 %v2352_v2  ;;  %1415 = vmatprep.mubr.bf16.mxu1 %v2300_v0  ;;  %v2292_v2 = vld [vmem:[%s3000_s0 + $0xf0] ss:$28 sps:$4 sm:$0xff]  }
  0xa6   :  { %2070 = vmatprep.subr.bf16.mxu1 %v2364_v4  ;;  %2046 = vmatprep.subr.bf16.mxu0 %v2638_v54  ;;  %v2295_v4 = vld [vmem:[%s3000_s0 + $0x12c] ss:$28 sps:$4 sm:$0xff]  }
  0xa8   :  { %2047 = vmatpush3.bf16.msra.mxu0 %v2647_v55 }
  0xa9   :  { %2071 = vmatpush3.bf16.msra.mxu1 %v2376_v6  ;;  %2048 = vmatprep.subr.bf16.mxu0 %v2653_v56  ;;  %v2304_v6 = vld [vmem:[%s3000_s0 + $0x18c] ss:$28 sps:$4 sm:$0xff]  }
  0xaa   :  { %2072 = vmatprep.subr.bf16.mxu1 %v2388_v8  ;;  %v2312_v8 = vld [vmem:[%s3000_s0 + $0x164] ss:$28 sps:$4 sm:$0xff]  }
  0xac   :  { %2049 = vmatpush3.bf16.msra.mxu0 %v2664_v58 }
  0xad   :  { %2073 = vmatpush3.bf16.msra.mxu1 %v2400_v10  ;;  %2050 = vmatprep.subr.bf16.mxu0 %v2670_v59  ;;  %v2307_v10 = vld [vmem:[%s3000_s0 + $0x194] ss:$28 sps:$4 sm:$0xff]  }
  0xae   :  { %2074 = vmatprep.subr.bf16.mxu1 %v2412_v12  ;;  %v2313_v12 = vld [vmem:[%s3000_s0 + $0x168] ss:$28 sps:$4 sm:$0xff]  }
  0xb0   :  { %2051 = vmatpush3.bf16.msra.mxu0 %v2681_v61 }
  0xb1   :  { %2075 = vmatpush3.bf16.msra.mxu1 %v2424_v14  ;;  %2096 = vmatprep.subr.bf16.mxu0 %v2346_v1  ;;  %v2297_v1 = vld [vmem:[%s3000_s0 + $0x128] ss:$28 sps:$4 sm:$0xff]   ;;  %v2314_v14 = vld [vmem:[%s3000_s0 + $0x1a0] ss:$28 sps:$4 sm:$0xff]  }
  0xb2   :  { %2076 = vmatprep.subr.bf16.mxu1 %v2436_v16  ;;  %v2317_v16 = vld [vmem:[%s3000_s0 + $0x198] ss:$28 sps:$4 sm:$0xff]  }
  0xb3   :  { %1221 = vmatmul.mubr.bf16.vlgmr.msra.gmra.mrb[36].mxu0 %v2292_v2 }
  0xb4   :  { %2097 = vmatpush3.bf16.msra.mxu0 %v2358_v3  ;;  %1228 = vmatprep.mubr.bf16.mxu0 %v2295_v4  ;;  %v2303_v3 = vld [vmem:[%s3000_s0 + $0x15c] ss:$28 sps:$4 sm:$0xff]  }
  0xb5   :  { %2077 = vmatpush3.bf16.msra.mxu1 %v2448_v18  ;;  %2098 = vmatprep.subr.bf16.mxu0 %v2370_v5  ;;  %v2298_v5 = vld [vmem:[%s3000_s0 + $0x150] ss:$28 sps:$4 sm:$0xff]  }
  0xb6   :  { %2078 = vmatprep.subr.bf16.mxu1 %v2460_v20 }
  0xb8   :  { %2099 = vmatpush3.bf16.msra.mxu0 %v2382_v7  ;;  %v2306_v7 = vld [vmem:[%s3000_s0 + $0x188] ss:$28 sps:$4 sm:$0xff]  }
  0xb9   :  { %2079 = vmatpush3.bf16.msra.mxu1 %v2472_v22  ;;  %2100 = vmatprep.subr.bf16.mxu0 %v2394_v9  ;;  %v2301_v9 = vld [vmem:[%s3000_s0 + $0x158] ss:$28 sps:$4 sm:$0xff]  }
  0xba   :  { %2080 = vmatprep.subr.bf16.mxu1 %v2484_v24 }
  0xbb   :  { %1229 = vmatmul.mubr.bf16.gmra.mrb[40].mxu0 %v2297_v1 }
  0xbc   :  { %2101 = vmatpush3.bf16.msra.mxu0 %v2406_v11  ;;  %1464 = vmatprep.mubr.bf16.mxu0 %v2303_v3  ;;  %v2309_v11 = vld [vmem:[%s3000_s0 + $0x190] ss:$28 sps:$4 sm:$0xff]  }
  0xbd   :  { %2081 = vmatpush3.bf16.msra.mxu1 %v2496_v26  ;;  %2102 = vmatprep.subr.bf16.mxu0 %v2418_v13  ;;  %v2310_v13 = vld [vmem:[%s3000_s0 + $0x160] ss:$28 sps:$4 sm:$0xff]  }
  0xbe   :  { %2082 = vmatprep.subr.bf16.mxu1 %v2508_v28 }
  0xc0   :  { %2103 = vmatpush3.bf16.msra.mxu0 %v2430_v15  ;;  %v2315_v15 = vld [vmem:[%s3000_s0 + $0x19c] ss:$28 sps:$4 sm:$0xff]  }
  0xc1   :  { %2083 = vmatpush3.bf16.msra.mxu1 %v2520_v30  ;;  %2104 = vmatprep.subr.bf16.mxu0 %v2442_v17 }
  0xc2   :  { %2124 = vmatprep.subr.bf16.mxu1 %v2545_v36 }
  0xc4   :  { %1416 = vmatmul.mubr.bf16.vlgmr.msra.gmra.mrb[40].mxu1 %v2298_v5  ;;  %2105 = vmatpush3.bf16.msra.mxu0 %v2454_v19 }
  0xc5   :  { %2125 = vmatpush3.bf16.msra.mxu1 %v2556_v38  ;;  %1423 = vmatprep.mubr.bf16.mxu1 %v2304_v6 }
  0xc6   :  { %2126 = vmatprep.subr.bf16.mxu1 %v2562_v39  ;;  %2106 = vmatprep.subr.bf16.mxu0 %v2466_v21 }
  0xc8   :  { %2107 = vmatpush3.bf16.msra.mxu0 %v2478_v23 }
  0xc9   :  { %2127 = vmatpush3.bf16.msra.mxu1 %v2569_v40  ;;  %2108 = vmatprep.subr.bf16.mxu0 %v2490_v25 }
  0xca   :  { %2128 = vmatprep.subr.bf16.mxu1 %v2588_v45 }
  0xcc   :  { %1424 = vmatmul.mubr.bf16.gmra.mrb[44].mxu1 %v2306_v7  ;;  %2109 = vmatpush3.bf16.msra.mxu0 %v2502_v27 }
  0xcd   :  { %2129 = vmatpush3.bf16.msra.mxu1 %v2599_v47  ;;  %1513 = vmatprep.mubr.bf16.mxu1 %v2312_v8 }
  0xce   :  { %2130 = vmatprep.subr.bf16.mxu1 %v2605_v48  ;;  %2110 = vmatprep.subr.bf16.mxu0 %v2514_v29 }
  0xd0   :  { %2111 = vmatpush3.bf16.msra.mxu0 %v2526_v31 }
  0xd1   :  { %2131 = vmatpush3.bf16.msra.mxu1 %v2612_v49  ;;  %2180 = vmatprep.subr.bf16.mxu0 %v2550_v37 }
  0xd2   :  { %2132 = vmatprep.subr.bf16.mxu1 %v2622_v51 }
  0xd3   :  { %1465 = vmatmul.mubr.bf16.vlgmr.msra.gmra.mrb[44].mxu0 %v2301_v9 }
  0xd4   :  { %1472 = vmatprep.mubr.bf16.mxu0 %v2307_v10  ;;  %2181 = vmatpush3.bf16.msra.mxu0 %v2550_v37 }
  0xd5   :  { %2133 = vmatpush3.bf16.msra.mxu1 %v2632_v53  ;;  %2182 = vmatprep.subr.bf16.mxu0 %v2593_v46 }
  0xd6   :  { %2134 = vmatprep.subr.bf16.mxu1 %v2638_v54 }
  0xd8   :  { %2183 = vmatpush3.bf16.msra.mxu0 %v2593_v46 }
  0xd9   :  { %2135 = vmatpush3.bf16.msra.mxu1 %v2647_v55 }
  0xda   :  { %2136 = vmatprep.subr.bf16.mxu1 %v2653_v56 }
  0xdb   :  { %1473 = vmatmul.mubr.bf16.gmra.mrb[48].mxu0 %v2309_v11 }
  0xdc   :  { %2184 = vmatprep.mubr.msk.bf16.mxu0 %vm501_vm0, %v2313_v12 }
  0xdd   :  { %2137 = vmatpush3.bf16.msra.mxu1 %v2664_v58 }
  0xde   :  { %2138 = vmatprep.subr.bf16.mxu1 %v2670_v59 }
  0xe1   :  { %2139 = vmatpush3.bf16.msra.mxu1 %v2681_v61 }
  0xe3   :  { %2185 = vmatmul.mubr.msk.bf16.vlgmr.msra.gmra.mrb[52].mxu0 %vm501_vm0, %v2314_v14 }
  0xe4   :  { %1514 = vmatmul.mubr.bf16.vlgmr.msra.gmra.mrb[48].mxu1 %v2310_v13 }
  0xe5   :  { %1521 = vmatprep.mubr.bf16.mxu1 %v2315_v15 }
  0xec   :  { %1522 = vmatmul.mubr.bf16.gmra.mrb[52].mxu1 %v2317_v16 }
  0xf6   :  { %v1820_v17 = vpop.f32.mrb[0].mxu0 }
  0xf7   :  { %v1848_v18 = vpop.f32.mrb[0].mxu1  ;;  %v1821_v19 = vpop.f32.mrb[1].mxu0 }
  0xf8   :  { %v1822_v20 = vadd.f32 %v1821_v19, %v1820_v17  ;;  %v1849_v21 = vpop.f32.mrb[1].mxu1  ;;  %v1823_v22 = vpop.f32.mrb[2].mxu0 }
  0xf9   :  { %v1850_v23 = vadd.f32 %v1849_v21, %v1848_v18  ;;  %v1851_v24 = vpop.f32.mrb[2].mxu1  ;;  %v1824_v25 = vpop.f32.mrb[3].mxu0 }
  0xfa   :  { %v1825_v26 = vadd.f32 %v1824_v25, %v1823_v22  ;;  %v1852_v27 = vpop.f32.mrb[3].mxu1 }
  0xfb   :  { %v592_v28 = vadd.f32 %v1850_v23, %v1822_v20  ;;  %v1853_v29 = vadd.f32 %v1852_v27, %v1851_v24 }
  0xfd   :  { %v595_v30 = vadd.f32 %v1853_v29, %v1825_v26 }
  0xfe   :  { %v1826_v31 = vpop.f32.mrb[4].mxu0 }
  0xff   :  { %v1854_v36 = vpop.f32.mrb[4].mxu1  ;;  %v1827_v37 = vpop.f32.mrb[5].mxu0 }
 0x100   :  { %v1828_v38 = vadd.f32 %v1827_v37, %v1826_v31  ;;  %v1855_v39 = vpop.f32.mrb[5].mxu1  ;;  %v1829_v40 = vpop.f32.mrb[6].mxu0 }
 0x101   :  { %v1856_v45 = vadd.f32 %v1855_v39, %v1854_v36  ;;  %v1857_v46 = vpop.f32.mrb[6].mxu1  ;;  %v1830_v47 = vpop.f32.mrb[7].mxu0 }
 0x102   :  { %v1831_v48 = vadd.f32 %v1830_v47, %v1829_v40  ;;  %v1858_v49 = vpop.f32.mrb[7].mxu1 }
 0x103   :  { %v600_v51 = vadd.f32 %v1856_v45, %v1828_v38  ;;  %v1859_v53 = vadd.f32 %v1858_v49, %v1857_v46 }
 0x105   :  { %v603_v54 = vadd.f32 %v1859_v53, %v1831_v48 }
 0x107   :  { %v2162_v55 = vpop.f32.mrb[8].mxu1 }
 0x108   :  { %v689_v56 = vpop.f32.mrb[9].mxu1 }
 0x109   :  { %v2163_v58 = vpop.f32.mrb[10].mxu1 }
 0x10a   :  { %v692_v59 = vpop.f32.mrb[11].mxu1 }
 0x116   :  { %v1876_v61 = vpop.f32.mrb[8].mxu0 }
 0x117   :  { %v1877_v60 = vpop.f32.mrb[9].mxu0 }
 0x118   :  { %v1878_v62 = vadd.f32 %v1877_v60, %v1876_v61  ;;  %v1879_v63 = vpop.f32.mrb[10].mxu0 }
 0x119   :  { %v1880_v32 = vpop.f32.mrb[11].mxu0 }
 0x11a   :  { %v641_v33 = vadd.f32 %v1878_v62, %v592_v28  ;;  %v1881_v34 = vadd.f32 %v1880_v32, %v1879_v63 }
 0x11c   :  { %v644_v35 = vadd.f32 %v1881_v34, %v595_v30  ;;  %v2972_v41 = vadd.f32 %v689_v56, %v641_v33 }
 0x11e   :  { %v1882_v42 = vpop.f32.mrb[12].mxu0  ;;  %v2974_v43 = vadd.f32 %v692_v59, %v644_v35 }
 0x11f   :  { %v1883_v44 = vpop.f32.mrb[13].mxu0 }
 0x120   :  { %v1884_v50 = vadd.f32 %v1883_v44, %v1882_v42  ;;  %v1885_v52 = vpop.f32.mrb[14].mxu0 }
 0x121   :  { %v1886_v57 = vpop.f32.mrb[15].mxu0 }
 0x122   :  { %v649_v0 = vadd.f32 %v1884_v50, %v600_v51  ;;  %v1887_v2 = vadd.f32 %v1886_v57, %v1885_v52 }
 0x124   :  { %v2976_v4 = vadd.f32 %v2162_v55, %v649_v0  ;;  %v652_v1 = vadd.f32 %v1887_v2, %v603_v54 }
 0x126   :  { %v2978_v5 = vadd.f32 %v2163_v58, %v652_v1 }
 0x127   :  { %v1908_v3 = vpop.f32.mrb[12].mxu1 }
 0x128   :  { %v1909_v6 = vpop.f32.mrb[13].mxu1 }
 0x129   :  { %v1910_v7 = vadd.f32 %v1909_v6, %v1908_v3  ;;  %v1911_v8 = vpop.f32.mrb[14].mxu1 }
 0x12a   :  { %v1912_v9 = vpop.f32.mrb[15].mxu1 }
 0x12b   :  { %v1913_v10 = vadd.f32 %v1912_v9, %v1911_v8 }
 0x12f   :  { %v1914_v11 = vpop.f32.mrb[16].mxu1 }
 0x130   :  { %v1915_v12 = vpop.f32.mrb[17].mxu1 }
 0x131   :  { %v1916_v13 = vadd.f32 %v1915_v12, %v1914_v11  ;;  %v1917_v14 = vpop.f32.mrb[18].mxu1 }
 0x132   :  { %v1918_v15 = vpop.f32.mrb[19].mxu1 }
 0x133   :  { %v1919_v16 = vadd.f32 %v1918_v15, %v1917_v14 }
 0x136   :  { %v1936_v17 = vpop.f32.mrb[16].mxu0 }
 0x137   :  { %v1937_v18 = vpop.f32.mrb[17].mxu0 }
 0x138   :  { %v1938_v19 = vadd.f32 %v1937_v18, %v1936_v17  ;;  %v1939_v20 = vpop.f32.mrb[18].mxu0 }
 0x139   :  { %v1940_v21 = vpop.f32.mrb[19].mxu0 }
 0x13a   :  { %v881_v22 = vadd.f32 %v1938_v19, %v1910_v7  ;;  %v1941_v23 = vadd.f32 %v1940_v21, %v1939_v20 }
 0x13c   :  { %v884_v24 = vadd.f32 %v1941_v23, %v1913_v10 }
 0x13e   :  { %v1942_v25 = vpop.f32.mrb[20].mxu0 }
 0x13f   :  { %v1943_v26 = vpop.f32.mrb[21].mxu0 }
 0x140   :  { %v1944_v27 = vadd.f32 %v1943_v26, %v1942_v25  ;;  %v1945_v28 = vpop.f32.mrb[22].mxu0 }
 0x141   :  { %v1946_v29 = vpop.f32.mrb[23].mxu0 }
 0x142   :  { %v889_v30 = vadd.f32 %v1944_v27, %v1916_v13  ;;  %v1947_v31 = vadd.f32 %v1946_v29, %v1945_v28 }
 0x144   :  { %v892_v36 = vadd.f32 %v1947_v31, %v1919_v16 }
 0x146   :  { %v2170_v39 = vpop.f32.mrb[24].mxu0 }
 0x147   :  { %v1964_v37 = vpop.f32.mrb[20].mxu1  ;;  %v978_v46 = vpop.f32.mrb[25].mxu0 }
 0x148   :  { %v1965_v38 = vpop.f32.mrb[21].mxu1  ;;  %v2171_v48 = vpop.f32.mrb[26].mxu0 }
 0x149   :  { %v1966_v40 = vadd.f32 %v1965_v38, %v1964_v37  ;;  %v1967_v45 = vpop.f32.mrb[22].mxu1  ;;  %v981_v53 = vpop.f32.mrb[27].mxu0 }
 0x14a   :  { %v1968_v47 = vpop.f32.mrb[23].mxu1 }
 0x14b   :  { %v1969_v49 = vadd.f32 %v1968_v47, %v1967_v45  ;;  %v930_v51 = vadd.f32 %v1966_v40, %v881_v22 }
 0x14d   :  { %v979_v54 = vadd.f32 %v978_v46, %v930_v51  ;;  %v933_v55 = vadd.f32 %v1969_v49, %v884_v24 }
 0x14f   :  { %v993_v56 = vmax.f32 %v2972_v41, %v979_v54  ;;  %v982_v58 = vadd.f32 %v981_v53, %v933_v55  ;;  %v1970_v59 = vpop.f32.mrb[24].mxu1 }
 0x150   :  { %v1971_v61 = vpop.f32.mrb[25].mxu1 }
 0x151   :  { %v994_v60 = vmax.f32 %v2974_v43, %v982_v58  ;;  %v1972_v62 = vadd.f32 %v1971_v61, %v1970_v59  ;;  %v1973_v63 = vpop.f32.mrb[26].mxu1 }
 0x152   :  { %v1974_v32 = vpop.f32.mrb[27].mxu1 }
 0x153   :  { %v938_v33 = vadd.f32 %v1972_v62, %v889_v30  ;;  %v1975_v34 = vadd.f32 %v1974_v32, %v1973_v63 }
 0x155   :  { %v987_v35 = vadd.f32 %v2170_v39, %v938_v33  ;;  %v941_v42 = vadd.f32 %v1975_v34, %v892_v36 }
 0x157   :  { %v995_v44 = vmax.f32 %v2976_v4, %v987_v35  ;;  %v990_v50 = vadd.f32 %v2171_v48, %v941_v42 }
 0x159   :  { %v996_v52 = vmax.f32 %v2978_v5, %v990_v50 }
 0x166   :  { %v1996_v0 = vpop.f32.mrb[28].mxu0 }
 0x167   :  { %v2024_v57 = vpop.f32.mrb[28].mxu1  ;;  %v1997_v2 = vpop.f32.mrb[29].mxu0 }
 0x168   :  { %v2025_v41 = vpop.f32.mrb[29].mxu1  ;;  %v1998_v6 = vadd.f32 %v1997_v2, %v1996_v0  ;;  %v1999_v43 = vpop.f32.mrb[30].mxu0 }
 0x169   :  { %v2026_v1 = vadd.f32 %v2025_v41, %v2024_v57  ;;  %v2027_v3 = vpop.f32.mrb[30].mxu1  ;;  %v2000_v8 = vpop.f32.mrb[31].mxu0 }
 0x16a   :  { %v2028_v7 = vpop.f32.mrb[31].mxu1  ;;  %v2001_v11 = vadd.f32 %v2000_v8, %v1999_v43 }
 0x16b   :  { %v2029_v9 = vadd.f32 %v2028_v7, %v2027_v3  ;;  %v1174_v10 = vadd.f32 %v2026_v1, %v1998_v6 }
 0x16d   :  { %v1177_v12 = vadd.f32 %v2029_v9, %v2001_v11 }
 0x16e   :  { %v2002_v14 = vpop.f32.mrb[32].mxu0 }
 0x16f   :  { %v2030_v13 = vpop.f32.mrb[32].mxu1  ;;  %v2003_v15 = vpop.f32.mrb[33].mxu0 }
 0x170   :  { %v2031_v4 = vpop.f32.mrb[33].mxu1  ;;  %v2004_v17 = vadd.f32 %v2003_v15, %v2002_v14  ;;  %v2005_v18 = vpop.f32.mrb[34].mxu0 }
 0x171   :  { %v2032_v16 = vadd.f32 %v2031_v4, %v2030_v13  ;;  %v2033_v5 = vpop.f32.mrb[34].mxu1  ;;  %v2006_v20 = vpop.f32.mrb[35].mxu0 }
 0x172   :  { %v2034_v19 = vpop.f32.mrb[35].mxu1  ;;  %v2007_v23 = vadd.f32 %v2006_v20, %v2005_v18 }
 0x173   :  { %v2035_v21 = vadd.f32 %v2034_v19, %v2033_v5  ;;  %v1182_v22 = vadd.f32 %v2032_v16, %v2004_v17 }
 0x175   :  { %v1185_v24 = vadd.f32 %v2035_v21, %v2007_v23 }
 0x177   :  { %v2178_v25 = vpop.f32.mrb[36].mxu1 }
 0x178   :  { %v1271_v26 = vpop.f32.mrb[37].mxu1 }
 0x179   :  { %v2179_v27 = vpop.f32.mrb[38].mxu1 }
 0x17a   :  { %v1274_v28 = vpop.f32.mrb[39].mxu1 }
 0x186   :  { %v2052_v29 = vpop.f32.mrb[36].mxu0 }
 0x187   :  { %v2053_v30 = vpop.f32.mrb[37].mxu0 }
 0x188   :  { %v2054_v31 = vadd.f32 %v2053_v30, %v2052_v29  ;;  %v2055_v36 = vpop.f32.mrb[38].mxu0  ;;  %v1784_v30 = vld [vmem:[%s3001_s2] ss:$0 sm:$0xff] }
 0x189   :  { %v2056_v37 = vpop.f32.mrb[39].mxu0 }
 0x18a   :  { %v1223_v38 = vadd.f32 %v2054_v31, %v1174_v10  ;;  %v2057_v39 = vadd.f32 %v2056_v37, %v2055_v36 }
 0x18c   :  { %v1272_v40 = vadd.f32 %v1271_v26, %v1223_v38  ;;  %v1226_v45 = vadd.f32 %v2057_v39, %v1177_v12 }
 0x18e   :  { %v1275_v46 = vadd.f32 %v1274_v28, %v1226_v45  ;;  %v2058_v47 = vpop.f32.mrb[40].mxu0  ;;  %v1286_v48 = vmax.f32 %v993_v56, %v1272_v40 }
 0x18f   :  { %v2059_v49 = vpop.f32.mrb[41].mxu0 }
 0x190   :  { %v2060_v51 = vadd.f32 %v2059_v49, %v2058_v47  ;;  %v2061_v53 = vpop.f32.mrb[42].mxu0  ;;  %v1287_v54 = vmax.f32 %v994_v60, %v1275_v46 }
 0x191   :  { %v2062_v55 = vpop.f32.mrb[43].mxu0 }
 0x192   :  { %v1231_v58 = vadd.f32 %v2060_v51, %v1182_v22  ;;  %v2063_v59 = vadd.f32 %v2062_v55, %v2061_v53 }
 0x194   :  { %v1280_v61 = vadd.f32 %v2178_v25, %v1231_v58  ;;  %v1234_v62 = vadd.f32 %v2063_v59, %v1185_v24 }
 0x196   :  { %v2984_v32 = vmax.f32 %v995_v44, %v1280_v61  ;;  %v1283_v33 = vadd.f32 %v2179_v27, %v1234_v62 }
 0x197   :  { %v2084_v63 = vpop.f32.mrb[40].mxu1 }
 0x198   :  { %v2085_v34 = vpop.f32.mrb[41].mxu1  ;;  %v2986_v50 = vmax.f32 %v996_v52, %v1283_v33 }
 0x199   :  { %v2086_v35 = vadd.f32 %v2085_v34, %v2084_v63  ;;  %v2087_v42 = vpop.f32.mrb[42].mxu1 }
 0x19a   :  { %v2088_v57 = vpop.f32.mrb[43].mxu1 }
 0x19b   :  { %v2089_v56 = vadd.f32 %v2088_v57, %v2087_v42 }
 0x19f   :  { %v2090_v0 = vpop.f32.mrb[44].mxu1 }
 0x1a0   :  { %v2091_v41 = vpop.f32.mrb[45].mxu1 }
 0x1a1   :  { %v2092_v2 = vadd.f32 %v2091_v41, %v2090_v0  ;;  %v2093_v60 = vpop.f32.mrb[46].mxu1 }
 0x1a2   :  { %v2094_v1 = vpop.f32.mrb[47].mxu1 }
 0x1a3   :  { %v2095_v3 = vadd.f32 %v2094_v1, %v2093_v60 }
 0x1a6   :  { %v2112_v6 = vpop.f32.mrb[44].mxu0 }
 0x1a7   :  { %v2113_v43 = vpop.f32.mrb[45].mxu0 }
 0x1a8   :  { %v2114_v7 = vadd.f32 %v2113_v43, %v2112_v6  ;;  %v2115_v8 = vpop.f32.mrb[46].mxu0 }
 0x1a9   :  { %v2116_v44 = vpop.f32.mrb[47].mxu0 }
 0x1aa   :  { %v1467_v9 = vadd.f32 %v2114_v7, %v2086_v35  ;;  %v2117_v10 = vadd.f32 %v2116_v44, %v2115_v8 }
 0x1ac   :  { %v1470_v11 = vadd.f32 %v2117_v10, %v2089_v56 }
 0x1ae   :  { %v2118_v12 = vpop.f32.mrb[48].mxu0 }
 0x1af   :  { %v2119_v13 = vpop.f32.mrb[49].mxu0 }
 0x1b0   :  { %v2120_v52 = vadd.f32 %v2119_v13, %v2118_v12  ;;  %v2121_v14 = vpop.f32.mrb[50].mxu0 }
 0x1b1   :  { %v2122_v4 = vpop.f32.mrb[51].mxu0 }
 0x1b2   :  { %v1475_v15 = vadd.f32 %v2120_v52, %v2092_v2  ;;  %v2123_v16 = vadd.f32 %v2122_v4, %v2121_v14 }
 0x1b4   :  { %v1478_v5 = vadd.f32 %v2123_v16, %v2095_v3 }
 0x1b6   :  { %v2186_v19 = vpop.f32.mrb[52].mxu0 }
 0x1b7   :  { %v2140_v17 = vpop.f32.mrb[48].mxu1  ;;  %v1564_v22 = vpop.f32.mrb[53].mxu0 }
 0x1b8   :  { %v2141_v18 = vpop.f32.mrb[49].mxu1  ;;  %v2187_v24 = vpop.f32.mrb[54].mxu0 }
 0x1b9   :  { %v2142_v20 = vadd.f32 %v2141_v18, %v2140_v17  ;;  %v2143_v21 = vpop.f32.mrb[50].mxu1  ;;  %v1567_v27 = vpop.f32.mrb[55].mxu0 }
 0x1ba   :  { %v2144_v23 = vpop.f32.mrb[51].mxu1 }
 0x1bb   :  { %v2145_v25 = vadd.f32 %v2144_v23, %v2143_v21  ;;  %v1516_v26 = vadd.f32 %v2142_v20, %v1467_v9 }
 0x1bd   :  { %v1565_v28 = vadd.f32 %v1564_v22, %v1516_v26  ;;  %v1519_v29 = vadd.f32 %v2145_v25, %v1470_v11 }
 0x1bf   :  { %v1579_v31 = vmax.f32 %v1286_v48, %v1565_v28  ;;  %v1568_v36 = vadd.f32 %v1567_v27, %v1519_v29  ;;  %v2146_v37 = vpop.f32.mrb[52].mxu1 }
 0x1c0   :  { %v2147_v38 = vpop.f32.mrb[53].mxu1 }
 0x1c1   :  { %v1590_v39 = vadd.f32 %v1784_v30, %v1579_v31  ;;  %v1580_v40 = vmax.f32 %v1287_v54, %v1568_v36  ;;  %v2148_v45 = vadd.f32 %v2147_v38, %v2146_v37  ;;  %v2149_v46 = vpop.f32.mrb[54].mxu1 }
 0x1c2   :  { %v2150_v47 = vpop.f32.mrb[55].mxu1 }
 0x1c3   :  { %v1591_v49 = vadd.f32 %v1784_v30, %v1580_v40  ;;  %v1524_v51 = vadd.f32 %v2148_v45, %v1475_v15  ;;  %v2151_v53 = vadd.f32 %v2150_v47, %v2149_v46  ;;  %v1594_v55 = vmax.f32 %v1590_v39, 0.0 }
 0x1c5   :  { %v1595_v58 = vmax.f32 %v1591_v49, 0.0  ;;  %v1573_v59 = vadd.f32 %v2186_v19, %v1524_v51  ;;  %v1527_v61 = vadd.f32 %v2151_v53, %v1478_v5 }
 0x1c7   :  { %v1796_v62 = vpack.c.bf16 %v1595_v58, %v1594_v55  ;;  %v1581_v63 = vmax.f32 %v2984_v32, %v1573_v59  ;;  %v1576_v33 = vadd.f32 %v2187_v24, %v1527_v61 }
 0x1c9   :  { %1797 = vst [vmem:[%s3002_s3] sm:$0xff] %v1796_v62   ;;  %v1592_v48 = vadd.f32 %v1784_v30, %v1581_v63  ;;  %v1582_v54 = vmax.f32 %v2986_v50, %v1576_v33 }
 0x1cb   :  { %v1593_v34 = vadd.f32 %v1784_v30, %v1582_v54  ;;  %v1596_v35 = vmax.f32 %v1592_v48, 0.0 }
 0x1cd   :  { %v1597_v42 = vmax.f32 %v1593_v34, 0.0 }
 0x1cf   :  { %v1801_v57 = vpack.c.bf16 %v1597_v42, %v1596_v35 }
 0x1d1   :  { %1803 = vst [vmem:[%s3002_s3 + $0x8] sm:$0xff] %v1801_v57  }

// kernel: fedavg_cnn_forward.5
= control target key start
LH: loop header
LB: loop body
LE: loop exit
PB: predicated region body
PF: predicated region fallthrough
CT: control target
= control target key end

     0   :  { %s4021_s1 = inlined_call_operand.vmem [shape: bf16[1024,512], index: 1, kind: input, shape index: {}]   ;;  %s4022_s0 = inlined_call_operand.vmem [shape: bf16[8,1024], index: 0, kind: input, shape index: {}]   ;;  %s4023_s3 = inlined_call_operand.vmem [shape: bf16[512,128], index: 3, kind: input, shape index: {}]   ;;  %s4024_s2 = inlined_call_operand.vmem [shape: f32[1,512], index: 2, kind: input, shape index: {}]   ;;  %s4025_s4 = inlined_call_operand.vmem [shape: f32[1,128], index: 4, kind: input, shape index: {}]   ;;  %s4026_s5 = inlined_call_operand.vmem [shape: f32[8,128], index: 5, kind: output, shape index: {}]  }
   0x1   :  { %v2664_v0 = vld [vmem:[%s4021_s1 + $0x4] ss:$16 sps:$4 sm:$0xff]   ;;  %v2666_v1 = vld [vmem:[%s4021_s1 + $0xc] ss:$16 sps:$4 sm:$0xff]   ;;  %v2668_v2 = vld [vmem:[%s4021_s1] ss:$16 sps:$4 sm:$0xff]  }
   0x2   :  { %1611 = vmatprep.subr.bf16.mxu0 %v2664_v0  ;;  %v2669_v3 = vld [vmem:[%s4021_s1 + $0x8] ss:$16 sps:$4 sm:$0xff]   ;;  %1775 = vmatprep.subr.bf16.mxu1 %v2666_v1  ;;  %v2670_v4 = vld [vmem:[%s4021_s1 + $0x24] ss:$16 sps:$4 sm:$0xff]   ;;  %v2672_v5 = vld [vmem:[%s4021_s1 + $0x2c] ss:$16 sps:$4 sm:$0xff]  }
   0x3   :  { %1612 = vmatpush1.bf16.msra.mxu0 %v2668_v2  ;;  %1776 = vmatpush1.bf16.msra.mxu1 %v2669_v3  ;;  %v2674_v6 = vld [vmem:[%s4021_s1 + $0x20] ss:$16 sps:$4 sm:$0xff]   ;;  %v2675_v7 = vld [vmem:[%s4021_s1 + $0x28] ss:$16 sps:$4 sm:$0xff]   ;;  %v2676_v8 = vld [vmem:[%s4021_s1 + $0x44] ss:$16 sps:$4 sm:$0xff]  }
   0x4   :  { %1613 = vmatprep.subr.bf16.mxu0 %v2670_v4  ;;  %1777 = vmatprep.subr.bf16.mxu1 %v2672_v5  ;;  %v2678_v9 = vld [vmem:[%s4021_s1 + $0x4c] ss:$16 sps:$4 sm:$0xff]   ;;  %v2680_v10 = vld [vmem:[%s4021_s1 + $0x40] ss:$16 sps:$4 sm:$0xff]   ;;  %v2681_v11 = vld [vmem:[%s4021_s1 + $0x48] ss:$16 sps:$4 sm:$0xff]  }
   0x5   :  { %v2682_v12 = vld [vmem:[%s4021_s1 + $0x64] ss:$16 sps:$4 sm:$0xff]   ;;  %v2684_v13 = vld [vmem:[%s4021_s1 + $0x6c] ss:$16 sps:$4 sm:$0xff]   ;;  %v2686_v14 = vld [vmem:[%s4021_s1 + $0x60] ss:$16 sps:$4 sm:$0xff]  }
   0x6   :  { %v2687_v15 = vld [vmem:[%s4021_s1 + $0x68] ss:$16 sps:$4 sm:$0xff]   ;;  %v2688_v16 = vld [vmem:[%s4021_s1 + $0x84] ss:$16 sps:$4 sm:$0xff]   ;;  %v2690_v17 = vld [vmem:[%s4021_s1 + $0x8c] ss:$16 sps:$4 sm:$0xff]  }
   0x7   :  { %1614 = vmatpush1.bf16.msra.mxu0 %v2674_v6  ;;  %1778 = vmatpush1.bf16.msra.mxu1 %v2675_v7  ;;  %v2692_v18 = vld [vmem:[%s4021_s1 + $0x80] ss:$16 sps:$4 sm:$0xff]   ;;  %v2693_v19 = vld [vmem:[%s4021_s1 + $0x88] ss:$16 sps:$4 sm:$0xff]   ;;  %v2694_v20 = vld [vmem:[%s4021_s1 + $0xa4] ss:$16 sps:$4 sm:$0xff]  }
   0x8   :  { %1615 = vmatprep.subr.bf16.mxu0 %v2676_v8  ;;  %1779 = vmatprep.subr.bf16.mxu1 %v2678_v9  ;;  %v2696_v21 = vld [vmem:[%s4021_s1 + $0xac] ss:$16 sps:$4 sm:$0xff]   ;;  %v2698_v22 = vld [vmem:[%s4021_s1 + $0xa0] ss:$16 sps:$4 sm:$0xff]   ;;  %v2699_v23 = vld [vmem:[%s4021_s1 + $0xa8] ss:$16 sps:$4 sm:$0xff]  }
   0x9   :  { %v2700_v24 = vld [vmem:[%s4021_s1 + $0xc4] ss:$16 sps:$4 sm:$0xff]   ;;  %v2702_v25 = vld [vmem:[%s4021_s1 + $0xcc] ss:$16 sps:$4 sm:$0xff]   ;;  %v2704_v26 = vld [vmem:[%s4021_s1 + $0xc0] ss:$16 sps:$4 sm:$0xff]  }
   0xa   :  { %v2705_v27 = vld [vmem:[%s4021_s1 + $0xc8] ss:$16 sps:$4 sm:$0xff]   ;;  %v2706_v28 = vld [vmem:[%s4021_s1 + $0xe4] ss:$16 sps:$4 sm:$0xff]   ;;  %v2708_v29 = vld [vmem:[%s4021_s1 + $0xec] ss:$16 sps:$4 sm:$0xff]  }
   0xb   :  { %1616 = vmatpush1.bf16.msra.mxu0 %v2680_v10  ;;  %1780 = vmatpush1.bf16.msra.mxu1 %v2681_v11  ;;  %v2710_v30 = vld [vmem:[%s4021_s1 + $0xe0] ss:$16 sps:$4 sm:$0xff]   ;;  %v2711_v31 = vld [vmem:[%s4021_s1 + $0xe8] ss:$16 sps:$4 sm:$0xff]   ;;  %v2712_v32 = vld [vmem:[%s4021_s1 + $0x104] ss:$16 sps:$4 sm:$0xff]  }
   0xc   :  { %1617 = vmatprep.subr.bf16.mxu0 %v2682_v12  ;;  %1781 = vmatprep.subr.bf16.mxu1 %v2684_v13  ;;  %v2714_v33 = vld [vmem:[%s4021_s1 + $0x10c] ss:$16 sps:$4 sm:$0xff]   ;;  %v2716_v34 = vld [vmem:[%s4021_s1 + $0x100] ss:$16 sps:$4 sm:$0xff]   ;;  %v2717_v35 = vld [vmem:[%s4021_s1 + $0x108] ss:$16 sps:$4 sm:$0xff]  }
   0xd   :  { %v2718_v36 = vld [vmem:[%s4021_s1 + $0x124] ss:$16 sps:$4 sm:$0xff]   ;;  %v2720_v37 = vld [vmem:[%s4021_s1 + $0x12c] ss:$16 sps:$4 sm:$0xff]   ;;  %v2722_v38 = vld [vmem:[%s4021_s1 + $0x120] ss:$16 sps:$4 sm:$0xff]  }
   0xe   :  { %v2723_v39 = vld [vmem:[%s4021_s1 + $0x128] ss:$16 sps:$4 sm:$0xff]   ;;  %v2724_v40 = vld [vmem:[%s4021_s1 + $0x144] ss:$16 sps:$4 sm:$0xff]   ;;  %v2726_v41 = vld [vmem:[%s4021_s1 + $0x14c] ss:$16 sps:$4 sm:$0xff]  }
   0xf   :  { %1618 = vmatpush1.bf16.msra.mxu0 %v2686_v14  ;;  %1782 = vmatpush1.bf16.msra.mxu1 %v2687_v15  ;;  %v2728_v42 = vld [vmem:[%s4021_s1 + $0x140] ss:$16 sps:$4 sm:$0xff]   ;;  %v2729_v43 = vld [vmem:[%s4021_s1 + $0x148] ss:$16 sps:$4 sm:$0xff]   ;;  %v2730_v44 = vld [vmem:[%s4021_s1 + $0x164] ss:$16 sps:$4 sm:$0xff]  }
  0x10   :  { %1619 = vmatprep.subr.bf16.mxu0 %v2688_v16  ;;  %1783 = vmatprep.subr.bf16.mxu1 %v2690_v17  ;;  %v2732_v45 = vld [vmem:[%s4021_s1 + $0x16c] ss:$16 sps:$4 sm:$0xff]   ;;  %v21_v46 = vld [vmem:[%s4022_s0] sm:$0xff]  ;;  %v2735_v49 = vld [vmem:[%s4021_s1 + $0x168] ss:$16 sps:$4 sm:$0xff]  }
  0x11   :  { %v2734_v47 = vld [vmem:[%s4021_s1 + $0x160] ss:$16 sps:$4 sm:$0xff]   ;;  %v2296_v48 = vcombine.high %v21_v46, %v21_v46  ;;  %v2736_v50 = vld [vmem:[%s4021_s1 + $0x184] ss:$16 sps:$4 sm:$0xff]   ;;  %v2738_v51 = vld [vmem:[%s4021_s1 + $0x18c] ss:$16 sps:$4 sm:$0xff]   ;;  %v2295_v4 = vcombine.low %v21_v46, %v21_v46 }
  0x12   :  { %v2740_v52 = vld [vmem:[%s4021_s1 + $0x180] ss:$16 sps:$4 sm:$0xff]   ;;  %v2741_v53 = vld [vmem:[%s4021_s1 + $0x188] ss:$16 sps:$4 sm:$0xff]   ;;  %v2742_v54 = vld [vmem:[%s4021_s1 + $0x1a4] ss:$16 sps:$4 sm:$0xff]  }
  0x13   :  { %1620 = vmatpush1.bf16.msra.mxu0 %v2692_v18  ;;  %1784 = vmatpush1.bf16.msra.mxu1 %v2693_v19  ;;  %v2744_v55 = vld [vmem:[%s4021_s1 + $0x1ac] ss:$16 sps:$4 sm:$0xff]   ;;  %v2746_v56 = vld [vmem:[%s4021_s1 + $0x1a0] ss:$16 sps:$4 sm:$0xff]   ;;  %v2747_v57 = vld [vmem:[%s4021_s1 + $0x1a8] ss:$16 sps:$4 sm:$0xff]  }
  0x14   :  { %1621 = vmatprep.subr.bf16.mxu0 %v2694_v20  ;;  %1785 = vmatprep.subr.bf16.mxu1 %v2696_v21  ;;  %v2748_v58 = vld [vmem:[%s4021_s1 + $0x1c4] ss:$16 sps:$4 sm:$0xff]   ;;  %v2750_v59 = vld [vmem:[%s4021_s1 + $0x1cc] ss:$16 sps:$4 sm:$0xff]   ;;  %v2752_v60 = vld [vmem:[%s4021_s1 + $0x1c0] ss:$16 sps:$4 sm:$0xff]  }
  0x15   :  { %1643 = vmatprep.mubr.bf16.mxu0 %v2296_v48  ;;  %1807 = vmatprep.mubr.bf16.mxu1 %v2296_v48  ;;  %v2753_v61 = vld [vmem:[%s4021_s1 + $0x1c8] ss:$16 sps:$4 sm:$0xff]   ;;  %v2754_v62 = vld [vmem:[%s4021_s1 + $0x1e4] ss:$16 sps:$4 sm:$0xff]   ;;  %v2756_v63 = vld [vmem:[%s4021_s1 + $0x1ec] ss:$16 sps:$4 sm:$0xff]  }
  0x16   :  { %v2758_v0 = vld [vmem:[%s4021_s1 + $0x1e0] ss:$16 sps:$4 sm:$0xff]   ;;  %v2759_v1 = vld [vmem:[%s4021_s1 + $0x1e8] ss:$16 sps:$4 sm:$0xff]   ;;  %v2764_v2 = vld [vmem:[%s4021_s1 + $0x204] ss:$16 sps:$4 sm:$0xff]  }
  0x17   :  { %1622 = vmatpush1.bf16.msra.mxu0 %v2698_v22  ;;  %1786 = vmatpush1.bf16.msra.mxu1 %v2699_v23  ;;  %v2767_v3 = vld [vmem:[%s4021_s1 + $0x20c] ss:$16 sps:$4 sm:$0xff]   ;;  %v2762_v5 = vld [vmem:[%s4021_s1 + $0x200] ss:$16 sps:$4 sm:$0xff]   ;;  %v2765_v6 = vld [vmem:[%s4021_s1 + $0x208] ss:$16 sps:$4 sm:$0xff]  }
  0x18   :  { %1623 = vmatprep.subr.bf16.mxu0 %v2700_v24  ;;  %1787 = vmatprep.subr.bf16.mxu1 %v2702_v25  ;;  %v2770_v7 = vld [vmem:[%s4021_s1 + $0x224] ss:$16 sps:$4 sm:$0xff]   ;;  %v2773_v8 = vld [vmem:[%s4021_s1 + $0x22c] ss:$16 sps:$4 sm:$0xff]   ;;  %v2768_v9 = vld [vmem:[%s4021_s1 + $0x220] ss:$16 sps:$4 sm:$0xff]  }
  0x19   :  { %v2771_v10 = vld [vmem:[%s4021_s1 + $0x228] ss:$16 sps:$4 sm:$0xff]   ;;  %v2776_v11 = vld [vmem:[%s4021_s1 + $0x244] ss:$16 sps:$4 sm:$0xff]   ;;  %v2779_v12 = vld [vmem:[%s4021_s1 + $0x24c] ss:$16 sps:$4 sm:$0xff]  }
  0x1a   :  { %v2774_v13 = vld [vmem:[%s4021_s1 + $0x240] ss:$16 sps:$4 sm:$0xff]   ;;  %v2777_v14 = vld [vmem:[%s4021_s1 + $0x248] ss:$16 sps:$4 sm:$0xff]   ;;  %v2782_v15 = vld [vmem:[%s4021_s1 + $0x264] ss:$16 sps:$4 sm:$0xff]  }
  0x1b   :  { %1624 = vmatpush1.bf16.msra.mxu0 %v2704_v26  ;;  %1788 = vmatpush1.bf16.msra.mxu1 %v2705_v27  ;;  %v2785_v16 = vld [vmem:[%s4021_s1 + $0x26c] ss:$16 sps:$4 sm:$0xff]   ;;  %v2780_v17 = vld [vmem:[%s4021_s1 + $0x260] ss:$16 sps:$4 sm:$0xff]   ;;  %v2783_v18 = vld [vmem:[%s4021_s1 + $0x268] ss:$16 sps:$4 sm:$0xff]  }
  0x1c   :  { %1625 = vmatprep.subr.bf16.mxu0 %v2706_v28  ;;  %1789 = vmatprep.subr.bf16.mxu1 %v2708_v29  ;;  %v2788_v19 = vld [vmem:[%s4021_s1 + $0x284] ss:$16 sps:$4 sm:$0xff]   ;;  %v2791_v20 = vld [vmem:[%s4021_s1 + $0x28c] ss:$16 sps:$4 sm:$0xff]   ;;  %v2786_v21 = vld [vmem:[%s4021_s1 + $0x280] ss:$16 sps:$4 sm:$0xff]  }
  0x1d   :  { %v2789_v22 = vld [vmem:[%s4021_s1 + $0x288] ss:$16 sps:$4 sm:$0xff]   ;;  %v2794_v23 = vld [vmem:[%s4021_s1 + $0x2a4] ss:$16 sps:$4 sm:$0xff]   ;;  %v2797_v24 = vld [vmem:[%s4021_s1 + $0x2ac] ss:$16 sps:$4 sm:$0xff]  }
  0x1e   :  { %v2792_v25 = vld [vmem:[%s4021_s1 + $0x2a0] ss:$16 sps:$4 sm:$0xff]   ;;  %v2795_v26 = vld [vmem:[%s4021_s1 + $0x2a8] ss:$16 sps:$4 sm:$0xff]   ;;  %v2800_v27 = vld [vmem:[%s4021_s1 + $0x2c4] ss:$16 sps:$4 sm:$0xff]  }
  0x1f   :  { %1626 = vmatpush1.bf16.msra.mxu0 %v2710_v30  ;;  %1790 = vmatpush1.bf16.msra.mxu1 %v2711_v31  ;;  %v2803_v28 = vld [vmem:[%s4021_s1 + $0x2cc] ss:$16 sps:$4 sm:$0xff]   ;;  %v2798_v31 = vld [vmem:[%s4021_s1 + $0x2c0] ss:$16 sps:$4 sm:$0xff]   ;;  %v2825_v48 = vld [vmem:[%s4021_s1 + $0x348] ss:$16 sps:$4 sm:$0xff]  }
  0x20   :  { %1627 = vmatprep.subr.bf16.mxu0 %v2712_v32  ;;  %1791 = vmatprep.subr.bf16.mxu1 %v2714_v33  ;;  %v3394_v29 = vld [vmem:[%s4022_s0 + $0x8] sm:$0xff]  ;;  %v2806_v33 = vld [vmem:[%s4021_s1 + $0x2e4] ss:$16 sps:$4 sm:$0xff]  }
  0x21   :  { %v2298_v30 = vcombine.high %v3394_v29, %v3394_v29  ;;  %v2801_v32 = vld [vmem:[%s4021_s1 + $0x2c8] ss:$16 sps:$4 sm:$0xff]   ;;  %v2827_v46 = vld [vmem:[%s4021_s1 + $0x34c] ss:$16 sps:$4 sm:$0xff]  }
  0x23   :  { %1628 = vmatpush1.bf16.msra.mxu0 %v2716_v34  ;;  %1792 = vmatpush1.bf16.msra.mxu1 %v2717_v35  ;;  %v2809_v34 = vld [vmem:[%s4021_s1 + $0x2ec] ss:$16 sps:$4 sm:$0xff]   ;;  %v2804_v35 = vld [vmem:[%s4021_s1 + $0x2e0] ss:$16 sps:$4 sm:$0xff]  }
  0x24   :  { %1629 = vmatprep.subr.bf16.mxu0 %v2718_v36  ;;  %1793 = vmatprep.subr.bf16.mxu1 %v2720_v37  ;;  %v2807_v36 = vld [vmem:[%s4021_s1 + $0x2e8] ss:$16 sps:$4 sm:$0xff]   ;;  %v2812_v37 = vld [vmem:[%s4021_s1 + $0x304] ss:$16 sps:$4 sm:$0xff]  }
  0x27   :  { %1630 = vmatpush1.bf16.msra.mxu0 %v2722_v38  ;;  %1794 = vmatpush1.bf16.msra.mxu1 %v2723_v39  ;;  %v2815_v38 = vld [vmem:[%s4021_s1 + $0x30c] ss:$16 sps:$4 sm:$0xff]   ;;  %v2810_v39 = vld [vmem:[%s4021_s1 + $0x300] ss:$16 sps:$4 sm:$0xff]  }
  0x28   :  { %1631 = vmatprep.subr.bf16.mxu0 %v2724_v40  ;;  %1795 = vmatprep.subr.bf16.mxu1 %v2726_v41  ;;  %v2813_v40 = vld [vmem:[%s4021_s1 + $0x308] ss:$16 sps:$4 sm:$0xff]   ;;  %v2818_v41 = vld [vmem:[%s4021_s1 + $0x324] ss:$16 sps:$4 sm:$0xff]  }
  0x2b   :  { %1632 = vmatpush1.bf16.msra.mxu0 %v2728_v42  ;;  %1796 = vmatpush1.bf16.msra.mxu1 %v2729_v43  ;;  %v2821_v42 = vld [vmem:[%s4021_s1 + $0x32c] ss:$16 sps:$4 sm:$0xff]   ;;  %v2816_v43 = vld [vmem:[%s4021_s1 + $0x320] ss:$16 sps:$4 sm:$0xff]  }
  0x2c   :  { %1633 = vmatprep.subr.bf16.mxu0 %v2730_v44  ;;  %1797 = vmatprep.subr.bf16.mxu1 %v2732_v45  ;;  %v2819_v44 = vld [vmem:[%s4021_s1 + $0x328] ss:$16 sps:$4 sm:$0xff]   ;;  %v2824_v45 = vld [vmem:[%s4021_s1 + $0x344] ss:$16 sps:$4 sm:$0xff]  }
  0x2f   :  { %1634 = vmatpush1.bf16.msra.mxu0 %v2734_v47  ;;  %1798 = vmatpush1.bf16.msra.mxu1 %v2735_v49  ;;  %v2822_v47 = vld [vmem:[%s4021_s1 + $0x340] ss:$16 sps:$4 sm:$0xff]   ;;  %v2830_v49 = vld [vmem:[%s4021_s1 + $0x364] ss:$16 sps:$4 sm:$0xff]  }
  0x30   :  { %1635 = vmatprep.subr.bf16.mxu0 %v2736_v50  ;;  %1799 = vmatprep.subr.bf16.mxu1 %v2738_v51  ;;  %v2833_v50 = vld [vmem:[%s4021_s1 + $0x36c] ss:$16 sps:$4 sm:$0xff]   ;;  %v2828_v51 = vld [vmem:[%s4021_s1 + $0x360] ss:$16 sps:$4 sm:$0xff]  }
  0x33   :  { %1636 = vmatpush1.bf16.msra.mxu0 %v2740_v52  ;;  %1800 = vmatpush1.bf16.msra.mxu1 %v2741_v53  ;;  %v2831_v52 = vld [vmem:[%s4021_s1 + $0x368] ss:$16 sps:$4 sm:$0xff]   ;;  %v2836_v53 = vld [vmem:[%s4021_s1 + $0x384] ss:$16 sps:$4 sm:$0xff]  }
  0x34   :  { %1637 = vmatprep.subr.bf16.mxu0 %v2742_v54  ;;  %1801 = vmatprep.subr.bf16.mxu1 %v2744_v55  ;;  %v2839_v54 = vld [vmem:[%s4021_s1 + $0x38c] ss:$16 sps:$4 sm:$0xff]   ;;  %v2834_v55 = vld [vmem:[%s4021_s1 + $0x380] ss:$16 sps:$4 sm:$0xff]  }
  0x37   :  { %1638 = vmatpush1.bf16.msra.mxu0 %v2746_v56  ;;  %1802 = vmatpush1.bf16.msra.mxu1 %v2747_v57  ;;  %v2837_v56 = vld [vmem:[%s4021_s1 + $0x388] ss:$16 sps:$4 sm:$0xff]   ;;  %v2842_v57 = vld [vmem:[%s4021_s1 + $0x3a4] ss:$16 sps:$4 sm:$0xff]  }
  0x38   :  { %1639 = vmatprep.subr.bf16.mxu0 %v2748_v58  ;;  %1803 = vmatprep.subr.bf16.mxu1 %v2750_v59  ;;  %v2845_v58 = vld [vmem:[%s4021_s1 + $0x3ac] ss:$16 sps:$4 sm:$0xff]   ;;  %v2840_v59 = vld [vmem:[%s4021_s1 + $0x3a0] ss:$16 sps:$4 sm:$0xff]  }
  0x3b   :  { %1640 = vmatpush1.bf16.msra.mxu0 %v2752_v60  ;;  %1804 = vmatpush1.bf16.msra.mxu1 %v2753_v61  ;;  %v2843_v60 = vld [vmem:[%s4021_s1 + $0x3a8] ss:$16 sps:$4 sm:$0xff]   ;;  %v2848_v61 = vld [vmem:[%s4021_s1 + $0x3c4] ss:$16 sps:$4 sm:$0xff]  }
  0x3c   :  { %1641 = vmatprep.subr.bf16.mxu0 %v2754_v62  ;;  %1805 = vmatprep.subr.bf16.mxu1 %v2756_v63  ;;  %v2851_v62 = vld [vmem:[%s4021_s1 + $0x3cc] ss:$16 sps:$4 sm:$0xff]   ;;  %v2846_v63 = vld [vmem:[%s4021_s1 + $0x3c0] ss:$16 sps:$4 sm:$0xff]  }
  0x3f   :  { %1642 = vmatpush1.bf16.msra.mxu0 %v2758_v0  ;;  %1806 = vmatpush1.bf16.msra.mxu1 %v2759_v1  ;;  %v2849_v0 = vld [vmem:[%s4021_s1 + $0x3c8] ss:$16 sps:$4 sm:$0xff]   ;;  %v2854_v1 = vld [vmem:[%s4021_s1 + $0x3e4] ss:$16 sps:$4 sm:$0xff]  }
  0x40   :  { %1652 = vmatprep.subr.bf16.mxu0 %v2764_v2  ;;  %1816 = vmatprep.subr.bf16.mxu1 %v2767_v3  ;;  %v2857_v2 = vld [vmem:[%s4021_s1 + $0x3ec] ss:$16 sps:$4 sm:$0xff]   ;;  %v2852_v3 = vld [vmem:[%s4021_s1 + $0x3e0] ss:$16 sps:$4 sm:$0xff]  }
  0x42   :  { %1644 = vmatmul.mubr.bf16.vlgmr.msra.gmra.mrb[0].mxu0 %v2295_v4  ;;  %1808 = vmatmul.mubr.bf16.vlgmr.msra.gmra.mrb[0].mxu1 %v2295_v4  ;;  %v2855_v4 = vld [vmem:[%s4021_s1 + $0x3e8] ss:$16 sps:$4 sm:$0xff]  }
  0x43   :  { %1653 = vmatpush1.bf16.msra.mxu0 %v2762_v5  ;;  %1817 = vmatpush1.bf16.msra.mxu1 %v2765_v6  ;;  %v2862_v5 = vld [vmem:[%s4021_s1 + $0x404] ss:$16 sps:$4 sm:$0xff]   ;;  %v2865_v6 = vld [vmem:[%s4021_s1 + $0x40c] ss:$16 sps:$4 sm:$0xff]  }
  0x44   :  { %1654 = vmatprep.subr.bf16.mxu0 %v2770_v7  ;;  %1818 = vmatprep.subr.bf16.mxu1 %v2773_v8  ;;  %v2297_v7 = vcombine.low %v3394_v29, %v3394_v29  ;;  %v2860_v8 = vld [vmem:[%s4021_s1 + $0x400] ss:$16 sps:$4 sm:$0xff]   ;;  %v2895_v29 = vld [vmem:[%s4021_s1 + $0x4ac] ss:$16 sps:$4 sm:$0xff]  }
  0x45   :  { %1684 = vmatprep.mubr.bf16.mxu0 %v2298_v30  ;;  %1848 = vmatprep.mubr.bf16.mxu1 %v2298_v30  ;;  %v2890_v30 = vld [vmem:[%s4021_s1 + $0x4a0] ss:$16 sps:$4 sm:$0xff]  }
  0x47   :  { %1655 = vmatpush1.bf16.msra.mxu0 %v2768_v9  ;;  %1819 = vmatpush1.bf16.msra.mxu1 %v2771_v10  ;;  %v2863_v9 = vld [vmem:[%s4021_s1 + $0x408] ss:$16 sps:$4 sm:$0xff]   ;;  %v2868_v10 = vld [vmem:[%s4021_s1 + $0x424] ss:$16 sps:$4 sm:$0xff]  }
  0x48   :  { %1656 = vmatprep.subr.bf16.mxu0 %v2776_v11  ;;  %1820 = vmatprep.subr.bf16.mxu1 %v2779_v12  ;;  %v3532_v11 = vld [vmem:[%s4022_s0 + $0x10] sm:$0xff]  ;;  %v2871_v12 = vld [vmem:[%s4021_s1 + $0x42c] ss:$16 sps:$4 sm:$0xff]  }
  0x4b   :  { %1657 = vmatpush1.bf16.msra.mxu0 %v2774_v13  ;;  %1821 = vmatpush1.bf16.msra.mxu1 %v2777_v14  ;;  %v2300_v13 = vcombine.high %v3532_v11, %v3532_v11  ;;  %v2866_v14 = vld [vmem:[%s4021_s1 + $0x420] ss:$16 sps:$4 sm:$0xff]  }
  0x4c   :  { %1658 = vmatprep.subr.bf16.mxu0 %v2782_v15  ;;  %1822 = vmatprep.subr.bf16.mxu1 %v2785_v16  ;;  %v2869_v15 = vld [vmem:[%s4021_s1 + $0x428] ss:$16 sps:$4 sm:$0xff]   ;;  %v2874_v16 = vld [vmem:[%s4021_s1 + $0x444] ss:$16 sps:$4 sm:$0xff]  }
  0x4f   :  { %1659 = vmatpush1.bf16.msra.mxu0 %v2780_v17  ;;  %1823 = vmatpush1.bf16.msra.mxu1 %v2783_v18  ;;  %v2877_v17 = vld [vmem:[%s4021_s1 + $0x44c] ss:$16 sps:$4 sm:$0xff]   ;;  %v2872_v18 = vld [vmem:[%s4021_s1 + $0x440] ss:$16 sps:$4 sm:$0xff]  }
  0x50   :  { %1660 = vmatprep.subr.bf16.mxu0 %v2788_v19  ;;  %1824 = vmatprep.subr.bf16.mxu1 %v2791_v20  ;;  %v2875_v19 = vld [vmem:[%s4021_s1 + $0x448] ss:$16 sps:$4 sm:$0xff]   ;;  %v2880_v20 = vld [vmem:[%s4021_s1 + $0x464] ss:$16 sps:$4 sm:$0xff]  }
  0x53   :  { %1661 = vmatpush1.bf16.msra.mxu0 %v2786_v21  ;;  %1825 = vmatpush1.bf16.msra.mxu1 %v2789_v22  ;;  %v2883_v21 = vld [vmem:[%s4021_s1 + $0x46c] ss:$16 sps:$4 sm:$0xff]   ;;  %v2878_v22 = vld [vmem:[%s4021_s1 + $0x460] ss:$16 sps:$4 sm:$0xff]  }
  0x54   :  { %1662 = vmatprep.subr.bf16.mxu0 %v2794_v23  ;;  %1826 = vmatprep.subr.bf16.mxu1 %v2797_v24  ;;  %v2881_v23 = vld [vmem:[%s4021_s1 + $0x468] ss:$16 sps:$4 sm:$0xff]   ;;  %v2886_v24 = vld [vmem:[%s4021_s1 + $0x484] ss:$16 sps:$4 sm:$0xff]  }
  0x57   :  { %1663 = vmatpush1.bf16.msra.mxu0 %v2792_v25  ;;  %1827 = vmatpush1.bf16.msra.mxu1 %v2795_v26  ;;  %v2889_v25 = vld [vmem:[%s4021_s1 + $0x48c] ss:$16 sps:$4 sm:$0xff]   ;;  %v2884_v26 = vld [vmem:[%s4021_s1 + $0x480] ss:$16 sps:$4 sm:$0xff]  }
  0x58   :  { %1664 = vmatprep.subr.bf16.mxu0 %v2800_v27  ;;  %1828 = vmatprep.subr.bf16.mxu1 %v2803_v28  ;;  %v2887_v27 = vld [vmem:[%s4021_s1 + $0x488] ss:$16 sps:$4 sm:$0xff]   ;;  %v2892_v28 = vld [vmem:[%s4021_s1 + $0x4a4] ss:$16 sps:$4 sm:$0xff]  }
  0x5b   :  { %1665 = vmatpush1.bf16.msra.mxu0 %v2798_v31  ;;  %1829 = vmatpush1.bf16.msra.mxu1 %v2801_v32  ;;  %v2893_v31 = vld [vmem:[%s4021_s1 + $0x4a8] ss:$16 sps:$4 sm:$0xff]   ;;  %v2898_v32 = vld [vmem:[%s4021_s1 + $0x4c4] ss:$16 sps:$4 sm:$0xff]  }
  0x5c   :  { %1666 = vmatprep.subr.bf16.mxu0 %v2806_v33  ;;  %1830 = vmatprep.subr.bf16.mxu1 %v2809_v34  ;;  %v2901_v33 = vld [vmem:[%s4021_s1 + $0x4cc] ss:$16 sps:$4 sm:$0xff]   ;;  %v2896_v34 = vld [vmem:[%s4021_s1 + $0x4c0] ss:$16 sps:$4 sm:$0xff]  }
  0x5f   :  { %1667 = vmatpush1.bf16.msra.mxu0 %v2804_v35  ;;  %1831 = vmatpush1.bf16.msra.mxu1 %v2807_v36  ;;  %v2899_v35 = vld [vmem:[%s4021_s1 + $0x4c8] ss:$16 sps:$4 sm:$0xff]   ;;  %v2904_v36 = vld [vmem:[%s4021_s1 + $0x4e4] ss:$16 sps:$4 sm:$0xff]  }
  0x60   :  { %1668 = vmatprep.subr.bf16.mxu0 %v2812_v37  ;;  %1832 = vmatprep.subr.bf16.mxu1 %v2815_v38  ;;  %v2907_v37 = vld [vmem:[%s4021_s1 + $0x4ec] ss:$16 sps:$4 sm:$0xff]   ;;  %v2902_v38 = vld [vmem:[%s4021_s1 + $0x4e0] ss:$16 sps:$4 sm:$0xff]  }
  0x63   :  { %1669 = vmatpush1.bf16.msra.mxu0 %v2810_v39  ;;  %1833 = vmatpush1.bf16.msra.mxu1 %v2813_v40  ;;  %v2905_v39 = vld [vmem:[%s4021_s1 + $0x4e8] ss:$16 sps:$4 sm:$0xff]   ;;  %v2910_v40 = vld [vmem:[%s4021_s1 + $0x504] ss:$16 sps:$4 sm:$0xff]  }
  0x64   :  { %1670 = vmatprep.subr.bf16.mxu0 %v2818_v41  ;;  %1834 = vmatprep.subr.bf16.mxu1 %v2821_v42  ;;  %v2913_v41 = vld [vmem:[%s4021_s1 + $0x50c] ss:$16 sps:$4 sm:$0xff]   ;;  %v2908_v42 = vld [vmem:[%s4021_s1 + $0x500] ss:$16 sps:$4 sm:$0xff]  }
  0x67   :  { %1671 = vmatpush1.bf16.msra.mxu0 %v2816_v43  ;;  %1835 = vmatpush1.bf16.msra.mxu1 %v2819_v44  ;;  %v2911_v43 = vld [vmem:[%s4021_s1 + $0x508] ss:$16 sps:$4 sm:$0xff]   ;;  %v2916_v44 = vld [vmem:[%s4021_s1 + $0x524] ss:$16 sps:$4 sm:$0xff]  }
  0x68   :  { %1672 = vmatprep.subr.bf16.mxu0 %v2824_v45  ;;  %1836 = vmatprep.subr.bf16.mxu1 %v2827_v46  ;;  %v2919_v45 = vld [vmem:[%s4021_s1 + $0x52c] ss:$16 sps:$4 sm:$0xff]   ;;  %v2914_v46 = vld [vmem:[%s4021_s1 + $0x520] ss:$16 sps:$4 sm:$0xff]  }
  0x6b   :  { %1673 = vmatpush1.bf16.msra.mxu0 %v2822_v47  ;;  %1837 = vmatpush1.bf16.msra.mxu1 %v2825_v48  ;;  %v2917_v47 = vld [vmem:[%s4021_s1 + $0x528] ss:$16 sps:$4 sm:$0xff]   ;;  %v2922_v48 = vld [vmem:[%s4021_s1 + $0x544] ss:$16 sps:$4 sm:$0xff]  }
  0x6c   :  { %1674 = vmatprep.subr.bf16.mxu0 %v2830_v49  ;;  %1838 = vmatprep.subr.bf16.mxu1 %v2833_v50  ;;  %v2925_v49 = vld [vmem:[%s4021_s1 + $0x54c] ss:$16 sps:$4 sm:$0xff]   ;;  %v2920_v50 = vld [vmem:[%s4021_s1 + $0x540] ss:$16 sps:$4 sm:$0xff]  }
  0x6f   :  { %1675 = vmatpush1.bf16.msra.mxu0 %v2828_v51  ;;  %1839 = vmatpush1.bf16.msra.mxu1 %v2831_v52  ;;  %v2923_v51 = vld [vmem:[%s4021_s1 + $0x548] ss:$16 sps:$4 sm:$0xff]   ;;  %v2928_v52 = vld [vmem:[%s4021_s1 + $0x564] ss:$16 sps:$4 sm:$0xff]  }
  0x70   :  { %1676 = vmatprep.subr.bf16.mxu0 %v2836_v53  ;;  %1840 = vmatprep.subr.bf16.mxu1 %v2839_v54  ;;  %v2931_v53 = vld [vmem:[%s4021_s1 + $0x56c] ss:$16 sps:$4 sm:$0xff]   ;;  %v2926_v54 = vld [vmem:[%s4021_s1 + $0x560] ss:$16 sps:$4 sm:$0xff]  }
  0x73   :  { %1677 = vmatpush1.bf16.msra.mxu0 %v2834_v55  ;;  %1841 = vmatpush1.bf16.msra.mxu1 %v2837_v56  ;;  %v2929_v55 = vld [vmem:[%s4021_s1 + $0x568] ss:$16 sps:$4 sm:$0xff]   ;;  %v2934_v56 = vld [vmem:[%s4021_s1 + $0x584] ss:$16 sps:$4 sm:$0xff]  }
  0x74   :  { %1678 = vmatprep.subr.bf16.mxu0 %v2842_v57  ;;  %1842 = vmatprep.subr.bf16.mxu1 %v2845_v58  ;;  %v2937_v57 = vld [vmem:[%s4021_s1 + $0x58c] ss:$16 sps:$4 sm:$0xff]   ;;  %v2932_v58 = vld [vmem:[%s4021_s1 + $0x580] ss:$16 sps:$4 sm:$0xff]  }
  0x77   :  { %1679 = vmatpush1.bf16.msra.mxu0 %v2840_v59  ;;  %1843 = vmatpush1.bf16.msra.mxu1 %v2843_v60  ;;  %v2935_v59 = vld [vmem:[%s4021_s1 + $0x588] ss:$16 sps:$4 sm:$0xff]   ;;  %v2940_v60 = vld [vmem:[%s4021_s1 + $0x5a4] ss:$16 sps:$4 sm:$0xff]  }
  0x78   :  { %1680 = vmatprep.subr.bf16.mxu0 %v2848_v61  ;;  %1844 = vmatprep.subr.bf16.mxu1 %v2851_v62  ;;  %v2943_v61 = vld [vmem:[%s4021_s1 + $0x5ac] ss:$16 sps:$4 sm:$0xff]   ;;  %v2938_v62 = vld [vmem:[%s4021_s1 + $0x5a0] ss:$16 sps:$4 sm:$0xff]  }
  0x7b   :  { %1681 = vmatpush1.bf16.msra.mxu0 %v2846_v63  ;;  %1845 = vmatpush1.bf16.msra.mxu1 %v2849_v0  ;;  %v2941_v63 = vld [vmem:[%s4021_s1 + $0x5a8] ss:$16 sps:$4 sm:$0xff]   ;;  %v2946_v0 = vld [vmem:[%s4021_s1 + $0x5c4] ss:$16 sps:$4 sm:$0xff]  }
  0x7c   :  { %1682 = vmatprep.subr.bf16.mxu0 %v2854_v1  ;;  %1846 = vmatprep.subr.bf16.mxu1 %v2857_v2  ;;  %v2949_v1 = vld [vmem:[%s4021_s1 + $0x5cc] ss:$16 sps:$4 sm:$0xff]   ;;  %v2944_v2 = vld [vmem:[%s4021_s1 + $0x5c0] ss:$16 sps:$4 sm:$0xff]  }
  0x7f   :  { %1683 = vmatpush1.bf16.msra.mxu0 %v2852_v3  ;;  %1847 = vmatpush1.bf16.msra.mxu1 %v2855_v4  ;;  %v2947_v3 = vld [vmem:[%s4021_s1 + $0x5c8] ss:$16 sps:$4 sm:$0xff]   ;;  %v2952_v4 = vld [vmem:[%s4021_s1 + $0x5e4] ss:$16 sps:$4 sm:$0xff]  }
  0x80   :  { %1693 = vmatprep.subr.bf16.mxu0 %v2862_v5  ;;  %1857 = vmatprep.subr.bf16.mxu1 %v2865_v6  ;;  %v2955_v5 = vld [vmem:[%s4021_s1 + $0x5ec] ss:$16 sps:$4 sm:$0xff]   ;;  %v2950_v6 = vld [vmem:[%s4021_s1 + $0x5e0] ss:$16 sps:$4 sm:$0xff]  }
  0x82   :  { %1685 = vmatmul.mubr.bf16.vlgmr.msra.gmra.mrb[0].mxu0 %v2297_v7  ;;  %1849 = vmatmul.mubr.bf16.vlgmr.msra.gmra.mrb[0].mxu1 %v2297_v7  ;;  %v2953_v7 = vld [vmem:[%s4021_s1 + $0x5e8] ss:$16 sps:$4 sm:$0xff]  }
  0x83   :  { %1694 = vmatpush1.bf16.msra.mxu0 %v2860_v8  ;;  %1858 = vmatpush1.bf16.msra.mxu1 %v2863_v9  ;;  %v2960_v8 = vld [vmem:[%s4021_s1 + $0x604] ss:$16 sps:$4 sm:$0xff]   ;;  %v2963_v9 = vld [vmem:[%s4021_s1 + $0x60c] ss:$16 sps:$4 sm:$0xff]  }
  0x84   :  { %1695 = vmatprep.subr.bf16.mxu0 %v2868_v10  ;;  %1859 = vmatprep.subr.bf16.mxu1 %v2871_v12  ;;  %v2958_v10 = vld [vmem:[%s4021_s1 + $0x600] ss:$16 sps:$4 sm:$0xff]   ;;  %v2961_v12 = vld [vmem:[%s4021_s1 + $0x608] ss:$16 sps:$4 sm:$0xff]  }
  0x85   :  { %1725 = vmatprep.mubr.bf16.mxu0 %v2300_v13  ;;  %1889 = vmatprep.mubr.bf16.mxu1 %v2300_v13  ;;  %v2299_v13 = vcombine.low %v3532_v11, %v3532_v11  ;;  %v2964_v11 = vld [vmem:[%s4021_s1 + $0x620] ss:$16 sps:$4 sm:$0xff]  }
  0x87   :  { %1696 = vmatpush1.bf16.msra.mxu0 %v2866_v14  ;;  %1860 = vmatpush1.bf16.msra.mxu1 %v2869_v15  ;;  %v3730_v14 = vld [vmem:[%s4022_s0 + $0x18] sm:$0xff]  ;;  %v2966_v15 = vld [vmem:[%s4021_s1 + $0x624] ss:$16 sps:$4 sm:$0xff]  }
  0x88   :  { %1697 = vmatprep.subr.bf16.mxu0 %v2874_v16  ;;  %1861 = vmatprep.subr.bf16.mxu1 %v2877_v17  ;;  %v2969_v16 = vld [vmem:[%s4021_s1 + $0x62c] ss:$16 sps:$4 sm:$0xff]   ;;  %v2967_v17 = vld [vmem:[%s4021_s1 + $0x628] ss:$16 sps:$4 sm:$0xff]  }
  0x8b   :  { %1698 = vmatpush1.bf16.msra.mxu0 %v2872_v18  ;;  %1862 = vmatpush1.bf16.msra.mxu1 %v2875_v19  ;;  %v2302_v18 = vcombine.high %v3730_v14, %v3730_v14  ;;  %v2972_v19 = vld [vmem:[%s4021_s1 + $0x644] ss:$16 sps:$4 sm:$0xff]  }
  0x8c   :  { %1699 = vmatprep.subr.bf16.mxu0 %v2880_v20  ;;  %1863 = vmatprep.subr.bf16.mxu1 %v2883_v21  ;;  %v2975_v20 = vld [vmem:[%s4021_s1 + $0x64c] ss:$16 sps:$4 sm:$0xff]   ;;  %v2970_v21 = vld [vmem:[%s4021_s1 + $0x640] ss:$16 sps:$4 sm:$0xff]  }
  0x8f   :  { %1700 = vmatpush1.bf16.msra.mxu0 %v2878_v22  ;;  %1864 = vmatpush1.bf16.msra.mxu1 %v2881_v23  ;;  %v2973_v22 = vld [vmem:[%s4021_s1 + $0x648] ss:$16 sps:$4 sm:$0xff]   ;;  %v2978_v23 = vld [vmem:[%s4021_s1 + $0x664] ss:$16 sps:$4 sm:$0xff]  }
  0x90   :  { %1701 = vmatprep.subr.bf16.mxu0 %v2886_v24  ;;  %1865 = vmatprep.subr.bf16.mxu1 %v2889_v25  ;;  %v2981_v24 = vld [vmem:[%s4021_s1 + $0x66c] ss:$16 sps:$4 sm:$0xff]   ;;  %v2976_v25 = vld [vmem:[%s4021_s1 + $0x660] ss:$16 sps:$4 sm:$0xff]  }
  0x93   :  { %1702 = vmatpush1.bf16.msra.mxu0 %v2884_v26  ;;  %1866 = vmatpush1.bf16.msra.mxu1 %v2887_v27  ;;  %v2979_v26 = vld [vmem:[%s4021_s1 + $0x668] ss:$16 sps:$4 sm:$0xff]   ;;  %v2984_v27 = vld [vmem:[%s4021_s1 + $0x684] ss:$16 sps:$4 sm:$0xff]  }
  0x94   :  { %1703 = vmatprep.subr.bf16.mxu0 %v2892_v28  ;;  %1867 = vmatprep.subr.bf16.mxu1 %v2895_v29  ;;  %v2987_v28 = vld [vmem:[%s4021_s1 + $0x68c] ss:$16 sps:$4 sm:$0xff]   ;;  %v2982_v29 = vld [vmem:[%s4021_s1 + $0x680] ss:$16 sps:$4 sm:$0xff]  }
  0x97   :  { %1704 = vmatpush1.bf16.msra.mxu0 %v2890_v30  ;;  %1868 = vmatpush1.bf16.msra.mxu1 %v2893_v31  ;;  %v2985_v30 = vld [vmem:[%s4021_s1 + $0x688] ss:$16 sps:$4 sm:$0xff]   ;;  %v2990_v31 = vld [vmem:[%s4021_s1 + $0x6a4] ss:$16 sps:$4 sm:$0xff]  }
  0x98   :  { %1705 = vmatprep.subr.bf16.mxu0 %v2898_v32  ;;  %1869 = vmatprep.subr.bf16.mxu1 %v2901_v33  ;;  %v2993_v32 = vld [vmem:[%s4021_s1 + $0x6ac] ss:$16 sps:$4 sm:$0xff]   ;;  %v2988_v33 = vld [vmem:[%s4021_s1 + $0x6a0] ss:$16 sps:$4 sm:$0xff]  }
  0x9b   :  { %1706 = vmatpush1.bf16.msra.mxu0 %v2896_v34  ;;  %1870 = vmatpush1.bf16.msra.mxu1 %v2899_v35  ;;  %v2991_v34 = vld [vmem:[%s4021_s1 + $0x6a8] ss:$16 sps:$4 sm:$0xff]   ;;  %v2996_v35 = vld [vmem:[%s4021_s1 + $0x6c4] ss:$16 sps:$4 sm:$0xff]  }
  0x9c   :  { %1707 = vmatprep.subr.bf16.mxu0 %v2904_v36  ;;  %1871 = vmatprep.subr.bf16.mxu1 %v2907_v37  ;;  %v2999_v36 = vld [vmem:[%s4021_s1 + $0x6cc] ss:$16 sps:$4 sm:$0xff]   ;;  %v2994_v37 = vld [vmem:[%s4021_s1 + $0x6c0] ss:$16 sps:$4 sm:$0xff]  }
  0x9f   :  { %1708 = vmatpush1.bf16.msra.mxu0 %v2902_v38  ;;  %1872 = vmatpush1.bf16.msra.mxu1 %v2905_v39  ;;  %v2997_v38 = vld [vmem:[%s4021_s1 + $0x6c8] ss:$16 sps:$4 sm:$0xff]   ;;  %v3002_v39 = vld [vmem:[%s4021_s1 + $0x6e4] ss:$16 sps:$4 sm:$0xff]  }
  0xa0   :  { %1709 = vmatprep.subr.bf16.mxu0 %v2910_v40  ;;  %1873 = vmatprep.subr.bf16.mxu1 %v2913_v41  ;;  %v3005_v40 = vld [vmem:[%s4021_s1 + $0x6ec] ss:$16 sps:$4 sm:$0xff]   ;;  %v3000_v41 = vld [vmem:[%s4021_s1 + $0x6e0] ss:$16 sps:$4 sm:$0xff]  }
  0xa3   :  { %1710 = vmatpush1.bf16.msra.mxu0 %v2908_v42  ;;  %1874 = vmatpush1.bf16.msra.mxu1 %v2911_v43  ;;  %v3003_v42 = vld [vmem:[%s4021_s1 + $0x6e8] ss:$16 sps:$4 sm:$0xff]   ;;  %v3008_v43 = vld [vmem:[%s4021_s1 + $0x704] ss:$16 sps:$4 sm:$0xff]  }
  0xa4   :  { %1711 = vmatprep.subr.bf16.mxu0 %v2916_v44  ;;  %1875 = vmatprep.subr.bf16.mxu1 %v2919_v45  ;;  %v3011_v44 = vld [vmem:[%s4021_s1 + $0x70c] ss:$16 sps:$4 sm:$0xff]   ;;  %v3006_v45 = vld [vmem:[%s4021_s1 + $0x700] ss:$16 sps:$4 sm:$0xff]  }
  0xa7   :  { %1712 = vmatpush1.bf16.msra.mxu0 %v2914_v46  ;;  %1876 = vmatpush1.bf16.msra.mxu1 %v2917_v47  ;;  %v3009_v46 = vld [vmem:[%s4021_s1 + $0x708] ss:$16 sps:$4 sm:$0xff]   ;;  %v3014_v47 = vld [vmem:[%s4021_s1 + $0x724] ss:$16 sps:$4 sm:$0xff]  }
  0xa8   :  { %1713 = vmatprep.subr.bf16.mxu0 %v2922_v48  ;;  %1877 = vmatprep.subr.bf16.mxu1 %v2925_v49  ;;  %v3017_v48 = vld [vmem:[%s4021_s1 + $0x72c] ss:$16 sps:$4 sm:$0xff]   ;;  %v3012_v49 = vld [vmem:[%s4021_s1 + $0x720] ss:$16 sps:$4 sm:$0xff]  }
  0xab   :  { %1714 = vmatpush1.bf16.msra.mxu0 %v2920_v50  ;;  %1878 = vmatpush1.bf16.msra.mxu1 %v2923_v51  ;;  %v3015_v50 = vld [vmem:[%s4021_s1 + $0x728] ss:$16 sps:$4 sm:$0xff]   ;;  %v3020_v51 = vld [vmem:[%s4021_s1 + $0x744] ss:$16 sps:$4 sm:$0xff]  }
  0xac   :  { %1715 = vmatprep.subr.bf16.mxu0 %v2928_v52  ;;  %1879 = vmatprep.subr.bf16.mxu1 %v2931_v53  ;;  %v3023_v52 = vld [vmem:[%s4021_s1 + $0x74c] ss:$16 sps:$4 sm:$0xff]   ;;  %v3018_v53 = vld [vmem:[%s4021_s1 + $0x740] ss:$16 sps:$4 sm:$0xff]  }
  0xaf   :  { %1716 = vmatpush1.bf16.msra.mxu0 %v2926_v54  ;;  %1880 = vmatpush1.bf16.msra.mxu1 %v2929_v55  ;;  %v3021_v54 = vld [vmem:[%s4021_s1 + $0x748] ss:$16 sps:$4 sm:$0xff]   ;;  %v3026_v55 = vld [vmem:[%s4021_s1 + $0x764] ss:$16 sps:$4 sm:$0xff]  }
  0xb0   :  { %1717 = vmatprep.subr.bf16.mxu0 %v2934_v56  ;;  %1881 = vmatprep.subr.bf16.mxu1 %v2937_v57  ;;  %v3029_v56 = vld [vmem:[%s4021_s1 + $0x76c] ss:$16 sps:$4 sm:$0xff]   ;;  %v3024_v57 = vld [vmem:[%s4021_s1 + $0x760] ss:$16 sps:$4 sm:$0xff]  }
  0xb3   :  { %1718 = vmatpush1.bf16.msra.mxu0 %v2932_v58  ;;  %1882 = vmatpush1.bf16.msra.mxu1 %v2935_v59  ;;  %v3027_v58 = vld [vmem:[%s4021_s1 + $0x768] ss:$16 sps:$4 sm:$0xff]   ;;  %v3032_v59 = vld [vmem:[%s4021_s1 + $0x784] ss:$16 sps:$4 sm:$0xff]  }
  0xb4   :  { %1719 = vmatprep.subr.bf16.mxu0 %v2940_v60  ;;  %1883 = vmatprep.subr.bf16.mxu1 %v2943_v61  ;;  %v3035_v60 = vld [vmem:[%s4021_s1 + $0x78c] ss:$16 sps:$4 sm:$0xff]   ;;  %v3030_v61 = vld [vmem:[%s4021_s1 + $0x780] ss:$16 sps:$4 sm:$0xff]  }
  0xb7   :  { %1720 = vmatpush1.bf16.msra.mxu0 %v2938_v62  ;;  %1884 = vmatpush1.bf16.msra.mxu1 %v2941_v63  ;;  %v3033_v62 = vld [vmem:[%s4021_s1 + $0x788] ss:$16 sps:$4 sm:$0xff]   ;;  %v3038_v63 = vld [vmem:[%s4021_s1 + $0x7a4] ss:$16 sps:$4 sm:$0xff]  }
  0xb8   :  { %1721 = vmatprep.subr.bf16.mxu0 %v2946_v0  ;;  %1885 = vmatprep.subr.bf16.mxu1 %v2949_v1  ;;  %v3041_v0 = vld [vmem:[%s4021_s1 + $0x7ac] ss:$16 sps:$4 sm:$0xff]   ;;  %v3036_v1 = vld [vmem:[%s4021_s1 + $0x7a0] ss:$16 sps:$4 sm:$0xff]  }
  0xbb   :  { %1722 = vmatpush1.bf16.msra.mxu0 %v2944_v2  ;;  %1886 = vmatpush1.bf16.msra.mxu1 %v2947_v3  ;;  %v3039_v2 = vld [vmem:[%s4021_s1 + $0x7a8] ss:$16 sps:$4 sm:$0xff]   ;;  %v3044_v3 = vld [vmem:[%s4021_s1 + $0x7c4] ss:$16 sps:$4 sm:$0xff]  }
  0xbc   :  { %1723 = vmatprep.subr.bf16.mxu0 %v2952_v4  ;;  %1887 = vmatprep.subr.bf16.mxu1 %v2955_v5  ;;  %v3047_v4 = vld [vmem:[%s4021_s1 + $0x7cc] ss:$16 sps:$4 sm:$0xff]   ;;  %v3042_v5 = vld [vmem:[%s4021_s1 + $0x7c0] ss:$16 sps:$4 sm:$0xff]  }
  0xbf   :  { %1724 = vmatpush1.bf16.msra.mxu0 %v2950_v6  ;;  %1888 = vmatpush1.bf16.msra.mxu1 %v2953_v7  ;;  %v3045_v6 = vld [vmem:[%s4021_s1 + $0x7c8] ss:$16 sps:$4 sm:$0xff]   ;;  %v3050_v7 = vld [vmem:[%s4021_s1 + $0x7e4] ss:$16 sps:$4 sm:$0xff]  }
  0xc0   :  { %1734 = vmatprep.subr.bf16.mxu0 %v2960_v8  ;;  %1898 = vmatprep.subr.bf16.mxu1 %v2963_v9  ;;  %v3053_v8 = vld [vmem:[%s4021_s1 + $0x7ec] ss:$16 sps:$4 sm:$0xff]   ;;  %v3048_v9 = vld [vmem:[%s4021_s1 + $0x7e0] ss:$16 sps:$4 sm:$0xff]  }
  0xc2   :  { %1726 = vmatmul.mubr.bf16.vlgmr.msra.gmra.mrb[0].mxu0 %v2299_v13  ;;  %1890 = vmatmul.mubr.bf16.vlgmr.msra.gmra.mrb[0].mxu1 %v2299_v13  ;;  %v3057_v13 = vld [vmem:[%s4023_s3 + $0xc0] sm:$0xff]  }
  0xc3   :  { %1735 = vmatpush1.bf16.msra.mxu0 %v2958_v10  ;;  %1899 = vmatpush1.bf16.msra.mxu1 %v2961_v12  ;;  %v3051_v10 = vld [vmem:[%s4021_s1 + $0x7e8] ss:$16 sps:$4 sm:$0xff]   ;;  %v3056_v12 = vld [vmem:[%s4023_s3 + $0x40] sm:$0xff]  }
  0xc4   :  { %1736 = vmatprep.subr.bf16.mxu0 %v2966_v15  ;;  %1900 = vmatprep.subr.bf16.mxu1 %v2969_v16  ;;  %v2301_v15 = vcombine.low %v3730_v14, %v3730_v14  ;;  %v3058_v16 = vld [vmem:[%s4023_s3] sm:$0xff]   ;;  %v3061_v14 = vld [vmem:[%s4023_s3 + $0xc8] sm:$0xff]  }
  0xc5   :  { %1766 = vmatprep.mubr.bf16.mxu0 %v2302_v18  ;;  %1930 = vmatprep.mubr.bf16.mxu1 %v2302_v18  ;;  %v3062_v18 = vld [vmem:[%s4023_s3 + $0x8] sm:$0xff]  }
  0xc7   :  { %1737 = vmatpush1.bf16.msra.mxu0 %v2964_v11  ;;  %1901 = vmatpush1.bf16.msra.mxu1 %v2967_v17  ;;  %v3059_v11 = vld [vmem:[%s4023_s3 + $0x80] sm:$0xff]   ;;  %v3060_v17 = vld [vmem:[%s4023_s3 + $0x48] sm:$0xff]  }
  0xc8   :  { %1738 = vmatprep.subr.bf16.mxu0 %v2972_v19  ;;  %1902 = vmatprep.subr.bf16.mxu1 %v2975_v20  ;;  %v3063_v19 = vld [vmem:[%s4023_s3 + $0x88] sm:$0xff]   ;;  %v3064_v20 = vld [vmem:[%s4023_s3 + $0x50] sm:$0xff]  }
  0xcb   :  { %1739 = vmatpush1.bf16.msra.mxu0 %v2970_v21  ;;  %1903 = vmatpush1.bf16.msra.mxu1 %v2973_v22  ;;  %v3065_v21 = vld [vmem:[%s4023_s3 + $0xd0] sm:$0xff]  }
  0xcc   :  { %1740 = vmatprep.subr.bf16.mxu0 %v2978_v23  ;;  %1904 = vmatprep.subr.bf16.mxu1 %v2981_v24  ;;  %v3066_v22 = vld [vmem:[%s4023_s3 + $0x10] sm:$0xff]   ;;  %v3068_v24 = vld [vmem:[%s4023_s3 + $0x58] sm:$0xff]  }
  0xcd   :  { %v3067_v23 = vld [vmem:[%s4023_s3 + $0x90] sm:$0xff]  }
  0xcf   :  { %1741 = vmatpush1.bf16.msra.mxu0 %v2976_v25  ;;  %1905 = vmatpush1.bf16.msra.mxu1 %v2979_v26  ;;  %v3069_v25 = vld [vmem:[%s4023_s3 + $0xd8] sm:$0xff]  }
  0xd0   :  { %1742 = vmatprep.subr.bf16.mxu0 %v2984_v27  ;;  %1906 = vmatprep.subr.bf16.mxu1 %v2987_v28  ;;  %v3070_v26 = vld [vmem:[%s4023_s3 + $0x18] sm:$0xff]   ;;  %v3072_v28 = vld [vmem:[%s4023_s3 + $0x60] sm:$0xff]  }
  0xd1   :  { %v3071_v27 = vld [vmem:[%s4023_s3 + $0x98] sm:$0xff]  }
  0xd3   :  { %1743 = vmatpush1.bf16.msra.mxu0 %v2982_v29  ;;  %1907 = vmatpush1.bf16.msra.mxu1 %v2985_v30  ;;  %v3073_v29 = vld [vmem:[%s4023_s3 + $0xe0] sm:$0xff]  }
  0xd4   :  { %1744 = vmatprep.subr.bf16.mxu0 %v2990_v31  ;;  %1908 = vmatprep.subr.bf16.mxu1 %v2993_v32  ;;  %v3074_v30 = vld [vmem:[%s4023_s3 + $0x20] sm:$0xff]   ;;  %v3076_v32 = vld [vmem:[%s4023_s3 + $0x68] sm:$0xff]  }
  0xd5   :  { %v3075_v31 = vld [vmem:[%s4023_s3 + $0xa0] sm:$0xff]  }
  0xd7   :  { %1745 = vmatpush1.bf16.msra.mxu0 %v2988_v33  ;;  %1909 = vmatpush1.bf16.msra.mxu1 %v2991_v34  ;;  %v3077_v33 = vld [vmem:[%s4023_s3 + $0xe8] sm:$0xff]  }
  0xd8   :  { %1746 = vmatprep.subr.bf16.mxu0 %v2996_v35  ;;  %1910 = vmatprep.subr.bf16.mxu1 %v2999_v36  ;;  %v3078_v34 = vld [vmem:[%s4023_s3 + $0x28] sm:$0xff]   ;;  %v3080_v36 = vld [vmem:[%s4023_s3 + $0x70] sm:$0xff]  }
  0xd9   :  { %v3079_v35 = vld [vmem:[%s4023_s3 + $0xa8] sm:$0xff]  }
  0xdb   :  { %1747 = vmatpush1.bf16.msra.mxu0 %v2994_v37  ;;  %1911 = vmatpush1.bf16.msra.mxu1 %v2997_v38  ;;  %v3081_v37 = vld [vmem:[%s4023_s3 + $0xf0] sm:$0xff]  }
  0xdc   :  { %1748 = vmatprep.subr.bf16.mxu0 %v3002_v39  ;;  %1912 = vmatprep.subr.bf16.mxu1 %v3005_v40  ;;  %v3082_v38 = vld [vmem:[%s4023_s3 + $0x30] sm:$0xff]   ;;  %v3084_v40 = vld [vmem:[%s4023_s3 + $0x78] sm:$0xff]  }
  0xdd   :  { %v3083_v39 = vld [vmem:[%s4023_s3 + $0xb0] sm:$0xff]  }
  0xdf   :  { %1749 = vmatpush1.bf16.msra.mxu0 %v3000_v41  ;;  %1913 = vmatpush1.bf16.msra.mxu1 %v3003_v42  ;;  %v3085_v41 = vld [vmem:[%s4023_s3 + $0xf8] sm:$0xff]  }
  0xe0   :  { %1750 = vmatprep.subr.bf16.mxu0 %v3008_v43  ;;  %1914 = vmatprep.subr.bf16.mxu1 %v3011_v44  ;;  %v3086_v42 = vld [vmem:[%s4023_s3 + $0x38] sm:$0xff]   ;;  %v283_v44 = vlaneseq }
  0xe1   :  { %v3087_v43 = vld [vmem:[%s4023_s3 + $0xb8] sm:$0xff]  }
  0xe3   :  { %1751 = vmatpush1.bf16.msra.mxu0 %v3006_v45  ;;  %1915 = vmatpush1.bf16.msra.mxu1 %v3009_v46  ;;  %v284_v45 = vshrl.u32 %v283_v44, 7 }
  0xe4   :  { %1752 = vmatprep.subr.bf16.mxu0 %v3014_v47  ;;  %1916 = vmatprep.subr.bf16.mxu1 %v3017_v48  ;;  %v281_v48 = vld [vmem:[%s4024_s2] sm:$0xf] }
  0xe5   :  { %v285_v46 = vsub.s32 0, %v284_v45  ;;  %v293_v47 = vsub.s32 2, %v284_v45 }
  0xe7   :  { %1753 = vmatpush1.bf16.msra.mxu0 %v3012_v49  ;;  %1917 = vmatpush1.bf16.msra.mxu1 %v3015_v50  ;;  %v289_v49 = vsub.s32 1, %v284_v45  ;;  %v297_v50 = vsub.s32 3, %v284_v45 }
  0xe8   :  { %1754 = vmatprep.subr.bf16.mxu0 %v3020_v51  ;;  %1918 = vmatprep.subr.bf16.mxu1 %v3023_v52  ;;  %v286_v51 = vrot.slane %v281_v48, %v285_v46  ;;  %v294_v52 = vrot.slane %v281_v48, %v293_v47 }
  0xeb   :  { %1755 = vmatpush1.bf16.msra.mxu0 %v3018_v53  ;;  %1919 = vmatpush1.bf16.msra.mxu1 %v3021_v54  ;;  %v290_v53 = vrot.slane %v281_v48, %v289_v49  ;;  %v298_v54 = vrot.slane %v281_v48, %v297_v50 }
  0xec   :  { %1756 = vmatprep.subr.bf16.mxu0 %v3026_v55  ;;  %1920 = vmatprep.subr.bf16.mxu1 %v3029_v56 }
  0xef   :  { %1757 = vmatpush1.bf16.msra.mxu0 %v3024_v57  ;;  %1921 = vmatpush1.bf16.msra.mxu1 %v3027_v58 }
  0xf0   :  { %1758 = vmatprep.subr.bf16.mxu0 %v3032_v59  ;;  %1922 = vmatprep.subr.bf16.mxu1 %v3035_v60 }
  0xf3   :  { %1759 = vmatpush1.bf16.msra.mxu0 %v3030_v61  ;;  %1923 = vmatpush1.bf16.msra.mxu1 %v3033_v62 }
  0xf4   :  { %1760 = vmatprep.subr.bf16.mxu0 %v3038_v63  ;;  %1924 = vmatprep.subr.bf16.mxu1 %v3041_v0 }
  0xf7   :  { %1761 = vmatpush1.bf16.msra.mxu0 %v3036_v1  ;;  %1925 = vmatpush1.bf16.msra.mxu1 %v3039_v2 }
  0xf8   :  { %1762 = vmatprep.subr.bf16.mxu0 %v3044_v3  ;;  %1926 = vmatprep.subr.bf16.mxu1 %v3047_v4 }
  0xfb   :  { %1763 = vmatpush1.bf16.msra.mxu0 %v3042_v5  ;;  %1927 = vmatpush1.bf16.msra.mxu1 %v3045_v6 }
  0xfc   :  { %1764 = vmatprep.subr.bf16.mxu0 %v3050_v7  ;;  %1928 = vmatprep.subr.bf16.mxu1 %v3053_v8 }
  0xff   :  { %1765 = vmatpush1.bf16.msra.mxu0 %v3048_v9  ;;  %1929 = vmatpush1.bf16.msra.mxu1 %v3051_v10 }
 0x100   :  { %2592 = vmatprep.subr.bf16.mxu0 %v3056_v12  ;;  %2614 = vmatprep.subr.bf16.mxu1 %v3057_v13 }
 0x102   :  { %1767 = vmatmul.mubr.bf16.vlgmr.msra.gmra.mrb[0].mxu0 %v2301_v15  ;;  %1931 = vmatmul.mubr.bf16.vlgmr.msra.gmra.mrb[0].mxu1 %v2301_v15  ;;  %v2559_v15 = vld [vmem:[%s4025_s4] ss:$0 sm:$0xff] }
 0x103   :  { %2593 = vmatpush3.bf16.msra.mxu0 %v3058_v16  ;;  %2615 = vmatpush3.bf16.msra.mxu1 %v3059_v11 }
 0x104   :  { %2594 = vmatprep.subr.bf16.mxu0 %v3060_v17  ;;  %2616 = vmatprep.subr.bf16.mxu1 %v3061_v14 }
 0x107   :  { %2595 = vmatpush3.bf16.msra.mxu0 %v3062_v18  ;;  %2617 = vmatpush3.bf16.msra.mxu1 %v3063_v19 }
 0x108   :  { %2596 = vmatprep.subr.bf16.mxu0 %v3064_v20  ;;  %2618 = vmatprep.subr.bf16.mxu1 %v3065_v21 }
 0x10b   :  { %2597 = vmatpush3.bf16.msra.mxu0 %v3066_v22  ;;  %2619 = vmatpush3.bf16.msra.mxu1 %v3067_v23 }
 0x10c   :  { %2598 = vmatprep.subr.bf16.mxu0 %v3068_v24  ;;  %2620 = vmatprep.subr.bf16.mxu1 %v3069_v25 }
 0x10f   :  { %2599 = vmatpush3.bf16.msra.mxu0 %v3070_v26  ;;  %2621 = vmatpush3.bf16.msra.mxu1 %v3071_v27 }
 0x110   :  { %2600 = vmatprep.subr.bf16.mxu0 %v3072_v28  ;;  %2622 = vmatprep.subr.bf16.mxu1 %v3073_v29 }
 0x113   :  { %2601 = vmatpush3.bf16.msra.mxu0 %v3074_v30  ;;  %2623 = vmatpush3.bf16.msra.mxu1 %v3075_v31 }
 0x114   :  { %2602 = vmatprep.subr.bf16.mxu0 %v3076_v32  ;;  %2624 = vmatprep.subr.bf16.mxu1 %v3077_v33 }
 0x117   :  { %2603 = vmatpush3.bf16.msra.mxu0 %v3078_v34  ;;  %2625 = vmatpush3.bf16.msra.mxu1 %v3079_v35 }
 0x118   :  { %2604 = vmatprep.subr.bf16.mxu0 %v3080_v36  ;;  %2626 = vmatprep.subr.bf16.mxu1 %v3081_v37 }
 0x11b   :  { %2605 = vmatpush3.bf16.msra.mxu0 %v3082_v38  ;;  %2627 = vmatpush3.bf16.msra.mxu1 %v3083_v39 }
 0x11c   :  { %2606 = vmatprep.subr.bf16.mxu0 %v3084_v40  ;;  %2628 = vmatprep.subr.bf16.mxu1 %v3085_v41 }
 0x11f   :  { %2607 = vmatpush3.bf16.msra.mxu0 %v3086_v42  ;;  %2629 = vmatpush3.bf16.msra.mxu1 %v3087_v43 }
 0x1d5   :  { %v1768_v55 = vpop.f32.mrb[0].mxu0  ;;  %v1932_v56 = vpop.f32.mrb[0].mxu1 }
 0x1d6   :  { %v2636_v57 = vadd.f32 %v1768_v55, %v286_v51  ;;  %v2638_v58 = vadd.f32 %v1932_v56, %v294_v52  ;;  %v1770_v59 = vpop.f32.mrb[1].mxu0  ;;  %v1934_v60 = vpop.f32.mrb[1].mxu1 }
 0x1d7   :  { %v2637_v61 = vadd.f32 %v1770_v59, %v290_v53  ;;  %v2639_v62 = vadd.f32 %v1934_v60, %v298_v54  ;;  %v1772_v63 = vpop.f32.mrb[2].mxu0  ;;  %v1936_v0 = vpop.f32.mrb[2].mxu1 }
 0x1d8   :  { %v1939_v1 = vmax.f32 %v2636_v57, 0.0  ;;  %v1941_v2 = vmax.f32 %v2638_v58, 0.0  ;;  %v1773_v3 = vpop.f32.mrb[3].mxu0  ;;  %v1937_v4 = vpop.f32.mrb[3].mxu1 }
 0x1d9   :  { %v1940_v5 = vmax.f32 %v2637_v61, 0.0  ;;  %v1942_v6 = vmax.f32 %v2639_v62, 0.0 }
 0x1da   :  { %v1943_v9 = vpack.c.bf16 %v1939_v1, %v1939_v1  ;;  %v1945_v10 = vpack.c.bf16 %v1941_v2, %v1941_v2 }
 0x1db   :  { %v1944_v7 = vpack.c.bf16 %v1940_v5, %v1940_v5  ;;  %v1946_v8 = vpack.c.bf16 %v1942_v6, %v1942_v6 }
 0x1dd   :  { %2242 = vmatprep.mubr.bf16.mxu0 %v1944_v7  ;;  %2282 = vmatprep.mubr.bf16.mxu1 %v1946_v8 }
 0x1de   :  { %2243 = vmatmul.mubr.bf16.vlgmr.msra.gmra.mrb[4].mxu0 %v1943_v9  ;;  %2283 = vmatmul.mubr.bf16.vlgmr.msra.gmra.mrb[4].mxu1 %v1945_v10 }
 0x2b1   :  { %v2608_v12 = vpop.f32.mrb[4].mxu0  ;;  %v2630_v13 = vpop.f32.mrb[4].mxu1 }
 0x2b2   :  { %v2609_v16 = vpop.f32.mrb[5].mxu0  ;;  %v2631_v11 = vpop.f32.mrb[5].mxu1 }
 0x2b3   :  { %v2610_v17 = vadd.f32 %v2609_v16, %v2608_v12  ;;  %v2632_v14 = vadd.f32 %v2631_v11, %v2630_v13  ;;  %v2611_v18 = vpop.f32.mrb[6].mxu0  ;;  %v2633_v19 = vpop.f32.mrb[6].mxu1 }
 0x2b4   :  { %v2612_v20 = vpop.f32.mrb[7].mxu0  ;;  %v2634_v21 = vpop.f32.mrb[7].mxu1 }
 0x2b5   :  { %v2245_v22 = vadd.f32 %v2610_v17, %v2559_v15 }
 0x2b7   :  { %v2285_v23 = vadd.f32 %v2632_v14, %v2245_v22 }
 0x2b9   :  { %2290 = vst [vmem:[%s4026_s5] sm:$0xff] %v2285_v23 }

</bundles_post_ra>
